<compile_context>
chip_gen: v7x
topology: tpu7x:2x2x1
jax: 0.10.0
libtpu: 0.0.40
codegen_flags: <defaults>
</compile_context>

<pallas_src>
import numpy as np
import jax
import jax.numpy as jnp
from jax.experimental import pallas as pl
from jax.experimental.pallas import tpu as pltpu

FEATURE_LEN = 14                      # feature_length ([ds, de, a, j, ...]) — also car_feature size
LAYERS = 3
PLEN = FEATURE_LEN * 2 ** LAYERS      # 112
CAR_FEATURE = 14
HIDDEN = 150
LN_EPS = 1e-5
AGENT_VECTOR_IDX = 19                 # reference: agent_his_traj = x[:, 19, :]
NEG_BIG = -1e30

_VMEM = pl.BlockSpec(memory_space=pltpu.MemorySpace.VMEM)


def _layer_norm(x, gamma, beta):
    mean = jnp.mean(x, axis=-1, keepdims=True)
    var = jnp.mean(jnp.square(x - mean), axis=-1, keepdims=True)
    return (x - mean) * jax.lax.rsqrt(var + LN_EPS) * gamma + beta


def _dot(a, b):
    return jnp.dot(a, b, preferred_element_type=jnp.float32)


def _segment_max(x, neg_mask3):
    # x: [R, C]; neg_mask3: [S, R, 1] additive mask (0 = member, -1e30 = non-member) -> [S, C]
    return jnp.max(x[None, :, :] + neg_mask3, axis=1)


# --------------------------- Fused forward kernel ---------------------------
def fused_vectornet_kernel(
        # data & host-built index / mask matrices
        x_ref,        # [B*vNum, F]        all vectors, flattened over (batch, node)
        seg_sel_ref,  # [B*vNum, B*nPoly]  node <- its polyline (scatter matrix, 0/1)
        neg_seg_ref,  # [B*nPoly, B*vNum, 1] additive mask for per-polyline max-pool
        neg_pb_ref,   # [B, B*nPoly]       additive mask: batch b attends only to its polylines
        q_sel_ref,    # [B, B*nPoly]       query-polyline selector (polyline 0 of each batch)
        ag_sel_ref,   # [B, B*vNum]        agent-history-vector selector (vector #19 of each batch)
        # SubGraph params (3 layers; concat([enc, agg]) realized via split weights w*a / w*b)
        sw1_ref, sb1_ref, sg1_ref, sbe1_ref,
        sw2a_ref, sw2b_ref, sb2_ref, sg2_ref, sbe2_ref,
        sw3a_ref, sw3b_ref, sb3_ref, sg3_ref, sbe3_ref,
        # Global-graph attention params (weights pre-folded because P = [agg3, agg3])
        wq_ref, bq_ref, wk_ref, bk_ref, wv_ref, bv_ref,
        # target-prediction MLP params (first Linear split ctx/agent to avoid a lane concat)
        mw1a_ref, mw1b_ref, mb1_ref, mg1_ref, mbe1_ref,
        mw2_ref, mb2_ref, mg2_ref, mbe2_ref,
        mw3_ref, mb3_ref,
        # output
        o_ref):       # [B, 2]
    F = x_ref.shape[-1]

    # zero the polyline-id feature column (reference does this in-place under no_grad)
    col = jax.lax.broadcasted_iota(jnp.int32, (1, F), 1)
    x = jnp.where(col < F - 1, x_ref[...], 0.0)                                   # [BN, F]

    seg_sel = seg_sel_ref[...]
    neg_seg = neg_seg_ref[...]

    # ---- SubGraph: one GEMM per layer over ALL nodes of ALL polylines and batches ----
    z = _dot(x, sw1_ref[...]) + sb1_ref[...]
    enc1 = jnp.maximum(_layer_norm(z, sg1_ref[...], sbe1_ref[...]), 0.0)          # [BN, F]
    agg1 = _segment_max(enc1, neg_seg)                                            # [BP, F]

    z = (_dot(enc1, sw2a_ref[...]) + _dot(seg_sel, _dot(agg1, sw2b_ref[...]))
         + sb2_ref[...])
    enc2 = jnp.maximum(_layer_norm(z, sg2_ref[...], sbe2_ref[...]), 0.0)          # [BN, 2F]
    agg2 = _segment_max(enc2, neg_seg)                                            # [BP, 2F]

    z = (_dot(enc2, sw3a_ref[...]) + _dot(seg_sel, _dot(agg2, sw3b_ref[...]))
         + sb3_ref[...])
    enc3 = jnp.maximum(_layer_norm(z, sg3_ref[...], sbe3_ref[...]), 0.0)          # [BN, 4F]
    agg3 = _segment_max(enc3, neg_seg)                                            # [BP, 4F]
    # polyline feature P = concat([agg3, agg3]); attention weights are folded so agg3 is used directly

    # ---- Global graph: scaled-dot-product attention, agent polyline as query ----
    # TODO(synk): query polyline assumed to be polyline 0 (holds the [id,0,...,0] vector).
    k = _dot(agg3, wk_ref[...]) + bk_ref[...]                                     # [BP, PLEN]
    v = _dot(agg3, wv_ref[...]) + bv_ref[...]                                     # [BP, PLEN]
    q = _dot(_dot(q_sel_ref[...], agg3), wq_ref[...]) + bq_ref[...]               # [B, PLEN]
    scale = 1.0 / float(np.sqrt(PLEN))
    s = jax.lax.dot_general(q, k, (((1,), (1,)), ((), ())),
                            preferred_element_type=jnp.float32) * scale           # [B, BP]
    s = s + neg_pb_ref[...]                                 # mask out other batches' polylines
    m = jnp.max(s, axis=-1, keepdims=True)                                        # [B, 1]
    e = jnp.exp(s - m)                                                            # [B, BP]
    attn = e / jnp.sum(e, axis=-1, keepdims=True)                                 # [B, BP]
    ctx = _dot(attn, v)                                                           # [B, PLEN]

    # ---- target prediction MLP on concat([ctx, agent_his]) (concat via split first weight) ----
    agent = _dot(ag_sel_ref[...], x)                                              # [B, F]
    h = _dot(ctx, mw1a_ref[...]) + _dot(agent, mw1b_ref[...]) + mb1_ref[...]
    h = jnp.maximum(_layer_norm(h, mg1_ref[...], mbe1_ref[...]), 0.0)             # [B, HIDDEN]
    h = _dot(h, mw2_ref[...]) + mb2_ref[...]
    h = jnp.maximum(_layer_norm(h, mg2_ref[...], mbe2_ref[...]), 0.0)             # [B, HIDDEN]
    o_ref[...] = _dot(h, mw3_ref[...]) + mb3_ref[...]                             # [B, 2]


# --------------------------- Host-side helpers ---------------------------
def build_aux(pids, B, vNum):
    """Build the segment / selection mask matrices from the (host) polyline ids."""
    pids = np.asarray(pids)
    intervals = [0]
    last = pids[0]
    for i in range(vNum):
        if last != pids[i]:
            last = pids[i]
            intervals.append(i)
    intervals.append(vNum)
    nPoly = len(intervals) - 1
    BN, BP = B * vNum, B * nPoly

    seg_sel = np.zeros((BN, BP), np.float32)                 # node -> its polyline (one-hot cols)
    for b in range(B):
        for p in range(nPoly):
            s, e = intervals[p], intervals[p + 1]
            seg_sel[b * vNum + s: b * vNum + e, b * nPoly + p] = 1.0
    neg_seg = np.where(seg_sel.T[:, :, None] > 0.5, 0.0, NEG_BIG).astype(np.float32)  # [BP, BN, 1]

    pb = np.zeros((B, BP), np.float32)                       # batch -> its polyline rows
    for b in range(B):
        pb[b, b * nPoly:(b + 1) * nPoly] = 1.0
    neg_pb = np.where(pb > 0.5, 0.0, NEG_BIG).astype(np.float32)                      # [B, BP]

    q_sel = np.zeros((B, BP), np.float32)
    q_sel[np.arange(B), np.arange(B) * nPoly] = 1.0          # polyline 0 of each batch

    ag_sel = np.zeros((B, BN), np.float32)
    ag_sel[np.arange(B), np.arange(B) * vNum + AGENT_VECTOR_IDX] = 1.0

    return seg_sel, neg_seg, neg_pb, q_sel, ag_sel


def vector_net_target_pred(x, params, pids=None):
    x = jnp.asarray(x, jnp.float32)
    B, vNum, F = x.shape
    if pids is None:
        # same data-dependent host control flow as the PyTorch reference (one readback)
        pids = np.asarray(jax.device_get(x))[0, :, -1]
    seg_sel, neg_seg, neg_pb, q_sel, ag_sel = build_aux(pids, B, vNum)

    x2d = x.reshape(B * vNum, F)
    sp, ap, mp = params['sub'], params['attn'], params['mlp']
    args = (x2d,
            jnp.asarray(seg_sel), jnp.asarray(neg_seg), jnp.asarray(neg_pb),
            jnp.asarray(q_sel), jnp.asarray(ag_sel),
            sp['w1'], sp['b1'], sp['g1'], sp['be1'],
            sp['w2a'], sp['w2b'], sp['b2'], sp['g2'], sp['be2'],
            sp['w3a'], sp['w3b'], sp['b3'], sp['g3'], sp['be3'],
            ap['wq'], ap['bq'], ap['wk'], ap['bk'], ap['wv'], ap['bv'],
            mp['w1a'], mp['w1b'], mp['b1'], mp['g1'], mp['be1'],
            mp['w2'], mp['b2'], mp['g2'], mp['be2'],
            mp['w3'], mp['b3'])

    return pl.pallas_call(
        fused_vectornet_kernel,
        out_shape=jax.ShapeDtypeStruct((B, 2), jnp.float32),
        in_specs=[_VMEM] * len(args),       # derived from args -> lengths always match
        out_specs=_VMEM,
    )(*args)


# --------------------------- Parameter init (deterministic, synthetic) ---------------------------
def init_params(key):
    keys = iter(jax.random.split(key, 9))

    def linear(fin, fout):
        k1, k2 = jax.random.split(next(keys))
        bound = 1.0 / np.sqrt(fin)
        w = jax.random.uniform(k1, (fin, fout), jnp.float32, -bound, bound)
        b = jax.random.uniform(k2, (1, fout), jnp.float32, -bound, bound)
        return w, b

    def ln(d):
        return jnp.ones((1, d), jnp.float32), jnp.zeros((1, d), jnp.float32)

    F = FEATURE_LEN
    # SubGraph node encoders (feature width doubles each layer via concat with the pooled feature)
    w1, b1 = linear(F, F);           g1, be1 = ln(F)
    w2, b2 = linear(2 * F, 2 * F);   g2, be2 = ln(2 * F)
    w3, b3 = linear(4 * F, 4 * F);   g3, be3 = ln(4 * F)
    sub = dict(w1=w1, b1=b1, g1=g1, be1=be1,
               w2a=w2[:F], w2b=w2[F:], b2=b2, g2=g2, be2=be2,
               w3a=w3[:2 * F], w3b=w3[2 * F:], b3=b3, g3=g3, be3=be3)

    # Global-graph attention: polyline feature is [agg3, agg3] (identical halves), so fold
    # W[:4F] + W[4F:] once — exactly equivalent, and the kernel consumes agg3 [*, 4F] directly.
    def folded_linear():
        w, b = linear(PLEN, PLEN)
        return w[:4 * F] + w[4 * F:], b
    wq, bq = folded_linear()
    wk, bk = folded_linear()
    wv, bv = folded_linear()
    attn = dict(wq=wq, bq=bq, wk=wk, bk=bk, wv=wv, bv=bv)

    # targetPred MLP; first Linear split into [PLEN | CAR_FEATURE] rows to avoid a lane concat.
    tw1, tb1 = linear(PLEN + CAR_FEATURE, HIDDEN); tg1, tbe1 = ln(HIDDEN)
    tw2, tb2 = linear(HIDDEN, HIDDEN);             tg2, tbe2 = ln(HIDDEN)
    tw3, tb3 = linear(HIDDEN, 2)
    mlp = dict(w1a=tw1[:PLEN], w1b=tw1[PLEN:], b1=tb1, g1=tg1, be1=tbe1,
               w2=tw2, b2=tb2, g2=tg2, be2=tbe2, w3=tw3, b3=tb3)
    return dict(sub=sub, attn=attn, mlp=mlp)


if __name__ == "__main__":
    B, vNum = 2, 24
    key = jax.random.PRNGKey(0)
    kx, kp = jax.random.split(key)

    x = jax.random.normal(kx, (B, vNum, FEATURE_LEN), jnp.float32)
    # sorted polyline ids in the last feature: [0 | 1x8 | 2x8 | 3x7]
    pids = np.concatenate([np.zeros(1), np.ones(8), np.full(8, 2.0), np.full(7, 3.0)]).astype(np.float32)
    x = x.at[:, :, -1].set(jnp.asarray(pids)[None, :])
    # first vector is [id, 0, ..., 0]
    first_vec = jnp.zeros((B, FEATURE_LEN), jnp.float32).at[:, 0].set(3.0)
    x = x.at[:, 0, :].set(first_vec)

    params = init_params(kp)
    # pids passed as host numpy -> no device->host readback before kernel dispatch
    out = vector_net_target_pred(x, params, pids=pids)
    out = jax.block_until_ready(out)
    assert out.shape == (B, 2) and out.dtype == jnp.float32
    print("KERNEL_OK")
</pallas_src>

<mosaic_0001>
module attributes {stable_mosaic.version = 11 : i64} {
  func.func @fused_vectornet_kernel(%arg0: memref<48x14xf32, #tpu.memory_space<vmem>>, %arg1: memref<48x8xf32, #tpu.memory_space<vmem>>, %arg2: memref<8x48x1xf32, #tpu.memory_space<vmem>>, %arg3: memref<2x8xf32, #tpu.memory_space<vmem>>, %arg4: memref<2x8xf32, #tpu.memory_space<vmem>>, %arg5: memref<2x48xf32, #tpu.memory_space<vmem>>, %arg6: memref<14x14xf32, #tpu.memory_space<vmem>>, %arg7: memref<1x14xf32, #tpu.memory_space<vmem>>, %arg8: memref<1x14xf32, #tpu.memory_space<vmem>>, %arg9: memref<1x14xf32, #tpu.memory_space<vmem>>, %arg10: memref<14x28xf32, #tpu.memory_space<vmem>>, %arg11: memref<14x28xf32, #tpu.memory_space<vmem>>, %arg12: memref<1x28xf32, #tpu.memory_space<vmem>>, %arg13: memref<1x28xf32, #tpu.memory_space<vmem>>, %arg14: memref<1x28xf32, #tpu.memory_space<vmem>>, %arg15: memref<28x56xf32, #tpu.memory_space<vmem>>, %arg16: memref<28x56xf32, #tpu.memory_space<vmem>>, %arg17: memref<1x56xf32, #tpu.memory_space<vmem>>, %arg18: memref<1x56xf32, #tpu.memory_space<vmem>>, %arg19: memref<1x56xf32, #tpu.memory_space<vmem>>, %arg20: memref<56x112xf32, #tpu.memory_space<vmem>>, %arg21: memref<1x112xf32, #tpu.memory_space<vmem>>, %arg22: memref<56x112xf32, #tpu.memory_space<vmem>>, %arg23: memref<1x112xf32, #tpu.memory_space<vmem>>, %arg24: memref<56x112xf32, #tpu.memory_space<vmem>>, %arg25: memref<1x112xf32, #tpu.memory_space<vmem>>, %arg26: memref<112x150xf32, #tpu.memory_space<vmem>>, %arg27: memref<14x150xf32, #tpu.memory_space<vmem>>, %arg28: memref<1x150xf32, #tpu.memory_space<vmem>>, %arg29: memref<1x150xf32, #tpu.memory_space<vmem>>, %arg30: memref<1x150xf32, #tpu.memory_space<vmem>>, %arg31: memref<150x150xf32, #tpu.memory_space<vmem>>, %arg32: memref<1x150xf32, #tpu.memory_space<vmem>>, %arg33: memref<1x150xf32, #tpu.memory_space<vmem>>, %arg34: memref<1x150xf32, #tpu.memory_space<vmem>>, %arg35: memref<150x2xf32, #tpu.memory_space<vmem>>, %arg36: memref<1x2xf32, #tpu.memory_space<vmem>>, %arg37: memref<2x2xf32, #tpu.memory_space<vmem>>) attributes {dimension_semantics = [], scalar_prefetch = 0 : i64, scratch_operands = 0 : i64, tpu.core_type = #tpu.core_type<tc>} {
    %0 = tpu.iota {dimensions = array<i32: 1>} : vector<1x14xi32>
    %c13_i32 = arith.constant 13 : i32
    %1 = vector.broadcast %c13_i32 : i32 to vector<1x14xi32>
    %2 = arith.cmpi slt, %0, %1 : vector<1x14xi32>
    %c0 = arith.constant 0 : index
    %c0_0 = arith.constant 0 : index
    %3 = vector.load %arg0[%c0, %c0_0] : memref<48x14xf32, #tpu.memory_space<vmem>>, vector<48x14xf32>
    %cst = arith.constant 0.000000e+00 : f32
    %4 = vector.shape_cast %2 : vector<1x14xi1> to vector<1x14xi1>
    %5 = vector.broadcast %4 : vector<1x14xi1> to vector<48x14xi1>
    %6 = vector.broadcast %cst : f32 to vector<48x14xf32>
    %7 = arith.select %5, %3, %6 : vector<48x14xi1>, vector<48x14xf32>
    %c0_1 = arith.constant 0 : index
    %c0_2 = arith.constant 0 : index
    %8 = vector.load %arg1[%c0_1, %c0_2] : memref<48x8xf32, #tpu.memory_space<vmem>>, vector<48x8xf32>
    %c0_3 = arith.constant 0 : index
    %c0_4 = arith.constant 0 : index
    %c0_5 = arith.constant 0 : index
    %9 = vector.load %arg2[%c0_3, %c0_4, %c0_5] : memref<8x48x1xf32, #tpu.memory_space<vmem>>, vector<8x48x1xf32>
    %c0_6 = arith.constant 0 : index
    %c0_7 = arith.constant 0 : index
    %10 = vector.load %arg6[%c0_6, %c0_7] : memref<14x14xf32, #tpu.memory_space<vmem>>, vector<14x14xf32>
    %cst_8 = arith.constant dense<0.000000e+00> : vector<48x14xf32>
    %11 = tpu.matmul %7, %10, %cst_8 {dimension_numbers = #tpu.dot_dimension_numbers<[1], [0], [0], [1], [0, 0, 1, 1], [], []>} : vector<48x14xf32>, vector<14x14xf32>, vector<48x14xf32> -> vector<48x14xf32>
    %c0_9 = arith.constant 0 : index
    %c0_10 = arith.constant 0 : index
    %12 = vector.load %arg7[%c0_9, %c0_10] : memref<1x14xf32, #tpu.memory_space<vmem>>, vector<1x14xf32>
    %13 = vector.broadcast %12 : vector<1x14xf32> to vector<48x14xf32>
    %14 = arith.addf %11, %13 : vector<48x14xf32>
    %c0_11 = arith.constant 0 : index
    %c0_12 = arith.constant 0 : index
    %15 = vector.load %arg8[%c0_11, %c0_12] : memref<1x14xf32, #tpu.memory_space<vmem>>, vector<1x14xf32>
    %c0_13 = arith.constant 0 : index
    %c0_14 = arith.constant 0 : index
    %16 = vector.load %arg9[%c0_13, %c0_14] : memref<1x14xf32, #tpu.memory_space<vmem>>, vector<1x14xf32>
    %cst_15 = arith.constant dense<0.000000e+00> : vector<48xf32>
    %17 = vector.multi_reduction <add>, %14, %cst_15 [1] : vector<48x14xf32> to vector<48xf32>
    %18 = vector.shape_cast %17 : vector<48xf32> to vector<48x1xf32>
    %cst_16 = arith.constant 1.400000e+01 : f32
    %19 = vector.broadcast %cst_16 : f32 to vector<48x1xf32>
    %20 = arith.divf %18, %19 : vector<48x1xf32>
    %21 = vector.broadcast %20 : vector<48x1xf32> to vector<48x14xf32>
    %22 = arith.subf %14, %21 : vector<48x14xf32>
    %23 = arith.mulf %22, %22 : vector<48x14xf32>
    %cst_17 = arith.constant dense<0.000000e+00> : vector<48xf32>
    %24 = vector.multi_reduction <add>, %23, %cst_17 [1] : vector<48x14xf32> to vector<48xf32>
    %25 = vector.shape_cast %24 : vector<48xf32> to vector<48x1xf32>
    %cst_18 = arith.constant 1.400000e+01 : f32
    %26 = vector.broadcast %cst_18 : f32 to vector<48x1xf32>
    %27 = arith.divf %25, %26 : vector<48x1xf32>
    %28 = vector.broadcast %20 : vector<48x1xf32> to vector<48x14xf32>
    %29 = arith.subf %14, %28 : vector<48x14xf32>
    %cst_19 = arith.constant 9.99999974E-6 : f32
    %30 = vector.broadcast %cst_19 : f32 to vector<48x1xf32>
    %31 = arith.addf %27, %30 : vector<48x1xf32>
    %32 = math.rsqrt %31 : vector<48x1xf32>
    %33 = vector.broadcast %32 : vector<48x1xf32> to vector<48x14xf32>
    %34 = arith.mulf %29, %33 : vector<48x14xf32>
    %35 = vector.broadcast %15 : vector<1x14xf32> to vector<48x14xf32>
    %36 = arith.mulf %34, %35 : vector<48x14xf32>
    %37 = vector.broadcast %16 : vector<1x14xf32> to vector<48x14xf32>
    %38 = arith.addf %36, %37 : vector<48x14xf32>
    %cst_20 = arith.constant 0.000000e+00 : f32
    %39 = vector.broadcast %cst_20 : f32 to vector<48x14xf32>
    %40 = arith.maximumf %38, %39 : vector<48x14xf32>
    %41 = vector.shape_cast %40 : vector<48x14xf32> to vector<1x48x14xf32>
    %42 = vector.broadcast %41 : vector<1x48x14xf32> to vector<8x48x14xf32>
    %43 = vector.broadcast %9 : vector<8x48x1xf32> to vector<8x48x14xf32>
    %44 = arith.addf %42, %43 : vector<8x48x14xf32>
    %cst_21 = arith.constant dense<0xFF800000> : vector<8x14xf32>
    %45 = vector.multi_reduction <maximumf>, %44, %cst_21 [1] : vector<8x48x14xf32> to vector<8x14xf32>
    %c0_22 = arith.constant 0 : index
    %c0_23 = arith.constant 0 : index
    %46 = vector.load %arg10[%c0_22, %c0_23] : memref<14x28xf32, #tpu.memory_space<vmem>>, vector<14x28xf32>
    %cst_24 = arith.constant dense<0.000000e+00> : vector<48x28xf32>
    %47 = tpu.matmul %40, %46, %cst_24 {dimension_numbers = #tpu.dot_dimension_numbers<[1], [0], [0], [1], [0, 0, 1, 1], [], []>} : vector<48x14xf32>, vector<14x28xf32>, vector<48x28xf32> -> vector<48x28xf32>
    %c0_25 = arith.constant 0 : index
    %c0_26 = arith.constant 0 : index
    %48 = vector.load %arg11[%c0_25, %c0_26] : memref<14x28xf32, #tpu.memory_space<vmem>>, vector<14x28xf32>
    %cst_27 = arith.constant dense<0.000000e+00> : vector<8x28xf32>
    %49 = tpu.matmul %45, %48, %cst_27 {dimension_numbers = #tpu.dot_dimension_numbers<[1], [0], [0], [1], [0, 0, 1, 1], [], []>} : vector<8x14xf32>, vector<14x28xf32>, vector<8x28xf32> -> vector<8x28xf32>
    %cst_28 = arith.constant dense<0.000000e+00> : vector<48x28xf32>
    %50 = tpu.matmul %8, %49, %cst_28 {dimension_numbers = #tpu.dot_dimension_numbers<[1], [0], [0], [1], [0, 0, 1, 1], [], []>} : vector<48x8xf32>, vector<8x28xf32>, vector<48x28xf32> -> vector<48x28xf32>
    %51 = arith.addf %47, %50 : vector<48x28xf32>
    %c0_29 = arith.constant 0 : index
    %c0_30 = arith.constant 0 : index
    %52 = vector.load %arg12[%c0_29, %c0_30] : memref<1x28xf32, #tpu.memory_space<vmem>>, vector<1x28xf32>
    %53 = vector.broadcast %52 : vector<1x28xf32> to vector<48x28xf32>
    %54 = arith.addf %51, %53 : vector<48x28xf32>
    %c0_31 = arith.constant 0 : index
    %c0_32 = arith.constant 0 : index
    %55 = vector.load %arg13[%c0_31, %c0_32] : memref<1x28xf32, #tpu.memory_space<vmem>>, vector<1x28xf32>
    %c0_33 = arith.constant 0 : index
    %c0_34 = arith.constant 0 : index
    %56 = vector.load %arg14[%c0_33, %c0_34] : memref<1x28xf32, #tpu.memory_space<vmem>>, vector<1x28xf32>
    %cst_35 = arith.constant dense<0.000000e+00> : vector<48xf32>
    %57 = vector.multi_reduction <add>, %54, %cst_35 [1] : vector<48x28xf32> to vector<48xf32>
    %58 = vector.shape_cast %57 : vector<48xf32> to vector<48x1xf32>
    %cst_36 = arith.constant 2.800000e+01 : f32
    %59 = vector.broadcast %cst_36 : f32 to vector<48x1xf32>
    %60 = arith.divf %58, %59 : vector<48x1xf32>
    %61 = vector.broadcast %60 : vector<48x1xf32> to vector<48x28xf32>
    %62 = arith.subf %54, %61 : vector<48x28xf32>
    %63 = arith.mulf %62, %62 : vector<48x28xf32>
    %cst_37 = arith.constant dense<0.000000e+00> : vector<48xf32>
    %64 = vector.multi_reduction <add>, %63, %cst_37 [1] : vector<48x28xf32> to vector<48xf32>
    %65 = vector.shape_cast %64 : vector<48xf32> to vector<48x1xf32>
    %cst_38 = arith.constant 2.800000e+01 : f32
    %66 = vector.broadcast %cst_38 : f32 to vector<48x1xf32>
    %67 = arith.divf %65, %66 : vector<48x1xf32>
    %68 = vector.broadcast %60 : vector<48x1xf32> to vector<48x28xf32>
    %69 = arith.subf %54, %68 : vector<48x28xf32>
    %cst_39 = arith.constant 9.99999974E-6 : f32
    %70 = vector.broadcast %cst_39 : f32 to vector<48x1xf32>
    %71 = arith.addf %67, %70 : vector<48x1xf32>
    %72 = math.rsqrt %71 : vector<48x1xf32>
    %73 = vector.broadcast %72 : vector<48x1xf32> to vector<48x28xf32>
    %74 = arith.mulf %69, %73 : vector<48x28xf32>
    %75 = vector.broadcast %55 : vector<1x28xf32> to vector<48x28xf32>
    %76 = arith.mulf %74, %75 : vector<48x28xf32>
    %77 = vector.broadcast %56 : vector<1x28xf32> to vector<48x28xf32>
    %78 = arith.addf %76, %77 : vector<48x28xf32>
    %cst_40 = arith.constant 0.000000e+00 : f32
    %79 = vector.broadcast %cst_40 : f32 to vector<48x28xf32>
    %80 = arith.maximumf %78, %79 : vector<48x28xf32>
    %81 = vector.shape_cast %80 : vector<48x28xf32> to vector<1x48x28xf32>
    %82 = vector.broadcast %81 : vector<1x48x28xf32> to vector<8x48x28xf32>
    %83 = vector.broadcast %9 : vector<8x48x1xf32> to vector<8x48x28xf32>
    %84 = arith.addf %82, %83 : vector<8x48x28xf32>
    %cst_41 = arith.constant dense<0xFF800000> : vector<8x28xf32>
    %85 = vector.multi_reduction <maximumf>, %84, %cst_41 [1] : vector<8x48x28xf32> to vector<8x28xf32>
    %c0_42 = arith.constant 0 : index
    %c0_43 = arith.constant 0 : index
    %86 = vector.load %arg15[%c0_42, %c0_43] : memref<28x56xf32, #tpu.memory_space<vmem>>, vector<28x56xf32>
    %cst_44 = arith.constant dense<0.000000e+00> : vector<48x56xf32>
    %87 = tpu.matmul %80, %86, %cst_44 {dimension_numbers = #tpu.dot_dimension_numbers<[1], [0], [0], [1], [0, 0, 1, 1], [], []>} : vector<48x28xf32>, vector<28x56xf32>, vector<48x56xf32> -> vector<48x56xf32>
    %c0_45 = arith.constant 0 : index
    %c0_46 = arith.constant 0 : index
    %88 = vector.load %arg16[%c0_45, %c0_46] : memref<28x56xf32, #tpu.memory_space<vmem>>, vector<28x56xf32>
    %cst_47 = arith.constant dense<0.000000e+00> : vector<8x56xf32>
    %89 = tpu.matmul %85, %88, %cst_47 {dimension_numbers = #tpu.dot_dimension_numbers<[1], [0], [0], [1], [0, 0, 1, 1], [], []>} : vector<8x28xf32>, vector<28x56xf32>, vector<8x56xf32> -> vector<8x56xf32>
    %cst_48 = arith.constant dense<0.000000e+00> : vector<48x56xf32>
    %90 = tpu.matmul %8, %89, %cst_48 {dimension_numbers = #tpu.dot_dimension_numbers<[1], [0], [0], [1], [0, 0, 1, 1], [], []>} : vector<48x8xf32>, vector<8x56xf32>, vector<48x56xf32> -> vector<48x56xf32>
    %91 = arith.addf %87, %90 : vector<48x56xf32>
    %c0_49 = arith.constant 0 : index
    %c0_50 = arith.constant 0 : index
    %92 = vector.load %arg17[%c0_49, %c0_50] : memref<1x56xf32, #tpu.memory_space<vmem>>, vector<1x56xf32>
    %93 = vector.broadcast %92 : vector<1x56xf32> to vector<48x56xf32>
    %94 = arith.addf %91, %93 : vector<48x56xf32>
    %c0_51 = arith.constant 0 : index
    %c0_52 = arith.constant 0 : index
    %95 = vector.load %arg18[%c0_51, %c0_52] : memref<1x56xf32, #tpu.memory_space<vmem>>, vector<1x56xf32>
    %c0_53 = arith.constant 0 : index
    %c0_54 = arith.constant 0 : index
    %96 = vector.load %arg19[%c0_53, %c0_54] : memref<1x56xf32, #tpu.memory_space<vmem>>, vector<1x56xf32>
    %cst_55 = arith.constant dense<0.000000e+00> : vector<48xf32>
    %97 = vector.multi_reduction <add>, %94, %cst_55 [1] : vector<48x56xf32> to vector<48xf32>
    %98 = vector.shape_cast %97 : vector<48xf32> to vector<48x1xf32>
    %cst_56 = arith.constant 5.600000e+01 : f32
    %99 = vector.broadcast %cst_56 : f32 to vector<48x1xf32>
    %100 = arith.divf %98, %99 : vector<48x1xf32>
    %101 = vector.broadcast %100 : vector<48x1xf32> to vector<48x56xf32>
    %102 = arith.subf %94, %101 : vector<48x56xf32>
    %103 = arith.mulf %102, %102 : vector<48x56xf32>
    %cst_57 = arith.constant dense<0.000000e+00> : vector<48xf32>
    %104 = vector.multi_reduction <add>, %103, %cst_57 [1] : vector<48x56xf32> to vector<48xf32>
    %105 = vector.shape_cast %104 : vector<48xf32> to vector<48x1xf32>
    %cst_58 = arith.constant 5.600000e+01 : f32
    %106 = vector.broadcast %cst_58 : f32 to vector<48x1xf32>
    %107 = arith.divf %105, %106 : vector<48x1xf32>
    %108 = vector.broadcast %100 : vector<48x1xf32> to vector<48x56xf32>
    %109 = arith.subf %94, %108 : vector<48x56xf32>
    %cst_59 = arith.constant 9.99999974E-6 : f32
    %110 = vector.broadcast %cst_59 : f32 to vector<48x1xf32>
    %111 = arith.addf %107, %110 : vector<48x1xf32>
    %112 = math.rsqrt %111 : vector<48x1xf32>
    %113 = vector.broadcast %112 : vector<48x1xf32> to vector<48x56xf32>
    %114 = arith.mulf %109, %113 : vector<48x56xf32>
    %115 = vector.broadcast %95 : vector<1x56xf32> to vector<48x56xf32>
    %116 = arith.mulf %114, %115 : vector<48x56xf32>
    %117 = vector.broadcast %96 : vector<1x56xf32> to vector<48x56xf32>
    %118 = arith.addf %116, %117 : vector<48x56xf32>
    %cst_60 = arith.constant 0.000000e+00 : f32
    %119 = vector.broadcast %cst_60 : f32 to vector<48x56xf32>
    %120 = arith.maximumf %118, %119 : vector<48x56xf32>
    %121 = vector.shape_cast %120 : vector<48x56xf32> to vector<1x48x56xf32>
    %122 = vector.broadcast %121 : vector<1x48x56xf32> to vector<8x48x56xf32>
    %123 = vector.broadcast %9 : vector<8x48x1xf32> to vector<8x48x56xf32>
    %124 = arith.addf %122, %123 : vector<8x48x56xf32>
    %cst_61 = arith.constant dense<0xFF800000> : vector<8x56xf32>
    %125 = vector.multi_reduction <maximumf>, %124, %cst_61 [1] : vector<8x48x56xf32> to vector<8x56xf32>
    %c0_62 = arith.constant 0 : index
    %c0_63 = arith.constant 0 : index
    %126 = vector.load %arg22[%c0_62, %c0_63] : memref<56x112xf32, #tpu.memory_space<vmem>>, vector<56x112xf32>
    %cst_64 = arith.constant dense<0.000000e+00> : vector<8x112xf32>
    %127 = tpu.matmul %125, %126, %cst_64 {dimension_numbers = #tpu.dot_dimension_numbers<[1], [0], [0], [1], [0, 0, 1, 1], [], []>} : vector<8x56xf32>, vector<56x112xf32>, vector<8x112xf32> -> vector<8x112xf32>
    %c0_65 = arith.constant 0 : index
    %c0_66 = arith.constant 0 : index
    %128 = vector.load %arg23[%c0_65, %c0_66] : memref<1x112xf32, #tpu.memory_space<vmem>>, vector<1x112xf32>
    %129 = vector.broadcast %128 : vector<1x112xf32> to vector<8x112xf32>
    %130 = arith.addf %127, %129 : vector<8x112xf32>
    %c0_67 = arith.constant 0 : index
    %c0_68 = arith.constant 0 : index
    %131 = vector.load %arg24[%c0_67, %c0_68] : memref<56x112xf32, #tpu.memory_space<vmem>>, vector<56x112xf32>
    %cst_69 = arith.constant dense<0.000000e+00> : vector<8x112xf32>
    %132 = tpu.matmul %125, %131, %cst_69 {dimension_numbers = #tpu.dot_dimension_numbers<[1], [0], [0], [1], [0, 0, 1, 1], [], []>} : vector<8x56xf32>, vector<56x112xf32>, vector<8x112xf32> -> vector<8x112xf32>
    %c0_70 = arith.constant 0 : index
    %c0_71 = arith.constant 0 : index
    %133 = vector.load %arg25[%c0_70, %c0_71] : memref<1x112xf32, #tpu.memory_space<vmem>>, vector<1x112xf32>
    %134 = vector.broadcast %133 : vector<1x112xf32> to vector<8x112xf32>
    %135 = arith.addf %132, %134 : vector<8x112xf32>
    %c0_72 = arith.constant 0 : index
    %c0_73 = arith.constant 0 : index
    %136 = vector.load %arg4[%c0_72, %c0_73] : memref<2x8xf32, #tpu.memory_space<vmem>>, vector<2x8xf32>
    %cst_74 = arith.constant dense<0.000000e+00> : vector<2x56xf32>
    %137 = tpu.matmul %136, %125, %cst_74 {dimension_numbers = #tpu.dot_dimension_numbers<[1], [0], [0], [1], [0, 0, 1, 1], [], []>} : vector<2x8xf32>, vector<8x56xf32>, vector<2x56xf32> -> vector<2x56xf32>
    %c0_75 = arith.constant 0 : index
    %c0_76 = arith.constant 0 : index
    %138 = vector.load %arg20[%c0_75, %c0_76] : memref<56x112xf32, #tpu.memory_space<vmem>>, vector<56x112xf32>
    %cst_77 = arith.constant dense<0.000000e+00> : vector<2x112xf32>
    %139 = tpu.matmul %137, %138, %cst_77 {dimension_numbers = #tpu.dot_dimension_numbers<[1], [0], [0], [1], [0, 0, 1, 1], [], []>} : vector<2x56xf32>, vector<56x112xf32>, vector<2x112xf32> -> vector<2x112xf32>
    %c0_78 = arith.constant 0 : index
    %c0_79 = arith.constant 0 : index
    %140 = vector.load %arg21[%c0_78, %c0_79] : memref<1x112xf32, #tpu.memory_space<vmem>>, vector<1x112xf32>
    %141 = vector.broadcast %140 : vector<1x112xf32> to vector<2x112xf32>
    %142 = arith.addf %139, %141 : vector<2x112xf32>
    %cst_80 = arith.constant dense<0.000000e+00> : vector<2x8xf32>
    %143 = tpu.matmul %142, %130, %cst_80 {dimension_numbers = #tpu.dot_dimension_numbers<[1], [1], [0], [0], [0, 0, 1, 0], [], []>} : vector<2x112xf32>, vector<8x112xf32>, vector<2x8xf32> -> vector<2x8xf32>
    %cst_81 = arith.constant 0.0944911167 : f32
    %144 = vector.broadcast %cst_81 : f32 to vector<2x8xf32>
    %145 = arith.mulf %143, %144 : vector<2x8xf32>
    %c0_82 = arith.constant 0 : index
    %c0_83 = arith.constant 0 : index
    %146 = vector.load %arg3[%c0_82, %c0_83] : memref<2x8xf32, #tpu.memory_space<vmem>>, vector<2x8xf32>
    %147 = arith.addf %145, %146 : vector<2x8xf32>
    %cst_84 = arith.constant dense<0xFF800000> : vector<2xf32>
    %148 = vector.multi_reduction <maximumf>, %147, %cst_84 [1] : vector<2x8xf32> to vector<2xf32>
    %149 = vector.shape_cast %148 : vector<2xf32> to vector<2x1xf32>
    %150 = vector.broadcast %149 : vector<2x1xf32> to vector<2x8xf32>
    %151 = arith.subf %147, %150 : vector<2x8xf32>
    %152 = math.exp %151 : vector<2x8xf32>
    %cst_85 = arith.constant dense<0.000000e+00> : vector<2xf32>
    %153 = vector.multi_reduction <add>, %152, %cst_85 [1] : vector<2x8xf32> to vector<2xf32>
    %154 = vector.shape_cast %153 : vector<2xf32> to vector<2x1xf32>
    %155 = vector.broadcast %154 : vector<2x1xf32> to vector<2x8xf32>
    %156 = arith.divf %152, %155 : vector<2x8xf32>
    %cst_86 = arith.constant dense<0.000000e+00> : vector<2x112xf32>
    %157 = tpu.matmul %156, %135, %cst_86 {dimension_numbers = #tpu.dot_dimension_numbers<[1], [0], [0], [1], [0, 0, 1, 1], [], []>} : vector<2x8xf32>, vector<8x112xf32>, vector<2x112xf32> -> vector<2x112xf32>
    %c0_87 = arith.constant 0 : index
    %c0_88 = arith.constant 0 : index
    %158 = vector.load %arg5[%c0_87, %c0_88] : memref<2x48xf32, #tpu.memory_space<vmem>>, vector<2x48xf32>
    %cst_89 = arith.constant dense<0.000000e+00> : vector<2x14xf32>
    %159 = tpu.matmul %158, %7, %cst_89 {dimension_numbers = #tpu.dot_dimension_numbers<[1], [0], [0], [1], [0, 0, 1, 1], [], []>} : vector<2x48xf32>, vector<48x14xf32>, vector<2x14xf32> -> vector<2x14xf32>
    %c0_90 = arith.constant 0 : index
    %c0_91 = arith.constant 0 : index
    %160 = vector.load %arg26[%c0_90, %c0_91] : memref<112x150xf32, #tpu.memory_space<vmem>>, vector<112x150xf32>
    %cst_92 = arith.constant dense<0.000000e+00> : vector<2x150xf32>
    %161 = tpu.matmul %157, %160, %cst_92 {dimension_numbers = #tpu.dot_dimension_numbers<[1], [0], [0], [1], [0, 0, 1, 1], [], []>} : vector<2x112xf32>, vector<112x150xf32>, vector<2x150xf32> -> vector<2x150xf32>
    %c0_93 = arith.constant 0 : index
    %c0_94 = arith.constant 0 : index
    %162 = vector.load %arg27[%c0_93, %c0_94] : memref<14x150xf32, #tpu.memory_space<vmem>>, vector<14x150xf32>
    %cst_95 = arith.constant dense<0.000000e+00> : vector<2x150xf32>
    %163 = tpu.matmul %159, %162, %cst_95 {dimension_numbers = #tpu.dot_dimension_numbers<[1], [0], [0], [1], [0, 0, 1, 1], [], []>} : vector<2x14xf32>, vector<14x150xf32>, vector<2x150xf32> -> vector<2x150xf32>
    %164 = arith.addf %161, %163 : vector<2x150xf32>
    %c0_96 = arith.constant 0 : index
    %c0_97 = arith.constant 0 : index
    %165 = vector.load %arg28[%c0_96, %c0_97] : memref<1x150xf32, #tpu.memory_space<vmem>>, vector<1x150xf32>
    %166 = vector.broadcast %165 : vector<1x150xf32> to vector<2x150xf32>
    %167 = arith.addf %164, %166 : vector<2x150xf32>
    %c0_98 = arith.constant 0 : index
    %c0_99 = arith.constant 0 : index
    %168 = vector.load %arg29[%c0_98, %c0_99] : memref<1x150xf32, #tpu.memory_space<vmem>>, vector<1x150xf32>
    %c0_100 = arith.constant 0 : index
    %c0_101 = arith.constant 0 : index
    %169 = vector.load %arg30[%c0_100, %c0_101] : memref<1x150xf32, #tpu.memory_space<vmem>>, vector<1x150xf32>
    %cst_102 = arith.constant dense<0.000000e+00> : vector<2xf32>
    %170 = vector.multi_reduction <add>, %167, %cst_102 [1] : vector<2x150xf32> to vector<2xf32>
    %171 = vector.shape_cast %170 : vector<2xf32> to vector<2x1xf32>
    %cst_103 = arith.constant 1.500000e+02 : f32
    %172 = vector.broadcast %cst_103 : f32 to vector<2x1xf32>
    %173 = arith.divf %171, %172 : vector<2x1xf32>
    %174 = vector.broadcast %173 : vector<2x1xf32> to vector<2x150xf32>
    %175 = arith.subf %167, %174 : vector<2x150xf32>
    %176 = arith.mulf %175, %175 : vector<2x150xf32>
    %cst_104 = arith.constant dense<0.000000e+00> : vector<2xf32>
    %177 = vector.multi_reduction <add>, %176, %cst_104 [1] : vector<2x150xf32> to vector<2xf32>
    %178 = vector.shape_cast %177 : vector<2xf32> to vector<2x1xf32>
    %cst_105 = arith.constant 1.500000e+02 : f32
    %179 = vector.broadcast %cst_105 : f32 to vector<2x1xf32>
    %180 = arith.divf %178, %179 : vector<2x1xf32>
    %181 = vector.broadcast %173 : vector<2x1xf32> to vector<2x150xf32>
    %182 = arith.subf %167, %181 : vector<2x150xf32>
    %cst_106 = arith.constant 9.99999974E-6 : f32
    %183 = vector.broadcast %cst_106 : f32 to vector<2x1xf32>
    %184 = arith.addf %180, %183 : vector<2x1xf32>
    %185 = math.rsqrt %184 : vector<2x1xf32>
    %186 = vector.broadcast %185 : vector<2x1xf32> to vector<2x150xf32>
    %187 = arith.mulf %182, %186 : vector<2x150xf32>
    %188 = vector.broadcast %168 : vector<1x150xf32> to vector<2x150xf32>
    %189 = arith.mulf %187, %188 : vector<2x150xf32>
    %190 = vector.broadcast %169 : vector<1x150xf32> to vector<2x150xf32>
    %191 = arith.addf %189, %190 : vector<2x150xf32>
    %cst_107 = arith.constant 0.000000e+00 : f32
    %192 = vector.broadcast %cst_107 : f32 to vector<2x150xf32>
    %193 = arith.maximumf %191, %192 : vector<2x150xf32>
    %c0_108 = arith.constant 0 : index
    %c0_109 = arith.constant 0 : index
    %194 = vector.load %arg31[%c0_108, %c0_109] : memref<150x150xf32, #tpu.memory_space<vmem>>, vector<150x150xf32>
    %cst_110 = arith.constant dense<0.000000e+00> : vector<2x150xf32>
    %195 = tpu.matmul %193, %194, %cst_110 {dimension_numbers = #tpu.dot_dimension_numbers<[1], [0], [0], [1], [0, 0, 1, 1], [], []>} : vector<2x150xf32>, vector<150x150xf32>, vector<2x150xf32> -> vector<2x150xf32>
    %c0_111 = arith.constant 0 : index
    %c0_112 = arith.constant 0 : index
    %196 = vector.load %arg32[%c0_111, %c0_112] : memref<1x150xf32, #tpu.memory_space<vmem>>, vector<1x150xf32>
    %197 = vector.broadcast %196 : vector<1x150xf32> to vector<2x150xf32>
    %198 = arith.addf %195, %197 : vector<2x150xf32>
    %c0_113 = arith.constant 0 : index
    %c0_114 = arith.constant 0 : index
    %199 = vector.load %arg33[%c0_113, %c0_114] : memref<1x150xf32, #tpu.memory_space<vmem>>, vector<1x150xf32>
    %c0_115 = arith.constant 0 : index
    %c0_116 = arith.constant 0 : index
    %200 = vector.load %arg34[%c0_115, %c0_116] : memref<1x150xf32, #tpu.memory_space<vmem>>, vector<1x150xf32>
    %cst_117 = arith.constant dense<0.000000e+00> : vector<2xf32>
    %201 = vector.multi_reduction <add>, %198, %cst_117 [1] : vector<2x150xf32> to vector<2xf32>
    %202 = vector.shape_cast %201 : vector<2xf32> to vector<2x1xf32>
    %cst_118 = arith.constant 1.500000e+02 : f32
    %203 = vector.broadcast %cst_118 : f32 to vector<2x1xf32>
    %204 = arith.divf %202, %203 : vector<2x1xf32>
    %205 = vector.broadcast %204 : vector<2x1xf32> to vector<2x150xf32>
    %206 = arith.subf %198, %205 : vector<2x150xf32>
    %207 = arith.mulf %206, %206 : vector<2x150xf32>
    %cst_119 = arith.constant dense<0.000000e+00> : vector<2xf32>
    %208 = vector.multi_reduction <add>, %207, %cst_119 [1] : vector<2x150xf32> to vector<2xf32>
    %209 = vector.shape_cast %208 : vector<2xf32> to vector<2x1xf32>
    %cst_120 = arith.constant 1.500000e+02 : f32
    %210 = vector.broadcast %cst_120 : f32 to vector<2x1xf32>
    %211 = arith.divf %209, %210 : vector<2x1xf32>
    %212 = vector.broadcast %204 : vector<2x1xf32> to vector<2x150xf32>
    %213 = arith.subf %198, %212 : vector<2x150xf32>
    %cst_121 = arith.constant 9.99999974E-6 : f32
    %214 = vector.broadcast %cst_121 : f32 to vector<2x1xf32>
    %215 = arith.addf %211, %214 : vector<2x1xf32>
    %216 = math.rsqrt %215 : vector<2x1xf32>
    %217 = vector.broadcast %216 : vector<2x1xf32> to vector<2x150xf32>
    %218 = arith.mulf %213, %217 : vector<2x150xf32>
    %219 = vector.broadcast %199 : vector<1x150xf32> to vector<2x150xf32>
    %220 = arith.mulf %218, %219 : vector<2x150xf32>
    %221 = vector.broadcast %200 : vector<1x150xf32> to vector<2x150xf32>
    %222 = arith.addf %220, %221 : vector<2x150xf32>
    %cst_122 = arith.constant 0.000000e+00 : f32
    %223 = vector.broadcast %cst_122 : f32 to vector<2x150xf32>
    %224 = arith.maximumf %222, %223 : vector<2x150xf32>
    %c0_123 = arith.constant 0 : index
    %c0_124 = arith.constant 0 : index
    %225 = vector.load %arg35[%c0_123, %c0_124] : memref<150x2xf32, #tpu.memory_space<vmem>>, vector<150x2xf32>
    %cst_125 = arith.constant dense<0.000000e+00> : vector<2x2xf32>
    %226 = tpu.matmul %224, %225, %cst_125 {dimension_numbers = #tpu.dot_dimension_numbers<[1], [0], [0], [1], [0, 0, 1, 1], [], []>} : vector<2x150xf32>, vector<150x2xf32>, vector<2x2xf32> -> vector<2x2xf32>
    %c0_126 = arith.constant 0 : index
    %c0_127 = arith.constant 0 : index
    %227 = vector.load %arg36[%c0_126, %c0_127] : memref<1x2xf32, #tpu.memory_space<vmem>>, vector<1x2xf32>
    %228 = vector.broadcast %227 : vector<1x2xf32> to vector<2x2xf32>
    %229 = arith.addf %226, %228 : vector<2x2xf32>
    %c0_128 = arith.constant 0 : index
    %c0_129 = arith.constant 0 : index
    %230 = vector.load %arg37[%c0_128, %c0_129] : memref<2x2xf32, #tpu.memory_space<vmem>>, vector<2x2xf32>
    tpu.vector_store %arg37[%c0_128, %c0_129], %229 {strides = array<i32>} : memref<2x2xf32, #tpu.memory_space<vmem>>, vector<2x2xf32>,
    return
  }
}

</mosaic_0001>

<bundles_post_ra>
// kernel: tpu_custom_call.1
= control target key start
LH: loop header
LB: loop body
LE: loop exit
PB: predicated region body
PF: predicated region fallthrough
CT: control target
= control target key end

     0   :  { %s3941_s6 = smov 1   ;;  %s3942_s10 = smov 2   ;;  %s5484_s0 = inlined_call_operand.smem [shape: u32[38], index: -1, kind: input, shape index: {}] }
   0x1   :  { %s3992_s5 = sld [smem:[%s5484_s0]]   ;;  %s3943_s14 = smov 3  }
   0x2   :  { %s3997_s9 = sld [smem:[%s5484_s0 + %s3941_s6]]   ;;  %s3944_s18 = smov 4  }
   0x3   :  { %s4002_s13 = sld [smem:[%s5484_s0 + %s3942_s10]]   ;;  %s3945_s22 = smov 5  }
   0x4   :  { %s4007_s17 = sld [smem:[%s5484_s0 + %s3943_s14]]   ;;  %s3946_s26 = smov 6  }
   0x5   :  { %s4012_s21 = sld [smem:[%s5484_s0 + %s3944_s18]]   ;;  %s3947_s30 = smov 7  }
   0x6   :  { %s4017_s25 = sld [smem:[%s5484_s0 + %s3945_s22]]   ;;  %s3948_s4 = smov 8  }
   0x7   :  { %s4022_s29 = sld [smem:[%s5484_s0 + %s3946_s26]]   ;;  %s3949_s10 = smov 9  }
   0x8   :  { %s4027_s3 = sld [smem:[%s5484_s0 + %s3947_s30]]   ;;  %s3950_s15 = smov 10  }
   0x9   :  { %s4032_s8 = sld [smem:[%s5484_s0 + %s3948_s4]]   ;;  %s3951_s20 = smov 11  }
   0xa   :  { %5592 = sst [smem:[#allocation5_spill]] %s4007_s17  ;;  %s3952_s26 = smov 12  }
   0xb   :  { %5593 = sst [smem:[#allocation6_spill]] %s4012_s21  ;;  %s3953_s1 = smov 13  }
   0xc   :  { %5594 = sst [smem:[#allocation7_spill]] %s4017_s25  ;;  %s3954_s7 = smov 14  }
   0xd   :  { %s4037_s14 = sld [smem:[%s5484_s0 + %s3949_s10]]   ;;  %s3956_s22 = smov 16  }
   0xe   :  { %s4042_s19 = sld [smem:[%s5484_s0 + %s3950_s15]]   ;;  %s3955_s15 = smov 15  }
   0xf   :  { %s4047_s24 = sld [smem:[%s5484_s0 + %s3951_s20]]   ;;  %s3957_s28 = smov 17  }
  0x10   :  { %s4052_s30 = sld [smem:[%s5484_s0 + %s3952_s26]]  }
  0x11   :  { %s4057_s6 = sld [smem:[%s5484_s0 + %s3953_s1]]  }
  0x12   :  { %s4062_s12 = sld [smem:[%s5484_s0 + %s3954_s7]]   ;;  %s3958_s7 = smov 18  }
  0x13   :  { %s4067_s20 = sld [smem:[%s5484_s0 + %s3955_s15]]   ;;  %s3959_s15 = smov 19  }
  0x14   :  { %s4072_s27 = sld [smem:[%s5484_s0 + %s3956_s22]]   ;;  %s3960_s22 = smov 20  }
  0x15   :  { %s4077_s4 = sld [smem:[%s5484_s0 + %s3957_s28]]   ;;  %s3961_s28 = smov 21  }
  0x16   :  { %s4082_s25 = sld [smem:[%s5484_s0 + %s3958_s7]]   ;;  %s3962_s7 = smov 22  }
  0x17   :  { %s4087_s17 = sld [smem:[%s5484_s0 + %s3959_s15]]   ;;  %s3963_s15 = smov 23  }
  0x18   :  { %s4092_s21 = sld [smem:[%s5484_s0 + %s3960_s22]]   ;;  %s3964_s22 = smov 24  }
  0x1b   :  { %5595 = sst [smem:[#allocation8_spill]] %s4077_s4 }
  0x1c   :  { %5596 = sst [smem:[#allocation9_spill]] %s4082_s25 }
  0x1d   :  { %5597 = sst [smem:[#allocation10_spill]] %s4087_s17 }
  0x1e   :  { %5598 = sst [smem:[#allocation11_spill]] %s4092_s21 }
  0x1f   :  { %s4097_s4 = sld [smem:[%s5484_s0 + %s3961_s28]]   ;;  %s3965_s28 = smov 25  }
  0x20   :  { %s4102_s25 = sld [smem:[%s5484_s0 + %s3962_s7]]   ;;  %s3966_s7 = smov 26  }
  0x21   :  { %s4107_s17 = sld [smem:[%s5484_s0 + %s3963_s15]]   ;;  %s3967_s15 = smov 27  }
  0x22   :  { %s4112_s21 = sld [smem:[%s5484_s0 + %s3964_s22]]   ;;  %s3968_s22 = smov 28  }
  0x25   :  { %5599 = sst [smem:[#allocation12_spill]] %s4097_s4 }
  0x26   :  { %5600 = sst [smem:[#allocation13_spill]] %s4102_s25 }
  0x27   :  { %5601 = sst [smem:[#allocation14_spill]] %s4107_s17 }
  0x28   :  { %5602 = sst [smem:[#allocation15_spill]] %s4112_s21 }
  0x29   :  { %s4117_s4 = sld [smem:[%s5484_s0 + %s3965_s28]]   ;;  %s3969_s28 = smov 29  }
  0x2a   :  { %s4122_s25 = sld [smem:[%s5484_s0 + %s3966_s7]]   ;;  %s3970_s7 = smov 30  }
  0x2b   :  { %s4127_s17 = sld [smem:[%s5484_s0 + %s3967_s15]]   ;;  %s3971_s15 = smov 31  }
  0x2c   :  { %s4132_s21 = sld [smem:[%s5484_s0 + %s3968_s22]]   ;;  %s3972_s22 = smov 32  }
  0x2f   :  { %5603 = sst [smem:[#allocation16_spill]] %s4117_s4 }
  0x30   :  { %5604 = sst [smem:[#allocation17_spill]] %s4122_s25 }
  0x31   :  { %5605 = sst [smem:[#allocation18_spill]] %s4127_s17 }
  0x32   :  { %5606 = sst [smem:[#allocation19_spill]] %s4132_s21 }
  0x33   :  { %s4137_s4 = sld [smem:[%s5484_s0 + %s3969_s28]]   ;;  %s3973_s28 = smov 33  }
  0x34   :  { %s4142_s25 = sld [smem:[%s5484_s0 + %s3970_s7]]   ;;  %s3974_s7 = smov 34  }
  0x35   :  { %s4147_s17 = sld [smem:[%s5484_s0 + %s3971_s15]]   ;;  %s3975_s15 = smov 35  }
  0x36   :  { %s4152_s21 = sld [smem:[%s5484_s0 + %s3972_s22]]   ;;  %s3976_s22 = smov 36  }
  0x39   :  { %5607 = sst [smem:[#allocation20_spill]] %s4137_s4 }
  0x3a   :  { %5608 = sst [smem:[#allocation21_spill]] %s4142_s25 }
  0x3b   :  { %5609 = sst [smem:[#allocation22_spill]] %s4147_s17 }
  0x3c   :  { %5610 = sst [smem:[#allocation23_spill]] %s4152_s21 }
  0x3d   :  { %s4157_s4 = sld [smem:[%s5484_s0 + %s3973_s28]]   ;;  %s3977_s28 = smov 37  }
  0x3e   :  { %s4162_s25 = sld [smem:[%s5484_s0 + %s3974_s7]]  }
  0x3f   :  { %s4167_s17 = sld [smem:[%s5484_s0 + %s3975_s15]]  }
  0x40   :  { %s4172_s21 = sld [smem:[%s5484_s0 + %s3976_s22]]  }
  0x43   :  { %5611 = sst [smem:[#allocation24_spill]] %s4157_s4 }
  0x44   :  { %s4177_s4 = sld [smem:[%s5484_s0 + %s3977_s28]]  }
  0x45   :  { %v226_v0 = vld [vmem:[%s4022_s29] sm:$0xff]  ;;  %v227_v1 = vld [vmem:[%s4022_s29 + $0x8] sm:$0x3f]  ;;  %vm5572_vm0 = vcmask 1045504   ;;  %v5491_v2 = vlaneseq  ;;  %vm3978_vm1 = vmmov 1   ;;  %v5613_v5 = vmov 0 }
  0x46   :  { %v4182_v3 = vld [vmem:[%s3992_s5] sm:$0xff]  ;;  %v3645_v4 = vpack.c.bf16 %v227_v1, %v226_v0  ;;  %vm4186_vm2 = vmpackc.low %vm5572_vm0, %vm3978_vm1  ;;  %v4191_v6 = vld [vmem:[%s3992_s5 + $0x8] sm:$0xff]  ;;  %v3979_v13 = vmov 0   ;;  %vm235_vm3 = vcmask 113664  }
  0x47   :  { %5612 = vst [vmem:[#allocation25_spill] sm:$0xff] %v4182_v3  ;;  %v5614_v5 = vsel %vm4186_vm2, 4294967295, %v5613_v5  ;;  %5616 = vst [vmem:[#allocation27_spill] sm:$0xff] %v4191_v6  ;;  %v4194_v7 = vld [vmem:[%s3992_s5 + $0x10] sm:$0xff]  ;;  %v4197_v8 = vand.u32 127, %v5491_v2  ;;  %v4202_v10 = vld [vmem:[%s3992_s5 + $0x18] sm:$0xff]  ;;  %3872 = vset.pattern.permute.xlu1 %v3979_v13  ;;  %3871 = vset.pattern.permute.xlu0 %v3979_v13 }
  0x48   :  { %5615 = vst [vmem:[#allocation26_spill] sm:$0xff] %v5614_v5  ;;  %5617 = vst [vmem:[#allocation28_spill] sm:$0xff] %v4194_v7  ;;  %v4205_v11 = vld [vmem:[%s3992_s5 + $0x20] sm:$0xff]  ;;  %v4208_v12 = vld [vmem:[%s3992_s5 + $0x28] sm:$0xff]  ;;  %3647 = vmatprep.subr.msk.bf16.mxu0 %vm4186_vm2, %v3645_v4 }
  0x49   :  { %5618 = vst [vmem:[#allocation29_spill] sm:$0xff] %v4197_v8  ;;  %5619 = vst [vmem:[#allocation30_spill] sm:$0xff] %v4202_v10  ;;  %v179_v16 = vld [vmem:[%s4002_s13 + $0x8] sm:$0xff]  ;;  %3650 = vmatpush3.bf16.msk.msra.mxu0 %vm4186_vm2, %v3645_v4  ;;  %vm157_vm4 = vcmp.lt.s32.totalorder %v4197_v8, 13  ;;  %v184_v20 = vld [vmem:[%s4002_s13 + $0x30] sm:$0xff] }
  0x4a   :  { %5620 = vst [vmem:[#allocation31_spill] sm:$0xff] %v4205_v11  ;;  %5621 = vst [vmem:[#allocation32_spill] sm:$0xff] %v4208_v12  ;;  %471 = vperm.xlu1 %3872, %v179_v16   ;;  %v166_v17 = vsel %vm157_vm4, %v4182_v3, 0.0  ;;  %v167_v18 = vsel %vm157_vm4, %v4191_v6, 0.0  ;;  %v168_v19 = vsel %vm157_vm4, %v4194_v7, 0.0  ;;  %v169_v21 = vsel %vm157_vm4, %v4202_v10, 0.0 }
  0x4b   :  { %3485 = vmatprep.mubr.msk.f32.mxu0 %vm235_vm3, %v166_v17  ;;  %v178_v22 = vld [vmem:[%s4002_s13] sm:$0xff]  ;;  %v170_v23 = vsel %vm157_vm4, %v4205_v11, 0.0  ;;  %v185_v24 = vld [vmem:[%s4002_s13 + $0x38] sm:$0xff]  ;;  %v171_v26 = vsel %vm157_vm4, %v4208_v12, 0.0 }
  0x4c   :  { %3486 = vmatmul.mubr.msk.f32.vlgmr.msra.gmra.mrb[0].mxu0 %vm235_vm3, %v167_v18  ;;  %466 = vperm.xlu0 %3871, %v178_v22   ;;  %v197_v25 = vld [vmem:[%s4002_s13 + $0x98] sm:$0xff]  ;;  %v190_v27 = vld [vmem:[%s4002_s13 + $0x60] sm:$0xff] }
  0x4d   :  { %3488 = vmatprep.mubr.msk.f32.mxu0 %vm235_vm3, %v168_v19 }
  0x4e   :  { %496 = vperm.xlu1 %3872, %v184_v20  }
  0x50   :  { %3489 = vmatmul.mubr.msk.f32.gmra.mrb[2].mxu0 %vm235_vm3, %v169_v21  ;;  %561 = vperm.xlu0 %3871, %v197_v25  }
  0x51   :  { %3491 = vmatprep.mubr.msk.f32.mxu0 %vm235_vm3, %v170_v23 }
  0x52   :  { %501 = vperm.xlu1 %3872, %v185_v24  }
  0x53   :  { %80 = vsyncpa [#allocation3], 0  ;;  %v202_v28 = vld [vmem:[%s4002_s13 + $0xc0] sm:$0xff]  ;;  %v191_v29 = vld [vmem:[%s4002_s13 + $0x68] sm:$0xff]  ;;  %vm3981_vm5 = vmmov 0   ;;  %vm900_vm6 = vcmask 1041409  }
  0x54   :  { %3492 = vmatmul.mubr.msk.f32.gmra.mrb[4].mxu0 %vm235_vm3, %v171_v26  ;;  %586 = vperm.xlu0 %3871, %v202_v28   ;;  %v181_v30 = vld [vmem:[%s4002_s13 + $0x18] sm:$0xff]  ;;  %v180_v31 = vld [vmem:[%s4002_s13 + $0x10] sm:$0xff]  ;;  %v198_v32 = vld [vmem:[%s4002_s13 + $0xa0] sm:$0xff]  ;;  %vm902_vm7 = vcmask 1042434   ;;  %vm904_vm8 = vcmask 1043459   ;;  %vm906_vm9 = vcmask 1044484  }
  0x55   :  { %v186_v33 = vld [vmem:[%s4002_s13 + $0x40] sm:$0xff]  ;;  %v209_v34 = vld [vmem:[%s4002_s13 + $0xf8] sm:$0xff]  ;;  %v196_v35 = vld [vmem:[%s4002_s13 + $0x90] sm:$0xff]  ;;  %vm908_vm10 = vcmask 1045509   ;;  %vm910_vm11 = vcmask 1046534   ;;  %vm912_vm12 = vcmask 1047559  }
  0x56   :  { %526 = vperm.xlu1 %3872, %v190_v27   ;;  %v204_v36 = vld [vmem:[%s4002_s13 + $0xd0] sm:$0xff]  ;;  %v215_v38 = vld [vmem:[%s4002_s13 + $0x128] sm:$0xff]  ;;  %v210_v42 = vld [vmem:[%s4002_s13 + $0x100] sm:$0xff]  ;;  %vm989_vm13 = vcmask 64512   ;;  %vm1234_vm14 = vcmask 228352   ;;  %vm1553_vm15 = vcmask 1043456  }
  0x57   :  { %v192_v37 = vld [vmem:[%s4002_s13 + $0x70] sm:$0xff]  ;;  %v203_v39 = vld [vmem:[%s4002_s13 + $0xc8] sm:$0xff]  ;;  %v221_v44 = vld [vmem:[%s4002_s13 + $0x158] sm:$0xff]  ;;  %s5717_s0 = sld [smem:[#allocation8_spill]]  ;;  %s5722_s5 = sld [smem:[#allocation13_spill]] }
  0x58   :  { %481 = vperm.xlu0 %3871, %v181_v30   ;;  %v188_v40 = vld [vmem:[%s4002_s13 + $0x50] sm:$0xff]  ;;  %v187_v41 = vld [vmem:[%s4002_s13 + $0x48] sm:$0xff]  ;;  %v193_v45 = vld [vmem:[%s4002_s13 + $0x78] sm:$0xff]  ;;  %s5725_s29 = sld [smem:[#allocation10_spill]]  ;;  %s5794_s7 = sld [smem:[#allocation22_spill]] }
  0x59   :  { %v208_v43 = vld [vmem:[%s4002_s13 + $0xf0] sm:$0xff]  ;;  %v205_v46 = vld [vmem:[%s4002_s13 + $0xd8] sm:$0xff]  ;;  %v214_v47 = vld [vmem:[%s4002_s13 + $0x120] sm:$0xff]  ;;  %s5795_s10 = sld [smem:[#allocation20_spill]]  ;;  %s5796_s11 = sld [smem:[#allocation21_spill]] }
  0x5a   :  { %531 = vperm.xlu1 %3872, %v191_v29   ;;  %v182_v48 = vld [vmem:[%s4002_s13 + $0x20] sm:$0xff]  ;;  %v199_v49 = vld [vmem:[%s4002_s13 + $0xa8] sm:$0xff]  ;;  %v220_v50 = vld [vmem:[%s4002_s13 + $0x150] sm:$0xff]  ;;  %s5799_s15 = sld [smem:[#allocation23_spill]]  ;;  %s5800_s16 = sld [smem:[#allocation24_spill]] }
  0x5b   :  { %v194_v51 = vld [vmem:[%s4002_s13 + $0x80] sm:$0xff]  ;;  %v216_v52 = vld [vmem:[%s4002_s13 + $0x130] sm:$0xff]  ;;  %v189_v20 = vld [vmem:[%s4002_s13 + $0x58] sm:$0xff] }
  0x5c   :  { %566 = vperm.xlu0 %3871, %v198_v32   ;;  %v3323_v53 = vld [vmem:[%s4027_s3] ss:$0 sm:$0xff]  ;;  %v183_v21 = vld [vmem:[%s4002_s13 + $0x28] sm:$0xff]  ;;  %v200_v23 = vld [vmem:[%s4002_s13 + $0xb0] sm:$0xff]  ;;  %s5770_s3 = sld [smem:[#allocation11_spill]] }
  0x5d   :  { %v211_v22 = vld [vmem:[%s4002_s13 + $0x108] sm:$0xff]  ;;  %v222_v26 = vld [vmem:[%s4002_s13 + $0x160] sm:$0xff]  ;;  %v217_v27 = vld [vmem:[%s4002_s13 + $0x138] sm:$0xff] }
  0x5e   :  { %476 = vperm.xlu1 %3872, %v180_v31   ;;  %v195_v25 = vld [vmem:[%s4002_s13 + $0x88] sm:$0xff]  ;;  %v206_v29 = vld [vmem:[%s4002_s13 + $0xe0] sm:$0xff]  ;;  %v212_v30 = vld [vmem:[%s4002_s13 + $0x110] sm:$0xff] }
  0x5f   :  { %v201_v31 = vld [vmem:[%s4002_s13 + $0xb8] sm:$0xff]  ;;  %vm3666_vm0 = vmpackc.low %vm1553_vm15, %vm3978_vm1  ;;  %vm2494_vm1 = vcmask 916480  }
  0x60   :  { %621 = vperm.xlu0 %3871, %v209_v34   ;;  %v223_v34 = vld [vmem:[%s4002_s13 + $0x168] sm:$0xff] }
  0x62   :  { %506 = vperm.xlu1 %3872, %v186_v33   ;;  %v207_v33 = vld [vmem:[%s4002_s13 + $0xe8] sm:$0xff] }
  0x64   :  { %596 = vperm.xlu0 %3871, %v204_v36  }
  0x66   :  { %556 = vperm.xlu1 %3872, %v196_v35  }
  0x68   :  { %651 = vperm.xlu0 %3871, %v215_v38  }
  0x6a   :  { %536 = vperm.xlu1 %3872, %v192_v37  }
  0x6c   :  { %516 = vperm.xlu0 %3871, %v188_v40  }
  0x6e   :  { %591 = vperm.xlu1 %3872, %v203_v39  }
  0x70   :  { %626 = vperm.xlu0 %3871, %v210_v42  }
  0x72   :  { %511 = vperm.xlu1 %3872, %v187_v41  }
  0x74   :  { %681 = vperm.xlu0 %3871, %v221_v44  }
  0x76   :  { %616 = vperm.xlu1 %3872, %v208_v43  }
  0x78   :  { %601 = vperm.xlu0 %3871, %v205_v46  }
  0x7a   :  { %541 = vperm.xlu1 %3872, %v193_v45  }
  0x7e   :  { %646 = vperm.xlu1 %3872, %v214_v47  }
  0x82   :  { %486 = vperm.xlu1 %3872, %v182_v48  }
  0x86   :  { %571 = vperm.xlu1 %3872, %v199_v49  }
  0x8a   :  { %676 = vperm.xlu1 %3872, %v220_v50  }
  0x8e   :  { %546 = vperm.xlu1 %3872, %v194_v51  }
  0x92   :  { %656 = vperm.xlu1 %3872, %v216_v52  }
  0xc9   :  { %v4303_v24 = vpop.permute.xlu1 %471 }
  0xca   :  { %5622 = vst [vmem:[#allocation33_spill] sm:$0xff] %v4303_v24 }
  0xcb   :  { %v4325_v39 = vpop.permute.xlu0 %466 }
  0xcc   :  { %5629 = vst [vmem:[#allocation40_spill] sm:$0xff] %v4325_v39 }
  0xcd   :  { %v4308_v28 = vpop.permute.xlu1 %496 }
  0xce   :  { %5623 = vst [vmem:[#allocation34_spill] sm:$0xff] %v4308_v28 }
  0xcf   :  { %v4329_v41 = vpop.permute.xlu0 %561 }
  0xd0   :  { %5631 = vst [vmem:[#allocation42_spill] sm:$0xff] %v4329_v41 }
  0xd1   :  { %v4313_v32 = vpop.permute.xlu1 %501 }
  0xd2   :  { %5624 = vst [vmem:[#allocation35_spill] sm:$0xff] %v4313_v32 }
  0xd3   :  { %v4333_v43 = vpop.permute.xlu0 %586 }
  0xd4   :  { %5633 = vst [vmem:[#allocation44_spill] sm:$0xff] %v4333_v43 }
  0xd5   :  { %v4317_v35 = vpop.permute.xlu1 %526 }
  0xd6   :  { %5625 = vst [vmem:[#allocation36_spill] sm:$0xff] %v4317_v35 }
  0xd7   :  { %v4337_v45 = vpop.permute.xlu0 %481 }
  0xd8   :  { %5635 = vst [vmem:[#allocation46_spill] sm:$0xff] %v4337_v45 }
  0xd9   :  { %v4319_v36 = vpop.permute.xlu1 %531 }
  0xda   :  { %5626 = vst [vmem:[#allocation37_spill] sm:$0xff] %v4319_v36 }
  0xdb   :  { %v4341_v47 = vpop.permute.xlu0 %566 }
  0xdc   :  { %5637 = vst [vmem:[#allocation48_spill] sm:$0xff] %v4341_v47 }
  0xdd   :  { %v4321_v37 = vpop.permute.xlu1 %476 }
  0xde   :  { %5627 = vst [vmem:[#allocation38_spill] sm:$0xff] %v4321_v37 }
  0xdf   :  { %v4345_v49 = vpop.permute.xlu0 %621 }
  0xe0   :  { %5639 = vst [vmem:[#allocation50_spill] sm:$0xff] %v4345_v49 }
  0xe1   :  { %v4323_v38 = vpop.permute.xlu1 %506 }
  0xe2   :  { %5628 = vst [vmem:[#allocation39_spill] sm:$0xff] %v4323_v38 }
  0xe3   :  { %v4349_v51 = vpop.permute.xlu0 %596 }
  0xe4   :  { %5641 = vst [vmem:[#allocation52_spill] sm:$0xff] %v4349_v51 }
  0xe5   :  { %v4327_v40 = vpop.permute.xlu1 %556 }
  0xe6   :  { %5630 = vst [vmem:[#allocation41_spill] sm:$0xff] %v4327_v40 }
  0xe9   :  { %v4331_v42 = vpop.permute.xlu1 %536 }
  0xea   :  { %5632 = vst [vmem:[#allocation43_spill] sm:$0xff] %v4331_v42 }
  0xed   :  { %v4335_v44 = vpop.permute.xlu1 %591 }
  0xee   :  { %5634 = vst [vmem:[#allocation45_spill] sm:$0xff] %v4335_v44 }
  0xf1   :  { %v4339_v46 = vpop.permute.xlu1 %511 }
  0xf2   :  { %5636 = vst [vmem:[#allocation47_spill] sm:$0xff] %v4339_v46 }
  0xf5   :  { %v4343_v48 = vpop.permute.xlu1 %616 }
  0xf6   :  { %5638 = vst [vmem:[#allocation49_spill] sm:$0xff] %v4343_v48 }
  0xf9   :  { %v4347_v50 = vpop.permute.xlu1 %541 }
  0xfa   :  { %5640 = vst [vmem:[#allocation51_spill] sm:$0xff] %v4347_v50 }
  0xfd   :  { %v4351_v52 = vpop.permute.xlu1 %646 }
  0xfe   :  { %5642 = vst [vmem:[#allocation53_spill] sm:$0xff] %v4351_v52 }
 0x11f   :  { %v3487_v54 = vpop.f32.mrb[0].mxu0 }
 0x120   :  { %v4275_v55 = vadd.f32 %v3487_v54, %v3323_v53  ;;  %v324_v56 = vpop.f32.mrb[1].mxu0  ;;  %v4355_v54 = vpop.permute.xlu1 %486 }
 0x121   :  { %v4277_v57 = vadd.f32 %v3323_v53, %v324_v56  ;;  %5644 = vst [vmem:[#allocation55_spill] sm:$0xff] %v4355_v54 }
 0x122   :  { %v358_v58 = vsel %vm235_vm3, %v4275_v55, 0.0 }
 0x123   :  { %359 = vadd.xlane.f32.xlu0 %v358_v58  ;;  %v3490_v59 = vpop.f32.mrb[2].mxu0  ;;  %v355_v0 = vsel %vm235_vm3, %v4277_v57, 0.0 }
 0x124   :  { %v4281_v60 = vadd.f32 %v3490_v59, %v3323_v53  ;;  %v334_v61 = vpop.f32.mrb[3].mxu0  ;;  %v4359_v58 = vpop.permute.xlu1 %571 }
 0x125   :  { %v4283_v62 = vadd.f32 %v3323_v53, %v334_v61  ;;  %5646 = vst [vmem:[#allocation57_spill] sm:$0xff] %v4359_v58 }
 0x126   :  { %v364_v63 = vsel %vm235_vm3, %v4281_v60, 0.0 }
 0x127   :  { %365 = vadd.xlane.f32.xlu1 %v364_v63  ;;  %v3493_v1 = vpop.f32.mrb[4].mxu0  ;;  %356 = vadd.xlane.f32.xlu0 %v355_v0  ;;  %v361_v17 = vsel %vm235_vm3, %v4283_v62, 0.0 }
 0x128   :  { %v4289_v4 = vadd.f32 %v3493_v1, %v3323_v53  ;;  %v344_v13 = vpop.f32.mrb[5].mxu0  ;;  %v4363_v61 = vpop.permute.xlu1 %676 }
 0x129   :  { %v4291_v16 = vadd.f32 %v3323_v53, %v344_v13  ;;  %v4353_v53 = vpop.permute.xlu0 %651  ;;  %5648 = vst [vmem:[#allocation59_spill] sm:$0xff] %v4363_v61 }
 0x12a   :  { %v370_v19 = vsel %vm235_vm3, %v4289_v4, 0.0  ;;  %5643 = vst [vmem:[#allocation54_spill] sm:$0xff] %v4353_v53 }
 0x12b   :  { %362 = vadd.xlane.f32.xlu1 %v361_v17  ;;  %v367_v18 = vsel %vm235_vm3, %v4291_v16, 0.0 }
 0x12c   :  { %368 = vadd.xlane.f32.xlu0 %v367_v18  ;;  %v4367_v0 = vpop.permute.xlu1 %546 }
 0x12d   :  { %v4357_v56 = vpop.permute.xlu0 %516  ;;  %5650 = vst [vmem:[#allocation61_spill] sm:$0xff] %v4367_v0 }
 0x12e   :  { %5645 = vst [vmem:[#allocation56_spill] sm:$0xff] %v4357_v56 }
 0x12f   :  { %371 = vadd.xlane.f32.xlu1 %v370_v19 }
 0x130   :  { %v4371_v13 = vpop.permute.xlu1 %656 }
 0x131   :  { %v4361_v59 = vpop.permute.xlu0 %626  ;;  %5652 = vst [vmem:[#allocation63_spill] sm:$0xff] %v4371_v13 }
 0x132   :  { %5647 = vst [vmem:[#allocation58_spill] sm:$0xff] %v4361_v59 }
 0x135   :  { %v4365_v63 = vpop.permute.xlu0 %681 }
 0x136   :  { %5649 = vst [vmem:[#allocation60_spill] sm:$0xff] %v4365_v63 }
 0x139   :  { %v4369_v1 = vpop.permute.xlu0 %601 }
 0x13a   :  { %5651 = vst [vmem:[#allocation62_spill] sm:$0xff] %v4369_v1 }
 0x140   :  { %521 = vperm.xlu1 %3872, %v189_v20  }
 0x142   :  { %491 = vperm.xlu0 %3871, %v183_v21  }
 0x144   :  { %631 = vperm.xlu1 %3872, %v211_v22  }
 0x146   :  { %576 = vperm.xlu0 %3871, %v200_v23  }
 0x148   :  { %551 = vperm.xlu1 %3872, %v195_v25  }
 0x14a   :  { %686 = vperm.xlu0 %3871, %v222_v26  }
 0x14c   :  { %661 = vperm.xlu1 %3872, %v217_v27  }
 0x14e   :  { %606 = vperm.xlu0 %3871, %v206_v29  }
 0x150   :  { %636 = vperm.xlu1 %3872, %v212_v30  }
 0x152   :  { %581 = vperm.xlu0 %3871, %v201_v31  }
 0x154   :  { %611 = vperm.xlu1 %3872, %v207_v33  }
 0x156   :  { %691 = vperm.xlu0 %3871, %v223_v34  }
 0x1b0   :  { %v360_v17 = vpop.xlane.xlu0 %359 }
 0x1b1   :  { %v375_v18 = vmul.f32 0.071428575, %v360_v17 }
 0x1b3   :  { %v4374_v19 = vsub.f32 %v4275_v55, %v375_v18 }
 0x1b4   :  { %v366_v20 = vpop.xlane.xlu1 %365  ;;  %v357_v21 = vpop.xlane.xlu0 %356 }
 0x1b5   :  { %v377_v22 = vmul.f32 0.071428575, %v366_v20  ;;  %v374_v23 = vmul.f32 0.071428575, %v357_v21  ;;  %v387_v25 = vmul.f32 %v4374_v19, %v4374_v19 }
 0x1b7   :  { %v4379_v26 = vsub.f32 %v4281_v60, %v377_v22  ;;  %v4382_v27 = vsub.f32 %v4277_v57, %v374_v23  ;;  %v395_v29 = vsel %vm235_vm3, %v387_v25, 0.0 }
 0x1b8   :  { %396 = vadd.xlane.f32.xlu1 %v395_v29  ;;  %v363_v30 = vpop.xlane.xlu1 %362 }
 0x1b9   :  { %v376_v31 = vmul.f32 0.071428575, %v363_v30  ;;  %v369_v55 = vpop.xlane.xlu0 %368  ;;  %v389_v33 = vmul.f32 %v4379_v26, %v4379_v26  ;;  %v386_v34 = vmul.f32 %v4382_v27, %v4382_v27 }
 0x1ba   :  { %v378_v17 = vmul.f32 0.071428575, %v369_v55  ;;  %v219_v55 = vld [vmem:[%s4002_s13 + $0x148] sm:$0xff] }
 0x1bb   :  { %v4390_v18 = vsub.f32 %v4283_v62, %v376_v31  ;;  %v401_v60 = vsel %vm235_vm3, %v389_v33, 0.0  ;;  %v392_v57 = vsel %vm235_vm3, %v386_v34, 0.0  ;;  %v218_v33 = vld [vmem:[%s4002_s13 + $0x140] sm:$0xff]  ;;  %v224_v34 = vld [vmem:[%s4002_s13 + $0x170] sm:$0xff] }
 0x1bc   :  { %v4395_v20 = vsub.f32 %v4291_v16, %v378_v17  ;;  %402 = vadd.xlane.f32.xlu1 %v401_v60  ;;  %v372_v21 = vpop.xlane.xlu1 %371  ;;  %393 = vadd.xlane.f32.xlu0 %v392_v57  ;;  %v225_v17 = vld [vmem:[%s4002_s13 + $0x178] sm:$0xff]  ;;  %v890_v60 = vld [vmem:[%s4047_s24] sm:$0xff]  ;;  %v891_v57 = vld [vmem:[%s4047_s24 + $0x8] sm:$0x3f]  ;;  %s5776_s24 = sld [smem:[#allocation16_spill]] }
 0x1bd   :  { %v379_v22 = vmul.f32 0.071428575, %v372_v21  ;;  %v388_v23 = vmul.f32 %v4390_v18, %v4390_v18  ;;  %v5494_v21 = vmov 0.0|0.0  }
 0x1be   :  { %v390_v16 = vmul.f32 %v4395_v20, %v4395_v20  ;;  %3651 = vmatprep.subr.bf16.mxu1 %v5494_v21  ;;  %3661 = vmatprep.subr.bf16.mxu0 %v5494_v21 }
 0x1bf   :  { %v4400_v62 = vsub.f32 %v4289_v4, %v379_v22  ;;  %v398_v25 = vsel %vm235_vm3, %v388_v23, 0.0  ;;  %v213_v4 = vld [vmem:[%s4002_s13 + $0x118] sm:$0xff]  ;;  %v3652_v22 = vpack.c.bf16 %v891_v57, %v890_v60  ;;  %v5492_v23 = vmov 0.0   ;;  %s5724_s13 = sld [smem:[#allocation9_spill]] }
 0x1c0   :  { %399 = vadd.xlane.f32.xlu0 %v398_v25  ;;  %v404_v31 = vsel %vm235_vm3, %v390_v16, 0.0  ;;  %3498 = vmatprep.mubr.msk.f32.mxu1 %vm3981_vm5, %v5492_v23  ;;  %v4424_v25 = vpop.permute.xlu1 %521 }
 0x1c1   :  { %v391_v29 = vmul.f32 %v4400_v62, %v4400_v62  ;;  %3533 = vmatprep.mubr.msk.f32.mxu0 %vm3981_vm5, %v5492_v23  ;;  %3654 = vmatpush3.bf16.msk.msra.mxu1 %vm4186_vm2, %v3652_v22  ;;  %5653 = vst [vmem:[#allocation64_spill] sm:$0xff] %v4424_v25  ;;  %v4426_v16 = vpop.permute.xlu0 %491 }
 0x1c2   :  { %5654 = vst [vmem:[#allocation65_spill] sm:$0xff] %v4426_v16 }
 0x1c3   :  { %v407_v30 = vsel %vm235_vm3, %v391_v29, 0.0 }
 0x1c4   :  { %408 = vadd.xlane.f32.xlu1 %v407_v30  ;;  %405 = vadd.xlane.f32.xlu0 %v404_v31  ;;  %v4428_v29 = vpop.permute.xlu1 %631 }
 0x1c5   :  { %5655 = vst [vmem:[#allocation66_spill] sm:$0xff] %v4428_v29  ;;  %v4430_v30 = vpop.permute.xlu0 %576 }
 0x1c6   :  { %5656 = vst [vmem:[#allocation67_spill] sm:$0xff] %v4430_v30 }
 0x1c8   :  { %v4432_v31 = vpop.permute.xlu1 %551 }
 0x1c9   :  { %5657 = vst [vmem:[#allocation68_spill] sm:$0xff] %v4432_v31 }
 0x1d5   :  { %641 = vperm.xlu1 %3872, %v213_v4   ;;  %v4434_v4 = vpop.permute.xlu0 %686 }
 0x1d6   :  { %5658 = vst [vmem:[#allocation69_spill] sm:$0xff] %v4434_v4 }
 0x1d9   :  { %671 = vperm.xlu1 %3872, %v219_v55   ;;  %v4436_v55 = vpop.permute.xlu1 %661 }
 0x1da   :  { %666 = vperm.xlu0 %3871, %v218_v33   ;;  %5659 = vst [vmem:[#allocation70_spill] sm:$0xff] %v4436_v55  ;;  %v4438_v33 = vpop.permute.xlu0 %606 }
 0x1db   :  { %5660 = vst [vmem:[#allocation71_spill] sm:$0xff] %v4438_v33 }
 0x1de   :  { %696 = vperm.xlu0 %3871, %v224_v34   ;;  %v4440_v34 = vpop.permute.xlu1 %636 }
 0x1df   :  { %5661 = vst [vmem:[#allocation72_spill] sm:$0xff] %v4440_v34 }
 0x1e2   :  { %701 = vperm.xlu0 %3871, %v225_v17   ;;  %v4442_v17 = vpop.permute.xlu0 %581  ;;  %v4444_v60 = vpop.permute.xlu1 %611 }
 0x1e3   :  { %5662 = vst [vmem:[#allocation73_spill] sm:$0xff] %v4442_v17  ;;  %5663 = vst [vmem:[#allocation74_spill] sm:$0xff] %v4444_v60  ;;  %v3331_v60 = vld [vmem:[%s4032_s8] ss:$0 sm:$0xff]  ;;  %s5771_s8 = sld [smem:[#allocation6_spill]] }
 0x1e6   :  { %v4446_v57 = vpop.permute.xlu0 %691 }
 0x1e7   :  { %5664 = vst [vmem:[#allocation75_spill] sm:$0xff] %v4446_v57 }
 0x245   :  { %v397_v22 = vpop.xlane.xlu1 %396 }
 0x246   :  { %v411_v2 = vmul.f32 0.071428575, %v397_v22 }
 0x248   :  { %v417_v15 = vadd.f32 1e-05, %v411_v2 }
 0x249   :  { %v403_v14 = vpop.xlane.xlu1 %402  ;;  %v394_v9 = vpop.xlane.xlu0 %393 }
 0x24a   :  { %3873 = vrsqrt.f32 %v417_v15  ;;  %v413_v23 = vmul.f32 0.071428575, %v403_v14  ;;  %v410_v21 = vmul.f32 0.071428575, %v394_v9  ;;  %v3332_v9 = vld [vmem:[%s4037_s14] ss:$0 sm:$0xff] }
 0x24b   :  { %s5774_s14 = sld [smem:[#allocation14_spill]] }
 0x24c   :  { %v419_v11 = vadd.f32 1e-05, %v413_v23  ;;  %v416_v12 = vadd.f32 1e-05, %v410_v21 }
 0x24d   :  { %v400_v7 = vpop.xlane.xlu0 %399 }
 0x24e   :  { %3875 = vrsqrt.f32 %v419_v11  ;;  %v412_v10 = vmul.f32 0.071428575, %v400_v7 }
 0x24f   :  { %3877 = vrsqrt.f32 %v416_v12 }
 0x250   :  { %v418_v3 = vadd.f32 1e-05, %v412_v10 }
 0x251   :  { %v409_v6 = vpop.xlane.xlu1 %408  ;;  %v406_v8 = vpop.xlane.xlu0 %405 }
 0x252   :  { %3879 = vrsqrt.f32 %v418_v3  ;;  %v415_v5 = vmul.f32 0.071428575, %v409_v6  ;;  %v414_v22 = vmul.f32 0.071428575, %v406_v8 }
 0x254   :  { %v3874_v2 = vpop.eup %3873  ;;  %v421_v33 = vadd.f32 1e-05, %v415_v5  ;;  %v420_v15 = vadd.f32 1e-05, %v414_v22 }
 0x255   :  { %v429_v14 = vmul.f32 %v3874_v2, %v4374_v19 }
 0x256   :  { %3881 = vrsqrt.f32 %v421_v33 }
 0x257   :  { %v441_v21 = vmul.f32 %v3331_v60, %v429_v14  ;;  %3883 = vrsqrt.f32 %v420_v15 }
 0x258   :  { %v3876_v23 = vpop.eup %3875 }
 0x259   :  { %v3878_v11 = vpop.eup %3877  ;;  %v453_v7 = vadd.f32 %v3332_v9, %v441_v21  ;;  %v431_v10 = vmul.f32 %v3876_v23, %v4379_v26  ;;  %v4464_v14 = vpop.permute.xlu0 %666 }
 0x25a   :  { %v428_v12 = vmul.f32 %v3878_v11, %v4382_v27  ;;  %5665 = vst [vmem:[#allocation76_spill] sm:$0xff] %v4464_v14 }
 0x25b   :  { %v4453_v3 = vmax.f32 %v453_v7, 0.0  ;;  %v443_v6 = vmul.f32 %v3331_v60, %v431_v10 }
 0x25c   :  { %v3880_v8 = vpop.eup %3879  ;;  %v440_v1 = vmul.f32 %v3331_v60, %v428_v12 }
 0x25d   :  { %v455_v5 = vadd.f32 %v3332_v9, %v443_v6  ;;  %v430_v22 = vmul.f32 %v3880_v8, %v4390_v18  ;;  %v735_v19 = vadd.f32 %v4345_v49, %v4453_v3  ;;  %v741_v33 = vadd.f32 %v4353_v53, %v4453_v3  ;;  %v4495_v53 = vpop.permute.xlu0 %696 }
 0x25e   :  { %v452_v2 = vadd.f32 %v3332_v9, %v440_v1  ;;  %v747_v26 = vadd.f32 %v4365_v63, %v4453_v3  ;;  %5667 = vst [vmem:[#allocation78_spill] sm:$0xff] %v4495_v53 }
 0x25f   :  { %v4462_v15 = vmax.f32 %v455_v5, 0.0  ;;  %v442_v27 = vmul.f32 %v3331_v60, %v430_v22  ;;  %v838_v18 = vsel %vm235_vm3, %v735_v19, -inf  ;;  %v855_v12 = vsel %vm235_vm3, %v741_v33, -inf }
 0x260   :  { %v3882_v21 = vpop.eup %3881  ;;  %v4466_v23 = vmax.f32 %v452_v2, 0.0  ;;  %v872_v1 = vsel %vm235_vm3, %v747_v26, -inf }
 0x261   :  { %v3884_v11 = vpop.eup %3883  ;;  %v454_v7 = vadd.f32 %v3332_v9, %v442_v27  ;;  %v433_v10 = vmul.f32 %v3882_v21, %v4400_v62  ;;  %v737_v62 = vadd.f32 %v4428_v29, %v4462_v15  ;;  %v743_v33 = vadd.f32 %v4436_v55, %v4462_v15 }
 0x262   :  { %v432_v6 = vmul.f32 %v3884_v11, %v4395_v20  ;;  %v734_v8 = vadd.f32 %v4343_v48, %v4466_v23  ;;  %v740_v5 = vadd.f32 %v4351_v52, %v4466_v23  ;;  %v746_v22 = vadd.f32 %v4363_v61, %v4466_v23  ;;  %v4485_v20 = vpop.permute.xlu1 %641 }
 0x263   :  { %v4479_v19 = vmax.f32 %v454_v7, 0.0  ;;  %v445_v2 = vmul.f32 %v3331_v60, %v433_v10  ;;  %5666 = vst [vmem:[#allocation77_spill] sm:$0xff] %v4485_v20  ;;  %v749_v11 = vadd.f32 %v4446_v57, %v4462_v15 }
 0x264   :  { %v444_v26 = vmul.f32 %v3331_v60, %v432_v6  ;;  %v837_v27 = vsel %vm235_vm3, %v734_v8, -inf  ;;  %v854_v21 = vsel %vm235_vm3, %v740_v5, -inf  ;;  %v871_v5 = vsel %vm235_vm3, %v746_v22, -inf }
 0x265   :  { %v457_v63 = vadd.f32 %v3332_v9, %v445_v2  ;;  %v736_v7 = vadd.f32 %v4361_v59, %v4479_v19  ;;  %v839_v10 = vmax.f32 %v837_v27, %v838_v18  ;;  %v742_v61 = vadd.f32 %v4371_v13, %v4479_v19 }
 0x266   :  { %v456_v60 = vadd.f32 %v3332_v9, %v444_v26  ;;  %v856_v6 = vmax.f32 %v854_v21, %v855_v12  ;;  %v748_v8 = vadd.f32 %v4434_v4, %v4479_v19  ;;  %v873_v52 = vmax.f32 %v871_v5, %v872_v1 }
 0x267   :  { %v4500_v55 = vmax.f32 %v457_v63, 0.0  ;;  %v840_v2 = vsel %vm235_vm3, %v736_v7, -inf  ;;  %v857_v57 = vsel %vm235_vm3, %v742_v61, -inf  ;;  %v842_v9 = vsel %vm235_vm3, %v737_v62, -inf  ;;  %v4512_v7 = vpop.permute.xlu1 %671 }
 0x268   :  { %v4504_v18 = vmax.f32 %v456_v60, 0.0  ;;  %v841_v27 = vmax.f32 %v839_v10, %v840_v2  ;;  %v858_v13 = vmax.f32 %v856_v6, %v857_v57  ;;  %v874_v29 = vsel %vm235_vm3, %v748_v8, -inf  ;;  %5668 = vst [vmem:[#allocation79_spill] sm:$0xff] %v4512_v7 }
 0x269   :  { %v859_v12 = vsel %vm235_vm3, %v743_v33, -inf  ;;  %v875_v26 = vmax.f32 %v873_v52, %v874_v29  ;;  %v876_v22 = vsel %vm235_vm3, %v749_v11, -inf  ;;  %v739_v57 = vadd.f32 %v4485_v20, %v4500_v55  ;;  %v4522_v29 = vpop.permute.xlu0 %701 }
 0x26a   :  { %v738_v63 = vadd.f32 %v4440_v34, %v4504_v18  ;;  %v843_v21 = vmax.f32 %v841_v27, %v842_v9  ;;  %v860_v61 = vmax.f32 %v858_v13, %v859_v12  ;;  %v744_v1 = vadd.f32 %v4464_v14, %v4504_v18  ;;  %5669 = vst [vmem:[#allocation80_spill] sm:$0xff] %v4522_v29 }
 0x26b   :  { %v745_v62 = vadd.f32 %v4512_v7, %v4500_v55  ;;  %v877_v33 = vmax.f32 %v875_v26, %v876_v22  ;;  %v750_v52 = vadd.f32 %v4495_v53, %v4504_v18  ;;  %v751_v13 = vadd.f32 %v4522_v29, %v4500_v55 }
 0x26c   :  { %v844_v11 = vsel %vm235_vm3, %v738_v63, -inf  ;;  %v861_v10 = vsel %vm235_vm3, %v744_v1, -inf  ;;  %v846_v2 = vsel %vm235_vm3, %v739_v57, -inf  ;;  %v705_v9 = vadd.f32 %v4303_v24, %v4453_v3 }
 0x26d   :  { %v845_v60 = vmax.f32 %v843_v21, %v844_v11  ;;  %v862_v6 = vmax.f32 %v860_v61, %v861_v10  ;;  %v878_v8 = vsel %vm235_vm3, %v750_v52, -inf  ;;  %v863_v27 = vsel %vm235_vm3, %v745_v62, -inf }
 0x26e   :  { %v879_v5 = vmax.f32 %v877_v33, %v878_v8  ;;  %v880_v22 = vsel %vm235_vm3, %v751_v13, -inf  ;;  %v711_v63 = vadd.f32 %v4313_v32, %v4453_v3  ;;  %v704_v61 = vadd.f32 %v4325_v39, %v4466_v23 }
 0x26f   :  { %v4533_v12 = vmax.f32 %v845_v60, %v846_v2  ;;  %v4535_v26 = vmax.f32 %v862_v6, %v863_v27  ;;  %v717_v1 = vadd.f32 %v4319_v36, %v4453_v3  ;;  %v723_v57 = vadd.f32 %v4329_v41, %v4453_v3 }
 0x270   :  { %v4540_v21 = vmax.f32 %v879_v5, %v880_v22  ;;  %v706_v62 = vadd.f32 %v4321_v37, %v4479_v19  ;;  %v707_v33 = vadd.f32 %v4337_v45, %v4462_v15  ;;  %v708_v52 = vadd.f32 %v4355_v54, %v4504_v18 }
 0x271   :  { %v709_v11 = vadd.f32 %v4426_v16, %v4500_v55  ;;  %v710_v10 = vadd.f32 %v4308_v28, %v4466_v23  ;;  %v712_v13 = vadd.f32 %v4323_v38, %v4479_v19  ;;  %v713_v60 = vadd.f32 %v4339_v46, %v4462_v15 }
 0x272   :  { %v714_v6 = vadd.f32 %v4357_v56, %v4504_v18  ;;  %v715_v2 = vadd.f32 %v4424_v25, %v4500_v55  ;;  %v716_v27 = vadd.f32 %v4317_v35, %v4466_v23  ;;  %v718_v29 = vadd.f32 %v4331_v42, %v4479_v19 }
 0x273   :  { %v719_v53 = vadd.f32 %v4347_v50, %v4462_v15  ;;  %v720_v4 = vadd.f32 %v4367_v0, %v4504_v18  ;;  %v721_v5 = vadd.f32 %v4432_v31, %v4500_v55  ;;  %v722_v8 = vadd.f32 %v4327_v40, %v4466_v23 }
 0x274   :  { %v724_v7 = vadd.f32 %v4341_v47, %v4479_v19  ;;  %v725_v22 = vadd.f32 %v4359_v58, %v4462_v15  ;;  %v726_v14 = vadd.f32 %v4430_v30, %v4504_v18  ;;  %v727_v20 = vadd.f32 %v4442_v17, %v4500_v55  ;;  %v5670_v30 = vld [vmem:[#allocation62_spill] sm:$0xff]  ;;  %v5671_v17 = vld [vmem:[#allocation71_spill] sm:$0xff] }
 0x275   :  { %v728_v34 = vadd.f32 %v4333_v43, %v4466_v23  ;;  %v752_v0 = vsel %vm235_vm3, %v704_v61, -inf  ;;  %v729_v56 = vadd.f32 %v4335_v44, %v4453_v3  ;;  %v730_v54 = vadd.f32 %v4349_v51, %v4479_v19  ;;  %v5672_v61 = vld [vmem:[#allocation74_spill] sm:$0xff] }
 0x276   :  { %v753_v31 = vsel %vm235_vm3, %v705_v9, -inf  ;;  %v755_v25 = vsel %vm235_vm3, %v706_v62, -inf  ;;  %v731_v16 = vadd.f32 %v5670_v30, %v4462_v15  ;;  %v732_v59 = vadd.f32 %v5671_v17, %v4504_v18 }
 0x277   :  { %v754_v49 = vmax.f32 %v752_v0, %v753_v31  ;;  %v769_v58 = vsel %vm235_vm3, %v710_v10, -inf  ;;  %v733_v47 = vadd.f32 %v5672_v61, %v4500_v55  ;;  %v757_v42 = vsel %vm235_vm3, %v707_v33, -inf }
 0x278   :  { %v770_v51 = vsel %vm235_vm3, %v711_v63, -inf  ;;  %v772_v9 = vsel %vm235_vm3, %v712_v13, -inf  ;;  %v759_v62 = vsel %vm235_vm3, %v708_v52, -inf  ;;  %v786_v30 = vsel %vm235_vm3, %v716_v27, -inf }
 0x279   :  { %v756_v50 = vmax.f32 %v754_v49, %v755_v25  ;;  %v771_v38 = vmax.f32 %v769_v58, %v770_v51  ;;  %v761_v17 = vsel %vm235_vm3, %v709_v11, -inf  ;;  %v774_v0 = vsel %vm235_vm3, %v713_v60, -inf }
 0x27a   :  { %v787_v31 = vsel %vm235_vm3, %v717_v1, -inf  ;;  %v789_v10 = vsel %vm235_vm3, %v718_v29, -inf  ;;  %v776_v63 = vsel %vm235_vm3, %v714_v6, -inf  ;;  %v778_v49 = vsel %vm235_vm3, %v715_v2, -inf }
 0x27b   :  { %v758_v61 = vmax.f32 %v756_v50, %v757_v42  ;;  %v773_v33 = vmax.f32 %v771_v38, %v772_v9  ;;  %v788_v37 = vmax.f32 %v786_v30, %v787_v31  ;;  %v803_v25 = vsel %vm235_vm3, %v722_v8, -inf }
 0x27c   :  { %v804_v51 = vsel %vm235_vm3, %v723_v57, -inf  ;;  %v806_v58 = vsel %vm235_vm3, %v724_v7, -inf  ;;  %v791_v1 = vsel %vm235_vm3, %v719_v53, -inf  ;;  %v793_v42 = vsel %vm235_vm3, %v720_v4, -inf }
 0x27d   :  { %v760_v52 = vmax.f32 %v758_v61, %v759_v62  ;;  %v775_v11 = vmax.f32 %v773_v33, %v774_v0  ;;  %v790_v13 = vmax.f32 %v788_v37, %v789_v10  ;;  %v805_v60 = vmax.f32 %v803_v25, %v804_v51 }
 0x27e   :  { %v820_v38 = vsel %vm235_vm3, %v728_v34, -inf  ;;  %v821_v50 = vsel %vm235_vm3, %v729_v56, -inf  ;;  %v808_v57 = vsel %vm235_vm3, %v725_v22, -inf  ;;  %v810_v7 = vsel %vm235_vm3, %v726_v14, -inf }
 0x27f   :  { %v762_v30 = vmax.f32 %v760_v52, %v761_v17  ;;  %v777_v29 = vmax.f32 %v775_v11, %v776_v63  ;;  %v792_v6 = vmax.f32 %v790_v13, %v791_v1  ;;  %v807_v8 = vmax.f32 %v805_v60, %v806_v58 }
 0x280   :  { %v822_v2 = vmax.f32 %v820_v38, %v821_v50  ;;  %v823_v37 = vsel %vm235_vm3, %v730_v54, -inf  ;;  %v795_v4 = vsel %vm235_vm3, %v721_v5, -inf  ;;  %v825_v56 = vsel %vm235_vm3, %v731_v16, -inf }
 0x281   :  { %v763_v27 = vrot.slane %v762_v30, 4  ;;  %v779_v61 = vmax.f32 %v777_v29, %v778_v49  ;;  %v794_v53 = vmax.f32 %v792_v6, %v793_v42  ;;  %v809_v9 = vmax.f32 %v807_v8, %v808_v57 }
 0x282   :  { %v824_v34 = vmax.f32 %v822_v2, %v823_v37  ;;  %v827_v17 = vsel %vm235_vm3, %v732_v59, -inf  ;;  %v5673_v14 = vrot.slane %v4533_v12, 4  ;;  %v812_v54 = vsel %vm235_vm3, %v727_v20, -inf }
 0x283   :  { %v764_v62 = vmax.f32 %v762_v30, %v763_v27  ;;  %v780_v0 = vrot.slane %v779_v61, 4  ;;  %v796_v31 = vmax.f32 %v794_v53, %v795_v4  ;;  %v811_v22 = vmax.f32 %v809_v9, %v810_v7 }
 0x284   :  { %v849_v10 = vmax.f32 %v4533_v12, %v5673_v14  ;;  %v826_v33 = vmax.f32 %v824_v34, %v825_v56  ;;  %v5674_v51 = vrot.slane %v4535_v26, 4  ;;  %v5675_v59 = vrot.slane %v4540_v21, 4 }
 0x285   :  { %v765_v63 = vrot.slane %v764_v62, 2  ;;  %v781_v49 = vmax.f32 %v779_v61, %v780_v0  ;;  %v797_v25 = vrot.slane %v796_v31, 4  ;;  %v813_v5 = vmax.f32 %v811_v22, %v812_v54 }
 0x286   :  { %v866_v16 = vmax.f32 %v4535_v26, %v5674_v51  ;;  %v883_v58 = vmax.f32 %v4540_v21, %v5675_v59  ;;  %v828_v52 = vmax.f32 %v826_v33, %v827_v17  ;;  %v829_v11 = vsel %vm235_vm3, %v733_v47, -inf }
 0x287   :  { %v766_v13 = vmax.f32 %v764_v62, %v765_v63  ;;  %v782_v12 = vrot.slane %v781_v49, 2  ;;  %v798_v60 = vmax.f32 %v796_v31, %v797_v25  ;;  %v814_v20 = vrot.slane %v813_v5, 4 }
 0x288   :  { %v850_v1 = vrot.slane %v849_v10, 2  ;;  %v830_v42 = vmax.f32 %v828_v52, %v829_v11  ;;  %v867_v6 = vrot.slane %v866_v16, 2  ;;  %v884_v8 = vrot.slane %v883_v58, 2  ;;  %v4649_v11 = vld [vmem:[%s3997_s9] sm:$0xff] }
 0x289   :  { %v767_v38 = vrot.slane %v766_v13, 1  ;;  %v783_v50 = vmax.f32 %v781_v49, %v782_v12  ;;  %v799_v30 = vrot.slane %v798_v60, 2  ;;  %v815_v29 = vmax.f32 %v813_v5, %v814_v20  ;;  %v889_v12 = vld [vmem:[%s4042_s19 + $0x8] sm:$0x3f] }
 0x28a   :  { %v831_v26 = vrot.slane %v830_v42, 4  ;;  %v851_v47 = vmax.f32 %v849_v10, %v850_v1  ;;  %v868_v4 = vmax.f32 %v866_v16, %v867_v6  ;;  %v885_v17 = vmax.f32 %v883_v58, %v884_v8  ;;  %v4656_v1 = vld [vmem:[%s3997_s9 + $0x8] sm:$0xff]  ;;  %v3348_v8 = vld [vmem:[%s4052_s30] ss:$0 sm:$0xff]  ;;  %s5777_s30 = sld [smem:[#allocation5_spill]] }
 0x28b   :  { %v768_v57 = vmax.f32 %v766_v13, %v767_v38  ;;  %v784_v7 = vrot.slane %v783_v50, 1  ;;  %v800_v2 = vmax.f32 %v798_v60, %v799_v30  ;;  %v816_v21 = vrot.slane %v815_v29, 2  ;;  %v888_v13 = vld [vmem:[%s4042_s19] sm:$0xff]  ;;  %v4659_v38 = vld [vmem:[%s3997_s9 + $0x10] sm:$0xff]  ;;  %v4670_v30 = vld [vmem:[%s3997_s9 + $0x18] sm:$0xff]  ;;  %s5775_s19 = sld [smem:[#allocation12_spill]] }
 0x28c   :  { %v832_v37 = vmax.f32 %v830_v42, %v831_v26  ;;  %v852_v31 = vrot.slane %v851_v47, 1  ;;  %v869_v33 = vrot.slane %v868_v4, 1  ;;  %v886_v10 = vrot.slane %v885_v17, 1  ;;  %5677 = vst [vmem:[#allocation81_spill] sm:$0xff] %v4670_v30  ;;  %v4680_v6 = vld [vmem:[%s3997_s9 + $0x28] sm:$0xff] }
 0x28d   :  { %v785_v27 = vmax.f32 %v783_v50, %v784_v7  ;;  %v801_v61 = vrot.slane %v800_v2, 1  ;;  %v817_v53 = vmax.f32 %v815_v29, %v816_v21  ;;  %v3655_v60 = vpack.c.bf16 %v889_v12, %v888_v13  ;;  %v4673_v29 = vld [vmem:[%s3997_s9 + $0x20] sm:$0xff]  ;;  %5679 = vst [vmem:[#allocation83_spill] sm:$0xff] %v4680_v6  ;;  %s5723_s9 = sld [smem:[#allocation15_spill]] }
 0x28e   :  { %v833_v9 = vrot.slane %v832_v37, 2  ;;  %v853_v25 = vmax.f32 %v851_v47, %v852_v31  ;;  %v870_v5 = vmax.f32 %v868_v4, %v869_v33  ;;  %v887_v16 = vmax.f32 %v885_v17, %v886_v10  ;;  %5678 = vst [vmem:[#allocation82_spill] sm:$0xff] %v4673_v29  ;;  %v5693_v50 = vld [vmem:[#allocation68_spill] sm:$0xff] }
 0x28f   :  { %v802_v34 = vmax.f32 %v800_v2, %v801_v61  ;;  %v818_v56 = vrot.slane %v817_v53, 1  ;;  %v901_v62 = vsel %vm900_vm6, %v785_v27, %v768_v57 }
 0x290   :  { %v834_v0 = vmax.f32 %v832_v37, %v833_v9 }
 0x291   :  { %v819_v22 = vmax.f32 %v817_v53, %v818_v56  ;;  %v903_v14 = vsel %vm902_vm7, %v802_v34, %v901_v62 }
 0x292   :  { %v835_v54 = vrot.slane %v834_v0, 1 }
 0x293   :  { %v905_v63 = vsel %vm904_vm8, %v819_v22, %v903_v14 }
 0x294   :  { %v836_v49 = vmax.f32 %v834_v0, %v835_v54 }
 0x296   :  { %v907_v51 = vsel %vm906_vm9, %v836_v49, %v905_v63 }
 0x297   :  { %v909_v59 = vsel %vm908_vm10, %v853_v25, %v907_v51 }
 0x298   :  { %v911_v58 = vsel %vm910_vm11, %v870_v5, %v909_v59 }
 0x299   :  { %v913_v52 = vsel %vm912_vm12, %v887_v16, %v911_v58 }
 0x29a   :  { %3499 = vmatmul.mubr.msk.f32.vlgmr.msra.gmra.mrb[0].mxu1 %vm235_vm3, %v913_v52 }
 0x29b   :  { %3503 = vmatprep.mubr.msk.f32.mxu1 %vm989_vm13, %v4649_v11 }
 0x36d   :  { %v985_v20 = vpop.f32.mrb[0].mxu1 }
 0x36e   :  { %v3500_v42 = vpop.f32.mrb[1].mxu1  ;;  %3501 = vmatprep.subr.mxu1 %v985_v20 }
 0x36f   :  { %3502 = vmatpush3.msra.mxu1 %v985_v20 }
 0x370   :  { %3504 = vmatmul.mubr.msk.f32.vlgmr.msra.gmra.mrb[2].mxu1 %vm989_vm13, %v4656_v1  ;;  %3657 = vmatprep.subr.msk.bf16.mxu1 %vm4186_vm2, %v3655_v60 }
 0x371   :  { %3506 = vmatprep.mubr.msk.f32.mxu1 %vm989_vm13, %v4659_v38  ;;  %3660 = vmatpush3.bf16.msk.msra.mxu1 %vm4186_vm2, %v3655_v60 }
 0x374   :  { %3507 = vmatmul.mubr.msk.f32.gmra.mrb[4].mxu1 %vm989_vm13, %v4670_v30 }
 0x375   :  { %3509 = vmatprep.mubr.msk.f32.mxu1 %vm989_vm13, %v4673_v29 }
 0x378   :  { %3510 = vmatmul.mubr.msk.f32.gmra.mrb[6].mxu1 %vm989_vm13, %v4680_v6 }
 0x379   :  { %3516 = vmatprep.mubr.msk.f32.mxu1 %vm235_vm3, %v4466_v23 }
 0x37c   :  { %3517 = vmatmul.mubr.msk.f32.vlgmr.msra.gmra.mrb[2].mxu1 %vm235_vm3, %v4453_v3 }
 0x37d   :  { %3519 = vmatprep.mubr.msk.f32.mxu1 %vm235_vm3, %v4479_v19 }
 0x380   :  { %3520 = vmatmul.mubr.msk.f32.gmra.mrb[4].mxu1 %vm235_vm3, %v4462_v15 }
 0x381   :  { %3522 = vmatprep.mubr.msk.f32.mxu1 %vm235_vm3, %v4504_v18 }
 0x384   :  { %3523 = vmatmul.mubr.msk.f32.gmra.mrb[6].mxu1 %vm235_vm3, %v4500_v55 }
 0x44f   :  { %v3518_v26 = vpop.f32.mrb[2].mxu1 }
 0x450   :  { %v1227_v57 = vadd.f32 %v3518_v26, %v3348_v8  ;;  %v1190_v23 = vpop.f32.mrb[3].mxu1 }
 0x451   :  { %v1226_v7 = vadd.f32 %v3348_v8, %v1190_v23 }
 0x452   :  { %v1238_v3 = vsel %vm1234_vm14, %v1227_v57, 0.0 }
 0x453   :  { %1239 = vadd.xlane.f32.xlu0 %v1238_v3  ;;  %v3521_v2 = vpop.f32.mrb[4].mxu1  ;;  %v1235_v19 = vsel %vm1234_vm14, %v1226_v7, 0.0  ;;  %v1528_v3 = vld [vmem:[%s4067_s20] sm:$0xff] }
 0x454   :  { %v1229_v21 = vadd.f32 %v3521_v2, %v3348_v8  ;;  %1236 = vadd.xlane.f32.xlu1 %v1235_v19  ;;  %v1200_v15 = vpop.f32.mrb[5].mxu1  ;;  %v1529_v2 = vld [vmem:[%s4067_s20 + $0x8] sm:$0xff] }
 0x455   :  { %v1228_v37 = vadd.f32 %v3348_v8, %v1200_v15  ;;  %v3668_v19 = vpack.c.bf16 %v1529_v2, %v1528_v3  ;;  %v1531_v15 = vld [vmem:[%s4067_s20 + $0x18] sm:$0xf] }
 0x456   :  { %v1244_v18 = vsel %vm1234_vm14, %v1229_v21, 0.0 }
 0x457   :  { %v3524_v47 = vpop.f32.mrb[6].mxu1  ;;  %v1241_v55 = vsel %vm1234_vm14, %v1228_v37, 0.0  ;;  %3669 = vmatprep.subr.bf16.mxu1 %v3668_v19 }
 0x458   :  { %v1231_v27 = vadd.f32 %v3524_v47, %v3348_v8  ;;  %1245 = vadd.xlane.f32.xlu1 %v1244_v18  ;;  %1242 = vadd.xlane.f32.xlu0 %v1241_v55  ;;  %v1210_v61 = vpop.f32.mrb[7].mxu1  ;;  %v5680_v18 = vmov 0.0|0.0   ;;  %v1532_v47 = vld [vmem:[%s4072_s27] sm:$0xff]  ;;  %v1533_v55 = vld [vmem:[%s4072_s27 + $0x8] sm:$0xff] }
 0x459   :  { %v1230_v53 = vadd.f32 %v3348_v8, %v1210_v61  ;;  %3671 = vmatpush3.bf16.msra.mxu1 %v3668_v19  ;;  %v3662_v61 = vpack.c.bf16 %v1533_v55, %v1532_v47 }
 0x45a   :  { %v1250_v9 = vsel %vm1234_vm14, %v1231_v27, 0.0 }
 0x45b   :  { %v1247_v4 = vsel %vm1234_vm14, %v1230_v53, 0.0  ;;  %3663 = vmatpush3.bf16.msra.mxu0 %v3662_v61 }
 0x45c   :  { %1251 = vadd.xlane.f32.xlu1 %v1250_v9  ;;  %1248 = vadd.xlane.f32.xlu0 %v1247_v4 }
 0x45d   :  { %3664 = vmatprep.subr.bf16.mxu0 %v5680_v18 }
 0x4e0   :  { %v1240_v34 = vpop.xlane.xlu0 %1239 }
 0x4e1   :  { %v1255_v56 = vmul.f32 0.035714287, %v1240_v34  ;;  %v1237_v17 = vpop.xlane.xlu1 %1236 }
 0x4e2   :  { %v1254_v62 = vmul.f32 0.035714287, %v1237_v17 }
 0x4e3   :  { %v4703_v0 = vsub.f32 %v1227_v57, %v1255_v56 }
 0x4e4   :  { %v4705_v31 = vsub.f32 %v1226_v7, %v1254_v62 }
 0x4e5   :  { %v1246_v22 = vpop.xlane.xlu1 %1245  ;;  %v1243_v14 = vpop.xlane.xlu0 %1242  ;;  %v1267_v54 = vmul.f32 %v4703_v0, %v4703_v0 }
 0x4e6   :  { %v1257_v33 = vmul.f32 0.035714287, %v1246_v22  ;;  %v1256_v10 = vmul.f32 0.035714287, %v1243_v14  ;;  %v1266_v63 = vmul.f32 %v4705_v31, %v4705_v31 }
 0x4e7   :  { %v1275_v49 = vsel %vm1234_vm14, %v1267_v54, 0.0 }
 0x4e8   :  { %v4712_v25 = vsub.f32 %v1229_v21, %v1257_v33  ;;  %v4714_v5 = vsub.f32 %v1228_v37, %v1256_v10  ;;  %1276 = vadd.xlane.f32.xlu1 %v1275_v49  ;;  %v1272_v51 = vsel %vm1234_vm14, %v1266_v63, 0.0  ;;  %v1530_v21 = vld [vmem:[%s4067_s20 + $0x10] sm:$0xff]  ;;  %s5790_s20 = sld [smem:[#allocation17_spill]] }
 0x4e9   :  { %v1252_v16 = vpop.xlane.xlu1 %1251  ;;  %1273 = vadd.xlane.f32.xlu0 %v1272_v51  ;;  %v1249_v59 = vpop.xlane.xlu0 %1248  ;;  %v3672_v37 = vpack.c.bf16 %v1531_v15, %v1530_v21 }
 0x4ea   :  { %v1259_v58 = vmul.f32 0.035714287, %v1252_v16  ;;  %v1258_v52 = vmul.f32 0.035714287, %v1249_v59  ;;  %v1269_v13 = vmul.f32 %v4712_v25, %v4712_v25  ;;  %v1268_v12 = vmul.f32 %v4714_v5, %v4714_v5 }
 0x4eb   :  { %3674 = vmatprep.subr.msk.bf16.mxu1 %vm3666_vm0, %v3672_v37 }
 0x4ec   :  { %v4721_v60 = vsub.f32 %v1231_v27, %v1259_v58  ;;  %v4723_v20 = vsub.f32 %v1230_v53, %v1258_v52  ;;  %v1281_v42 = vsel %vm1234_vm14, %v1269_v13, 0.0  ;;  %v1278_v8 = vsel %vm1234_vm14, %v1268_v12, 0.0  ;;  %3677 = vmatpush3.bf16.msk.msra.mxu1 %vm3666_vm0, %v3672_v37  ;;  %v1534_v27 = vld [vmem:[%s4072_s27 + $0x10] sm:$0xff]  ;;  %v1535_v53 = vld [vmem:[%s4072_s27 + $0x18] sm:$0xf]  ;;  %s5792_s27 = sld [smem:[#allocation19_spill]] }
 0x4ed   :  { %1282 = vadd.xlane.f32.xlu1 %v1281_v42  ;;  %1279 = vadd.xlane.f32.xlu0 %v1278_v8  ;;  %v3665_v9 = vpack.c.bf16 %v1535_v53, %v1534_v27  ;;  %v3349_v42 = vld [vmem:[%s4057_s6] ss:$0 sm:$0xff]  ;;  %s5778_s6 = sld [smem:[#allocation7_spill]] }
 0x4ee   :  { %v1271_v26 = vmul.f32 %v4721_v60, %v4721_v60  ;;  %v1270_v57 = vmul.f32 %v4723_v20, %v4723_v20  ;;  %3678 = vmatprep.subr.bf16.mxu1 %v5680_v18 }
 0x4ef   :  { %3667 = vmatpush3.bf16.msk.msra.mxu0 %vm3666_vm0, %v3665_v9  ;;  %vm1853_vm0 = vcmask 457728  }
 0x4f0   :  { %v1287_v23 = vsel %vm1234_vm14, %v1271_v26, 0.0  ;;  %v1284_v7 = vsel %vm1234_vm14, %v1270_v57, 0.0  ;;  %v3350_v57 = vld [vmem:[%s4062_s12] ss:$0 sm:$0xff]  ;;  %s5783_s12 = sld [smem:[#allocation18_spill]] }
 0x4f1   :  { %1288 = vadd.xlane.f32.xlu1 %v1287_v23  ;;  %1285 = vadd.xlane.f32.xlu0 %v1284_v7 }
 0x575   :  { %v1277_v4 = vpop.xlane.xlu1 %1276 }
 0x576   :  { %v1291_v34 = vmul.f32 0.035714287, %v1277_v4  ;;  %v1274_v56 = vpop.xlane.xlu0 %1273 }
 0x577   :  { %v1290_v17 = vmul.f32 0.035714287, %v1274_v56 }
 0x578   :  { %v1297_v62 = vadd.f32 1e-05, %v1291_v34 }
 0x579   :  { %v1296_v22 = vadd.f32 1e-05, %v1290_v17 }
 0x57a   :  { %3885 = vrsqrt.f32 %v1297_v62  ;;  %v1283_v14 = vpop.xlane.xlu1 %1282  ;;  %v1280_v54 = vpop.xlane.xlu0 %1279 }
 0x57b   :  { %3887 = vrsqrt.f32 %v1296_v22  ;;  %v1293_v33 = vmul.f32 0.035714287, %v1283_v14  ;;  %v1292_v10 = vmul.f32 0.035714287, %v1280_v54 }
 0x57d   :  { %v1299_v63 = vadd.f32 1e-05, %v1293_v33  ;;  %v1298_v49 = vadd.f32 1e-05, %v1292_v10 }
 0x57e   :  { %v1289_v51 = vpop.xlane.xlu1 %1288  ;;  %v1286_v16 = vpop.xlane.xlu0 %1285 }
 0x57f   :  { %3889 = vrsqrt.f32 %v1299_v63  ;;  %v1295_v59 = vmul.f32 0.035714287, %v1289_v51  ;;  %v1294_v58 = vmul.f32 0.035714287, %v1286_v16 }
 0x580   :  { %3891 = vrsqrt.f32 %v1298_v49 }
 0x581   :  { %v1301_v52 = vadd.f32 1e-05, %v1295_v59  ;;  %v1300_v13 = vadd.f32 1e-05, %v1294_v58 }
 0x583   :  { %3893 = vrsqrt.f32 %v1301_v52 }
 0x584   :  { %v3886_v12 = vpop.eup %3885  ;;  %3895 = vrsqrt.f32 %v1300_v13 }
 0x585   :  { %v3888_v8 = vpop.eup %3887  ;;  %v1309_v26 = vmul.f32 %v3886_v12, %v4703_v0 }
 0x586   :  { %v1308_v23 = vmul.f32 %v3888_v8, %v4705_v31 }
 0x587   :  { %v1321_v7 = vmul.f32 %v3349_v42, %v1309_v26  ;;  %v5682_v26 = vld [vmem:[#allocation39_spill] sm:$0xff] }
 0x588   :  { %v1320_v3 = vmul.f32 %v3349_v42, %v1308_v23  ;;  %v5683_v23 = vld [vmem:[#allocation51_spill] sm:$0xff] }
 0x589   :  { %v3890_v2 = vpop.eup %3889  ;;  %v1333_v19 = vadd.f32 %v3350_v57, %v1321_v7 }
 0x58a   :  { %v3892_v21 = vpop.eup %3891  ;;  %v1332_v15 = vadd.f32 %v3350_v57, %v1320_v3  ;;  %v1311_v37 = vmul.f32 %v3890_v2, %v4712_v25  ;;  %v5684_v2 = vld [vmem:[#allocation43_spill] sm:$0xff] }
 0x58b   :  { %v4749_v47 = vmax.f32 %v1333_v19, 0.0  ;;  %v1310_v55 = vmul.f32 %v3892_v21, %v4714_v5  ;;  %v5685_v21 = vld [vmem:[#allocation48_spill] sm:$0xff] }
 0x58c   :  { %v4752_v27 = vmax.f32 %v1332_v15, 0.0  ;;  %v1323_v61 = vmul.f32 %v3349_v42, %v1311_v37  ;;  %v5686_v37 = vld [vmem:[#allocation57_spill] sm:$0xff] }
 0x58d   :  { %v3894_v53 = vpop.eup %3893  ;;  %v1322_v0 = vmul.f32 %v3349_v42, %v1310_v55  ;;  %v1345_v34 = vadd.f32 %v4749_v47, %v4303_v24  ;;  %v4764_v5 = vadd.f32 %v4749_v47, %v4313_v32  ;;  %v4768_v17 = vadd.f32 %v4749_v47, %v4319_v36 }
 0x58e   :  { %v3896_v9 = vpop.eup %3895  ;;  %v1335_v4 = vadd.f32 %v3350_v57, %v1323_v61  ;;  %v1313_v31 = vmul.f32 %v3894_v53, %v4721_v60  ;;  %3555 = vmatprep.mubr.msk.f32.mxu1 %vm1234_vm14, %v4752_v27  ;;  %v1344_v22 = vadd.f32 %v4752_v27, %v4325_v39  ;;  %v4778_v33 = vadd.f32 %v4752_v27, %v4317_v35  ;;  %v5687_v61 = vld [vmem:[#allocation52_spill] sm:$0xff] }
 0x58f   :  { %v1334_v25 = vadd.f32 %v3350_v57, %v1322_v0  ;;  %v1312_v56 = vmul.f32 %v3896_v9, %v4723_v20  ;;  %3556 = vmatmul.mubr.msk.f32.vlgmr.msra.gmra.mrb[8].mxu1 %vm1234_vm14, %v4749_v47  ;;  %v1350_v20 = vadd.f32 %v4752_v27, %v4308_v28  ;;  %v4782_v10 = vadd.f32 %v4752_v27, %v4327_v40  ;;  %v5688_v0 = vld [vmem:[#allocation62_spill] sm:$0xff]  ;;  %v5709_v35 = vld [vmem:[#allocation76_spill] sm:$0xff] }
 0x590   :  { %v4770_v60 = vmax.f32 %v1335_v4, 0.0  ;;  %v1325_v62 = vmul.f32 %v3349_v42, %v1313_v31  ;;  %v4786_v49 = vadd.f32 %v4749_v47, %v4329_v41  ;;  %v4790_v51 = vadd.f32 %v4752_v27, %v4333_v43  ;;  %v5689_v4 = vld [vmem:[#allocation50_spill] sm:$0xff] }
 0x591   :  { %v1340_v14 = vmax.f32 %v1334_v25, 0.0  ;;  %v1324_v54 = vmul.f32 %v3349_v42, %v1312_v56  ;;  %v4794_v16 = vadd.f32 %v4749_v47, %v4335_v44  ;;  %v4803_v13 = vadd.f32 %v4752_v27, %v4343_v48  ;;  %v5681_v42 = vld [vmem:[#allocation38_spill] sm:$0xff]  ;;  %v5696_v44 = vld [vmem:[#allocation56_spill] sm:$0xff] }
 0x592   :  { %v1337_v63 = vadd.f32 %v3350_v57, %v1325_v62  ;;  %v1347_v58 = vadd.f32 %v4770_v60, %v4337_v45  ;;  %v1353_v52 = vadd.f32 %v4770_v60, %v4339_v46  ;;  %v1359_v7 = vadd.f32 %v4770_v60, %v5683_v23  ;;  %v5690_v25 = vld [vmem:[#allocation58_spill] sm:$0xff]  ;;  %v5691_v62 = vld [vmem:[#allocation65_spill] sm:$0xff] }
 0x593   :  { %v1336_v59 = vadd.f32 %v3350_v57, %v1324_v54  ;;  %3558 = vmatprep.mubr.msk.f32.mxu1 %vm1234_vm14, %v1340_v14  ;;  %v1346_v8 = vadd.f32 %v1340_v14, %v5681_v42  ;;  %v1352_v57 = vadd.f32 %v1340_v14, %v5682_v26  ;;  %v1358_v19 = vadd.f32 %v1340_v14, %v5684_v2  ;;  %v5699_v2 = vld [vmem:[#allocation71_spill] sm:$0xff]  ;;  %v5700_v26 = vld [vmem:[#allocation74_spill] sm:$0xff] }
 0x594   :  { %v4805_v12 = vmax.f32 %v1337_v63, 0.0  ;;  %3559 = vmatmul.mubr.msk.f32.gmra.mrb[10].mxu1 %vm1234_vm14, %v4770_v60  ;;  %v1364_v15 = vadd.f32 %v1340_v14, %v5685_v21  ;;  %v1365_v55 = vadd.f32 %v4770_v60, %v5686_v37  ;;  %v4820_v53 = vadd.f32 %v1340_v14, %v5687_v61  ;;  %v5692_v63 = vld [vmem:[#allocation64_spill] sm:$0xff]  ;;  %v5697_v37 = vld [vmem:[#allocation61_spill] sm:$0xff]  ;;  %v5698_v21 = vld [vmem:[#allocation67_spill] sm:$0xff] }
 0x595   :  { %v4813_v3 = vmax.f32 %v1336_v59, 0.0  ;;  %v4824_v9 = vadd.f32 %v4770_v60, %v5688_v0  ;;  %v4828_v31 = vadd.f32 %v4749_v47, %v5689_v4  ;;  %v4831_v56 = vadd.f32 %v1340_v14, %v5690_v25  ;;  %v5694_v0 = vld [vmem:[#allocation73_spill] sm:$0xff]  ;;  %v5695_v25 = vld [vmem:[#allocation55_spill] sm:$0xff]  ;;  %v5701_v23 = vld [vmem:[#allocation66_spill] sm:$0xff] }
 0x596   :  { %v1349_v54 = vadd.f32 %v4805_v12, %v5691_v62  ;;  %v1355_v59 = vadd.f32 %v4805_v12, %v5692_v63  ;;  %v1361_v48 = vadd.f32 %v4805_v12, %v5693_v50  ;;  %v1367_v61 = vadd.f32 %v4805_v12, %v5694_v0 }
 0x597   :  { %3561 = vmatprep.mubr.msk.f32.mxu1 %vm1234_vm14, %v4813_v3  ;;  %v1348_v4 = vadd.f32 %v4813_v3, %v5695_v25  ;;  %v1354_v43 = vadd.f32 %v4813_v3, %v5696_v44  ;;  %v1360_v62 = vadd.f32 %v4813_v3, %v5697_v37  ;;  %v1366_v63 = vadd.f32 %v4813_v3, %v5698_v21  ;;  %v5702_v25 = vld [vmem:[#allocation72_spill] sm:$0xff]  ;;  %v5704_v37 = vld [vmem:[#allocation77_spill] sm:$0xff] }
 0x598   :  { %3562 = vmatmul.mubr.msk.f32.gmra.mrb[12].mxu1 %vm1234_vm14, %v4805_v12  ;;  %v1372_v50 = vadd.f32 %v4813_v3, %v5699_v2  ;;  %v4857_v0 = vadd.f32 %v4805_v12, %v5700_v26  ;;  %v4861_v46 = vadd.f32 %v4770_v60, %v5701_v23  ;;  %v4865_v44 = vadd.f32 %v4813_v3, %v5702_v25  ;;  %v5705_v2 = vld [vmem:[#allocation53_spill] sm:$0xff]  ;;  %v5706_v26 = vld [vmem:[#allocation54_spill] sm:$0xff]  ;;  %v5707_v23 = vld [vmem:[#allocation63_spill] sm:$0xff] }
 0x599   :  { %v5703_v42 = vmov 0.0   ;;  %v4871_v21 = vadd.f32 %v4805_v12, %v5704_v37  ;;  %v4875_v41 = vadd.f32 %v4752_v27, %v5705_v2  ;;  %v4879_v40 = vadd.f32 %v4749_v47, %v5706_v26  ;;  %v5708_v25 = vld [vmem:[#allocation70_spill] sm:$0xff]  ;;  %v5710_v37 = vld [vmem:[#allocation79_spill] sm:$0xff]  ;;  %v5712_v26 = vld [vmem:[#allocation60_spill] sm:$0xff] }
 0x59a   :  { %3578 = vmatprep.mubr.msk.f32.mxu1 %vm3981_vm5, %v5703_v42  ;;  %v4882_v45 = vadd.f32 %v1340_v14, %v5707_v23  ;;  %v4886_v36 = vadd.f32 %v4770_v60, %v5708_v25  ;;  %v4890_v28 = vadd.f32 %v4813_v3, %v5709_v35  ;;  %v4894_v32 = vadd.f32 %v4805_v12, %v5710_v37  ;;  %v5711_v2 = vld [vmem:[#allocation59_spill] sm:$0xff]  ;;  %v5713_v35 = vld [vmem:[#allocation69_spill] sm:$0xff] }
 0x59b   :  { %v4898_v39 = vadd.f32 %v4752_v27, %v5711_v2  ;;  %v4902_v23 = vadd.f32 %v4749_v47, %v5712_v26  ;;  %v1392_v24 = vsel %vm1234_vm14, %v1344_v22, -inf  ;;  %v1393_v25 = vsel %vm1234_vm14, %v1345_v34, -inf }
 0x59c   :  { %v1395_v42 = vsel %vm1234_vm14, %v1346_v8, -inf  ;;  %v4908_v6 = vadd.f32 %v1340_v14, %v5713_v35  ;;  %v1394_v29 = vmax.f32 %v1392_v24, %v1393_v25  ;;  %v1397_v37 = vsel %vm1234_vm14, %v1347_v58, -inf }
 0x59d   :  { %v1399_v30 = vsel %vm1234_vm14, %v1348_v4, -inf  ;;  %v1401_v27 = vsel %vm1234_vm14, %v1349_v54, -inf  ;;  %v1409_v2 = vsel %vm1234_vm14, %v1350_v20, -inf  ;;  %v1410_v47 = vsel %vm1234_vm14, %v4764_v5, -inf }
 0x59e   :  { %v1412_v22 = vsel %vm1234_vm14, %v1352_v57, -inf  ;;  %v1396_v34 = vmax.f32 %v1394_v29, %v1395_v42  ;;  %v1411_v26 = vmax.f32 %v1409_v2, %v1410_v47  ;;  %v1414_v8 = vsel %vm1234_vm14, %v1353_v52, -inf }
 0x59f   :  { %v1416_v14 = vsel %vm1234_vm14, %v1354_v43, -inf  ;;  %v1418_v24 = vsel %vm1234_vm14, %v1355_v59, -inf  ;;  %v1426_v58 = vsel %vm1234_vm14, %v4778_v33, -inf  ;;  %v1427_v4 = vsel %vm1234_vm14, %v4768_v17, -inf }
 0x5a0   :  { %v1429_v20 = vsel %vm1234_vm14, %v1358_v19, -inf  ;;  %v1398_v25 = vmax.f32 %v1396_v34, %v1397_v37  ;;  %v1413_v5 = vmax.f32 %v1411_v26, %v1412_v22  ;;  %v1428_v54 = vmax.f32 %v1426_v58, %v1427_v4 }
 0x5a1   :  { %v1431_v29 = vsel %vm1234_vm14, %v1359_v7, -inf  ;;  %v1433_v42 = vsel %vm1234_vm14, %v1360_v62, -inf  ;;  %v1443_v43 = vsel %vm1234_vm14, %v4782_v10, -inf  ;;  %v1444_v52 = vsel %vm1234_vm14, %v4786_v49, -inf }
 0x5a2   :  { %v1446_v33 = vsel %vm1234_vm14, %v1364_v15, -inf  ;;  %v1400_v57 = vmax.f32 %v1398_v25, %v1399_v30  ;;  %v1415_v2 = vmax.f32 %v1413_v5, %v1414_v8  ;;  %v1430_v17 = vmax.f32 %v1428_v54, %v1429_v20 }
 0x5a3   :  { %v1445_v59 = vmax.f32 %v1443_v43, %v1444_v52  ;;  %v1435_v19 = vsel %vm1234_vm14, %v1361_v48, -inf  ;;  %v1448_v26 = vsel %vm1234_vm14, %v1365_v55, -inf  ;;  %v1450_v7 = vsel %vm1234_vm14, %v1366_v63, -inf }
 0x5a4   :  { %v1460_v37 = vsel %vm1234_vm14, %v4790_v51, -inf  ;;  %v1402_v62 = vmax.f32 %v1400_v57, %v1401_v27  ;;  %v1417_v10 = vmax.f32 %v1415_v2, %v1416_v14  ;;  %v1432_v47 = vmax.f32 %v1430_v17, %v1431_v29 }
 0x5a5   :  { %v1447_v22 = vmax.f32 %v1445_v59, %v1446_v33  ;;  %v1452_v49 = vsel %vm1234_vm14, %v1367_v61, -inf  ;;  %v1461_v30 = vsel %vm1234_vm14, %v4794_v16, -inf  ;;  %v1463_v15 = vsel %vm1234_vm14, %v4820_v53, -inf }
 0x5a6   :  { %v1465_v48 = vsel %vm1234_vm14, %v4824_v9, -inf  ;;  %v1403_v55 = vrot.slane %v1402_v62, 4  ;;  %v1419_v63 = vmax.f32 %v1417_v10, %v1418_v24  ;;  %v1434_v34 = vmax.f32 %v1432_v47, %v1433_v42 }
 0x5a7   :  { %v1449_v8 = vmax.f32 %v1447_v22, %v1448_v26  ;;  %v1462_v51 = vmax.f32 %v1460_v37, %v1461_v30  ;;  %v1467_v27 = vsel %vm1234_vm14, %v1372_v50, -inf  ;;  %v1477_v14 = vsel %vm1234_vm14, %v4803_v13, -inf }
 0x5a8   :  { %v1478_v61 = vsel %vm1234_vm14, %v4828_v31, -inf  ;;  %v1404_v16 = vmax.f32 %v1402_v62, %v1403_v55  ;;  %v1420_v58 = vrot.slane %v1419_v63, 4  ;;  %v1436_v4 = vmax.f32 %v1434_v34, %v1435_v19 }
 0x5a9   :  { %v1451_v53 = vmax.f32 %v1449_v8, %v1450_v7  ;;  %v1464_v20 = vmax.f32 %v1462_v51, %v1463_v15  ;;  %v1469_v9 = vsel %vm1234_vm14, %v4857_v0, -inf  ;;  %v1479_v24 = vmax.f32 %v1477_v14, %v1478_v61 }
 0x5aa   :  { %v1480_v25 = vsel %vm1234_vm14, %v4831_v56, -inf  ;;  %v1405_v5 = vrot.slane %v1404_v16, 2  ;;  %v1421_v50 = vmax.f32 %v1419_v63, %v1420_v58  ;;  %v1437_v54 = vrot.slane %v1436_v4, 4  ;;  %v5715_v63 = vld [vmem:[#allocation78_spill] sm:$0xff] }
 0x5ab   :  { %v1453_v29 = vmax.f32 %v1451_v53, %v1452_v49  ;;  %v1466_v13 = vmax.f32 %v1464_v20, %v1465_v48  ;;  %v1481_v42 = vmax.f32 %v1479_v24, %v1480_v25  ;;  %v1482_v31 = vsel %vm1234_vm14, %v4861_v46, -inf  ;;  %v5716_v24 = vld [vmem:[#allocation80_spill] sm:$0xff] }
 0x5ac   :  { %v1484_v43 = vsel %vm1234_vm14, %v4865_v44, -inf  ;;  %v1406_v52 = vmax.f32 %v1404_v16, %v1405_v5  ;;  %v1422_v33 = vrot.slane %v1421_v50, 2  ;;  %v1438_v57 = vmax.f32 %v1436_v4, %v1437_v54 }
 0x5ad   :  { %v1454_v0 = vrot.slane %v1453_v29, 4  ;;  %v1468_v2 = vmax.f32 %v1466_v13, %v1467_v27  ;;  %v1483_v17 = vmax.f32 %v1481_v42, %v1482_v31  ;;  %v1494_v56 = vsel %vm1234_vm14, %v4875_v41, -inf  ;;  %v5714_v41 = vld [vmem:[#allocation75_spill] sm:$0xff] }
 0x5ae   :  { %v1495_v59 = vsel %vm1234_vm14, %v4879_v40, -inf  ;;  %v1407_v19 = vrot.slane %v1406_v52, 1  ;;  %v1423_v26 = vmax.f32 %v1421_v50, %v1422_v33  ;;  %v1439_v7 = vrot.slane %v1438_v57, 2 }
 0x5af   :  { %v1455_v37 = vmax.f32 %v1453_v29, %v1454_v0  ;;  %v1470_v46 = vmax.f32 %v1468_v2, %v1469_v9  ;;  %v1485_v62 = vmax.f32 %v1483_v17, %v1484_v43  ;;  %v1496_v10 = vmax.f32 %v1494_v56, %v1495_v59 }
 0x5b0   :  { %v1497_v44 = vsel %vm1234_vm14, %v4882_v45, -inf  ;;  %v1424_v47 = vrot.slane %v1423_v26, 1  ;;  %v1440_v22 = vmax.f32 %v1438_v57, %v1439_v7  ;;  %v1486_v30 = vsel %vm1234_vm14, %v4871_v21, -inf }
 0x5b1   :  { %v1456_v49 = vrot.slane %v1455_v37, 2  ;;  %v1389_v15 = vadd.f32 %v4770_v60, %v5714_v41  ;;  %v1471_v40 = vrot.slane %v1470_v46, 4  ;;  %v1487_v48 = vmax.f32 %v1485_v62, %v1486_v30 }
 0x5b2   :  { %v1498_v55 = vmax.f32 %v1496_v10, %v1497_v44  ;;  %v1390_v34 = vadd.f32 %v4813_v3, %v5715_v63  ;;  %v1408_v8 = vmax.f32 %v1406_v52, %v1407_v19  ;;  %v1499_v51 = vsel %vm1234_vm14, %v4886_v36, -inf }
 0x5b3   :  { %v1501_v45 = vsel %vm1234_vm14, %v4890_v28, -inf  ;;  %v1425_v27 = vmax.f32 %v1423_v26, %v1424_v47  ;;  %v1472_v14 = vmax.f32 %v1470_v46, %v1471_v40  ;;  %v1488_v61 = vrot.slane %v1487_v48, 4 }
 0x5b4   :  { %v1500_v21 = vmax.f32 %v1498_v55, %v1499_v51  ;;  %v1441_v16 = vrot.slane %v1440_v22, 1  ;;  %v1457_v58 = vmax.f32 %v1455_v37, %v1456_v49  ;;  %v1511_v60 = vsel %vm1234_vm14, %v4898_v39, -inf }
 0x5b5   :  { %v1512_v4 = vsel %vm1234_vm14, %v4902_v23, -inf  ;;  %v1473_v3 = vrot.slane %v1472_v14, 2  ;;  %v1489_v53 = vmax.f32 %v1487_v48, %v1488_v61  ;;  %v1503_v36 = vsel %vm1234_vm14, %v4894_v32, -inf }
 0x5b6   :  { %v1502_v20 = vmax.f32 %v1500_v21, %v1501_v45  ;;  %v1513_v9 = vmax.f32 %v1511_v60, %v1512_v4  ;;  %v1514_v28 = vsel %vm1234_vm14, %v4908_v6, -inf  ;;  %v1391_v25 = vadd.f32 %v4805_v12, %v5716_v24 }
 0x5b7   :  { %v1490_v5 = vrot.slane %v1489_v53, 2  ;;  %v1442_v39 = vmax.f32 %v1440_v22, %v1441_v16  ;;  %v1474_v29 = vmax.f32 %v1472_v14, %v1473_v3  ;;  %v1516_v23 = vsel %vm1234_vm14, %v1389_v15, -inf  ;;  %v5719_v16 = vld [vmem:[#allocation82_spill] sm:$0xff]  ;;  %v3366_v3 = vld [vmem:[%s5717_s0] ss:$0 sm:$0xff] }
 0x5b8   :  { %v1504_v50 = vmax.f32 %v1502_v20, %v1503_v36  ;;  %v1515_v54 = vmax.f32 %v1513_v9, %v1514_v28  ;;  %v1518_v13 = vsel %vm1234_vm14, %v1390_v34, -inf  ;;  %v1458_v42 = vrot.slane %v1457_v58, 1 }
 0x5b9   :  { %v1544_v32 = vsel %vm900_vm6, %v1425_v27, %v1408_v8  ;;  %v1491_v52 = vmax.f32 %v1489_v53, %v1490_v5  ;;  %v1475_v57 = vrot.slane %v1474_v29, 1  ;;  %v1520_v12 = vsel %vm1234_vm14, %v1391_v25, -inf }
 0x5ba   :  { %v1505_v31 = vrot.slane %v1504_v50, 4  ;;  %v1517_v43 = vmax.f32 %v1515_v54, %v1516_v23  ;;  %v1545_v0 = vsel %vm902_vm7, %v1442_v39, %v1544_v32  ;;  %v1459_v2 = vmax.f32 %v1457_v58, %v1458_v42  ;;  %v5720_v58 = vld [vmem:[#allocation83_spill] sm:$0xff] }
 0x5bb   :  { %v1492_v59 = vrot.slane %v1491_v52, 1  ;;  %v1476_v37 = vmax.f32 %v1474_v29, %v1475_v57  ;;  %v5721_v60 = vmov 0.0  }
 0x5bc   :  { %v1506_v33 = vmax.f32 %v1504_v50, %v1505_v31  ;;  %v1519_v6 = vmax.f32 %v1517_v43, %v1518_v13  ;;  %v1546_v7 = vsel %vm904_vm8, %v1459_v2, %v1545_v0 }
 0x5bd   :  { %v1547_v10 = vsel %vm906_vm9, %v1476_v37, %v1546_v7  ;;  %v1493_v44 = vmax.f32 %v1491_v52, %v1492_v59 }
 0x5be   :  { %v1507_v17 = vrot.slane %v1506_v33, 2  ;;  %v1521_v56 = vmax.f32 %v1519_v6, %v1520_v12 }
 0x5bf   :  { %v1548_v49 = vsel %vm908_vm10, %v1493_v44, %v1547_v10 }
 0x5c0   :  { %v1508_v19 = vmax.f32 %v1506_v33, %v1507_v17  ;;  %v1522_v26 = vrot.slane %v1521_v56, 4 }
 0x5c2   :  { %v1523_v46 = vmax.f32 %v1521_v56, %v1522_v26  ;;  %v1509_v62 = vrot.slane %v1508_v19, 1 }
 0x5c4   :  { %v1524_v47 = vrot.slane %v1523_v46, 2  ;;  %v1510_v30 = vmax.f32 %v1508_v19, %v1509_v62 }
 0x5c6   :  { %v1525_v22 = vmax.f32 %v1523_v46, %v1524_v47  ;;  %v1549_v40 = vsel %vm910_vm11, %v1510_v30, %v1548_v49 }
 0x5c8   :  { %v1526_v15 = vrot.slane %v1525_v22, 1 }
 0x5ca   :  { %v1527_v48 = vmax.f32 %v1525_v22, %v1526_v15 }
 0x5cc   :  { %v1550_v55 = vsel %vm912_vm12, %v1527_v48, %v1549_v40 }
 0x5cd   :  { %3534 = vmatmul.mubr.msk.f32.vlgmr.msra.gmra.mrb[6].mxu0 %vm1234_vm14, %v1550_v55 }
 0x5ce   :  { %3538 = vmatprep.mubr.msk.f32.mxu0 %vm989_vm13, %v4649_v11  ;;  %v5718_v11 = vld [vmem:[#allocation81_spill] sm:$0xff] }
 0x662   :  { %v3557_v34 = vpop.f32.mrb[8].mxu1 }
 0x663   :  { %v1809_v8 = vpop.f32.mrb[9].mxu1 }
 0x667   :  { %v3560_v51 = vpop.f32.mrb[10].mxu1 }
 0x668   :  { %v1819_v45 = vpop.f32.mrb[11].mxu1 }
 0x66b   :  { %v3563_v27 = vpop.f32.mrb[12].mxu1 }
 0x66c   :  { %v1829_v14 = vpop.f32.mrb[13].mxu1 }
 0x6a0   :  { %v1623_v61 = vpop.f32.mrb[6].mxu0 }
 0x6a1   :  { %v3535_v21 = vpop.f32.mrb[7].mxu0  ;;  %3536 = vmatprep.subr.mxu0 %v1623_v61 }
 0x6a2   :  { %3537 = vmatpush3.msra.mxu0 %v1623_v61 }
 0x6a3   :  { %3539 = vmatmul.mubr.msk.f32.vlgmr.msra.gmra.mrb[8].mxu0 %vm989_vm13, %v4656_v1  ;;  %3687 = vmatprep.subr.bf16.mxu0 %v5680_v18 }
 0x6a4   :  { %3541 = vmatprep.mubr.msk.f32.mxu0 %vm989_vm13, %v4659_v38 }
 0x6a7   :  { %3542 = vmatmul.mubr.msk.f32.gmra.mrb[10].mxu0 %vm989_vm13, %v5718_v11  ;;  %v2147_v11 = vld [vmem:[%s5722_s5] sm:$0xff] }
 0x6a8   :  { %3544 = vmatprep.mubr.msk.f32.mxu0 %vm989_vm13, %v5719_v16  ;;  %v2148_v16 = vld [vmem:[%s5722_s5 + $0x8] sm:$0xff] }
 0x6ab   :  { %3545 = vmatmul.mubr.msk.f32.gmra.mrb[12].mxu0 %vm989_vm13, %v5720_v58  ;;  %v2248_v58 = vld [vmem:[%s5723_s9] sm:$0xff] }
 0x6ac   :  { %3595 = vmatprep.mubr.msk.f32.mxu0 %vm3981_vm5, %v5721_v60 }
 0x776   :  { %v3540_v4 = vpop.f32.mrb[8].mxu0 }
 0x777   :  { %v1815_v1 = vadd.f32 %v3557_v34, %v3540_v4  ;;  %v1693_v53 = vpop.f32.mrb[9].mxu0  ;;  %v3679_v4 = vpack.c.bf16 %v2148_v16, %v2147_v11 }
 0x778   :  { %v1810_v20 = vadd.f32 %v1809_v8, %v1693_v53  ;;  %v2150_v53 = vld [vmem:[%s5722_s5 + $0x18] sm:$0xff] }
 0x779   :  { %v1846_v9 = vadd.f32 %v3366_v3, %v1815_v1  ;;  %v2149_v1 = vld [vmem:[%s5722_s5 + $0x10] sm:$0xff]  ;;  %3680 = vmatpush3.bf16.msra.mxu1 %v3679_v4 }
 0x77a   :  { %v3543_v38 = vpop.f32.mrb[10].mxu0  ;;  %v1845_v36 = vadd.f32 %v3366_v3, %v1810_v20  ;;  %3681 = vmatprep.subr.bf16.mxu1 %v5680_v18 }
 0x77b   :  { %v1825_v28 = vadd.f32 %v3560_v51, %v3543_v38  ;;  %v1703_v25 = vpop.f32.mrb[11].mxu0  ;;  %v1857_v5 = vsel %vm1853_vm0, %v1846_v9, 0.0  ;;  %v2251_v38 = vld [vmem:[%s5723_s9 + $0x18] sm:$0xff] }
 0x77c   :  { %v1820_v50 = vadd.f32 %v1819_v45, %v1703_v25  ;;  %1858 = vadd.xlane.f32.xlu1 %v1857_v5  ;;  %v1854_v54 = vsel %vm1853_vm0, %v1845_v36, 0.0  ;;  %v2151_v25 = vld [vmem:[%s5722_s5 + $0x20] sm:$0xff]  ;;  %v2152_v5 = vld [vmem:[%s5722_s5 + $0x28] sm:$0xff] }
 0x77d   :  { %1855 = vadd.xlane.f32.xlu0 %v1854_v54  ;;  %v1848_v39 = vadd.f32 %v3366_v3, %v1825_v28  ;;  %v2253_v54 = vld [vmem:[%s5723_s9 + $0x28] sm:$0xff] }
 0x77e   :  { %v3546_v29 = vpop.f32.mrb[12].mxu0  ;;  %v1847_v23 = vadd.f32 %v3366_v3, %v1820_v50  ;;  %v2252_v50 = vld [vmem:[%s5723_s9 + $0x20] sm:$0xff] }
 0x77f   :  { %v1835_v13 = vadd.f32 %v3563_v27, %v3546_v29  ;;  %v1713_v42 = vpop.f32.mrb[13].mxu0  ;;  %v1863_v31 = vsel %vm1853_vm0, %v1848_v39, 0.0  ;;  %v3694_v29 = vpack.c.bf16 %v2253_v54, %v2252_v50  ;;  %v5728_v50 = vld [vmem:[#allocation35_spill] sm:$0xff] }
 0x780   :  { %v1830_v43 = vadd.f32 %v1829_v14, %v1713_v42  ;;  %1864 = vadd.xlane.f32.xlu1 %v1863_v31  ;;  %v1860_v32 = vsel %vm1853_vm0, %v1847_v23, 0.0 }
 0x781   :  { %1861 = vadd.xlane.f32.xlu0 %v1860_v32  ;;  %v1850_v52 = vadd.f32 %v3366_v3, %v1835_v13  ;;  %v2254_v13 = vld [vmem:[%s5723_s9 + $0x30] sm:$0xff] }
 0x782   :  { %v1849_v33 = vadd.f32 %v3366_v3, %v1830_v43  ;;  %v2249_v3 = vld [vmem:[%s5723_s9 + $0x8] sm:$0xff] }
 0x783   :  { %v1869_v6 = vsel %vm1853_vm0, %v1850_v52, 0.0  ;;  %v3688_v20 = vpack.c.bf16 %v2249_v3, %v2248_v58 }
 0x784   :  { %1870 = vadd.xlane.f32.xlu1 %v1869_v6  ;;  %v1866_v57 = vsel %vm1853_vm0, %v1849_v33, 0.0 }
 0x785   :  { %1867 = vadd.xlane.f32.xlu0 %v1866_v57  ;;  %3689 = vmatpush3.bf16.msra.mxu0 %v3688_v20 }
 0x786   :  { %3690 = vmatprep.subr.bf16.mxu0 %v5680_v18 }
 0x809   :  { %v1859_v12 = vpop.xlane.xlu1 %1858 }
 0x80a   :  { %v1874_v0 = vmul.f32 0.017857144, %v1859_v12  ;;  %v1856_v2 = vpop.xlane.xlu0 %1855 }
 0x80b   :  { %v1873_v17 = vmul.f32 0.017857144, %v1856_v2 }
 0x80c   :  { %v5016_v56 = vsub.f32 %v1846_v9, %v1874_v0  ;;  %v2250_v9 = vld [vmem:[%s5723_s9 + $0x10] sm:$0xff] }
 0x80d   :  { %v5018_v59 = vsub.f32 %v1845_v36, %v1873_v17  ;;  %v1865_v19 = vpop.xlane.xlu1 %1864  ;;  %v3682_v36 = vpack.c.bf16 %v2150_v53, %v2149_v1  ;;  %v3691_v28 = vpack.c.bf16 %v2251_v38, %v2250_v9 }
 0x80e   :  { %v1876_v26 = vmul.f32 0.017857144, %v1865_v19  ;;  %v1862_v7 = vpop.xlane.xlu0 %1861  ;;  %v1886_v37 = vmul.f32 %v5016_v56, %v5016_v56 }
 0x80f   :  { %v1875_v46 = vmul.f32 0.017857144, %v1862_v7  ;;  %v1885_v62 = vmul.f32 %v5018_v59, %v5018_v59  ;;  %3683 = vmatpush3.bf16.msra.mxu1 %v3682_v36  ;;  %3692 = vmatpush3.bf16.msra.mxu0 %v3691_v28  ;;  %v5726_v36 = vld [vmem:[#allocation33_spill] sm:$0xff] }
 0x810   :  { %v5024_v10 = vsub.f32 %v1848_v39, %v1876_v26  ;;  %v1894_v44 = vsel %vm1853_vm0, %v1886_v37, 0.0  ;;  %v3685_v39 = vpack.c.bf16 %v2152_v5, %v2151_v25  ;;  %3684 = vmatprep.subr.bf16.mxu1 %v5680_v18  ;;  %3693 = vmatprep.subr.bf16.mxu0 %v5680_v18  ;;  %v5727_v25 = vld [vmem:[#allocation40_spill] sm:$0xff] }
 0x811   :  { %v5027_v47 = vsub.f32 %v1847_v23, %v1875_v46  ;;  %1895 = vadd.xlane.f32.xlu1 %v1894_v44  ;;  %v1871_v22 = vpop.xlane.xlu1 %1870  ;;  %v1891_v49 = vsel %vm1853_vm0, %v1885_v62, 0.0  ;;  %v2153_v23 = vld [vmem:[%s5722_s5 + $0x30] sm:$0xff] }
 0x812   :  { %v1878_v30 = vmul.f32 0.017857144, %v1871_v22  ;;  %1892 = vadd.xlane.f32.xlu0 %v1891_v49  ;;  %v1868_v15 = vpop.xlane.xlu0 %1867  ;;  %v1888_v40 = vmul.f32 %v5024_v10, %v5024_v10  ;;  %v3367_v22 = vld [vmem:[%s5724_s13] ss:$0 sm:$0xff] }
 0x813   :  { %v1877_v48 = vmul.f32 0.017857144, %v1868_v15  ;;  %v1887_v55 = vmul.f32 %v5027_v47, %v5027_v47  ;;  %3686 = vmatpush3.bf16.msra.mxu1 %v3685_v39  ;;  %3695 = vmatpush3.bf16.msra.mxu0 %v3694_v29  ;;  %v3368_v15 = vld [vmem:[%s5725_s29] ss:$0 sm:$0xff]  ;;  %v5729_v29 = vld [vmem:[#allocation34_spill] sm:$0xff] }
 0x814   :  { %v5034_v34 = vsub.f32 %v1850_v52, %v1878_v30  ;;  %v1900_v8 = vsel %vm1853_vm0, %v1888_v40, 0.0  ;;  %3576 = vmatprep.subr.mxu1 %v5721_v60  ;;  %3593 = vmatprep.subr.mxu0 %v5721_v60 }
 0x815   :  { %v5037_v51 = vsub.f32 %v1849_v33, %v1877_v48  ;;  %1901 = vadd.xlane.f32.xlu1 %v1900_v8  ;;  %v1897_v45 = vsel %vm1853_vm0, %v1887_v55, 0.0 }
 0x816   :  { %1898 = vadd.xlane.f32.xlu0 %v1897_v45  ;;  %v1890_v27 = vmul.f32 %v5034_v34, %v5034_v34 }
 0x817   :  { %v1889_v14 = vmul.f32 %v5037_v51, %v5037_v51  ;;  %3577 = vmatpush3.msra.mxu1 %v2153_v23  ;;  %3594 = vmatpush3.msra.mxu0 %v2254_v13  ;;  %v5730_v13 = vld [vmem:[#allocation36_spill] sm:$0xff] }
 0x818   :  { %v1906_v61 = vsel %vm1853_vm0, %v1890_v27, 0.0  ;;  %3598 = vmatprep.subr.mxu1 %v5721_v60  ;;  %3620 = vmatprep.subr.mxu0 %v5721_v60 }
 0x819   :  { %1907 = vadd.xlane.f32.xlu1 %v1906_v61  ;;  %v1903_v21 = vsel %vm1853_vm0, %v1889_v14, 0.0 }
 0x81a   :  { %1904 = vadd.xlane.f32.xlu0 %v1903_v21 }
 0x89e   :  { %v1896_v42 = vpop.xlane.xlu1 %1895 }
 0x89f   :  { %v1910_v31 = vmul.f32 0.017857144, %v1896_v42  ;;  %v1893_v43 = vpop.xlane.xlu0 %1892  ;;  %v5731_v42 = vld [vmem:[#allocation37_spill] sm:$0xff] }
 0x8a0   :  { %v1909_v32 = vmul.f32 0.017857144, %v1893_v43  ;;  %v5732_v43 = vld [vmem:[#allocation46_spill] sm:$0xff] }
 0x8a1   :  { %v1916_v52 = vadd.f32 1e-05, %v1910_v31 }
 0x8a2   :  { %v1915_v33 = vadd.f32 1e-05, %v1909_v32  ;;  %v1902_v6 = vpop.xlane.xlu1 %1901 }
 0x8a3   :  { %3897 = vrsqrt.f32 %v1916_v52  ;;  %v1912_v57 = vmul.f32 0.017857144, %v1902_v6  ;;  %v1899_v12 = vpop.xlane.xlu0 %1898  ;;  %v5733_v52 = vld [vmem:[#allocation41_spill] sm:$0xff]  ;;  %v5734_v6 = vld [vmem:[#allocation42_spill] sm:$0xff] }
 0x8a4   :  { %3899 = vrsqrt.f32 %v1915_v33  ;;  %v1911_v0 = vmul.f32 0.017857144, %v1899_v12 }
 0x8a5   :  { %v1918_v2 = vadd.f32 1e-05, %v1912_v57 }
 0x8a6   :  { %v1917_v17 = vadd.f32 1e-05, %v1911_v0  ;;  %v1908_v19 = vpop.xlane.xlu1 %1907  ;;  %v5735_v0 = vld [vmem:[#allocation38_spill] sm:$0xff] }
 0x8a7   :  { %3901 = vrsqrt.f32 %v1918_v2  ;;  %v1914_v26 = vmul.f32 0.017857144, %v1908_v19  ;;  %v1905_v7 = vpop.xlane.xlu0 %1904 }
 0x8a8   :  { %3903 = vrsqrt.f32 %v1917_v17  ;;  %v1913_v37 = vmul.f32 0.017857144, %v1905_v7  ;;  %v5736_v17 = vld [vmem:[#allocation47_spill] sm:$0xff] }
 0x8a9   :  { %v1920_v46 = vadd.f32 1e-05, %v1914_v26  ;;  %v5737_v26 = vld [vmem:[#allocation51_spill] sm:$0xff] }
 0x8aa   :  { %v1919_v62 = vadd.f32 1e-05, %v1913_v37 }
 0x8ab   :  { %3905 = vrsqrt.f32 %v1920_v46  ;;  %v5738_v46 = vld [vmem:[#allocation39_spill] sm:$0xff] }
 0x8ac   :  { %3907 = vrsqrt.f32 %v1919_v62 }
 0x8ad   :  { %v3898_v44 = vpop.eup %3897 }
 0x8ae   :  { %v3900_v49 = vpop.eup %3899  ;;  %v1928_v30 = vmul.f32 %v3898_v44, %v5016_v56  ;;  %v5739_v44 = vld [vmem:[#allocation43_spill] sm:$0xff] }
 0x8af   :  { %v1927_v40 = vmul.f32 %v3900_v49, %v5018_v59  ;;  %v5740_v49 = vld [vmem:[#allocation48_spill] sm:$0xff] }
 0x8b0   :  { %v1940_v48 = vmul.f32 %v3367_v22, %v1928_v30 }
 0x8b1   :  { %v3902_v55 = vpop.eup %3901  ;;  %v1939_v8 = vmul.f32 %v3367_v22, %v1927_v40 }
 0x8b2   :  { %v3904_v45 = vpop.eup %3903  ;;  %v1952_v27 = vadd.f32 %v3368_v15, %v1940_v48  ;;  %v1930_v14 = vmul.f32 %v3902_v55, %v5024_v10  ;;  %v5742_v48 = vld [vmem:[#allocation44_spill] sm:$0xff] }
 0x8b3   :  { %v1951_v61 = vadd.f32 %v3368_v15, %v1939_v8  ;;  %v1929_v21 = vmul.f32 %v3904_v45, %v5027_v47  ;;  %v5743_v8 = vld [vmem:[#allocation45_spill] sm:$0xff] }
 0x8b4   :  { %v1958_v11 = vmax.f32 %v1952_v27, 0.0  ;;  %v1942_v16 = vmul.f32 %v3367_v22, %v1930_v14  ;;  %v5744_v27 = vld [vmem:[#allocation52_spill] sm:$0xff] }
 0x8b5   :  { %v3906_v58 = vpop.eup %3905  ;;  %v1957_v4 = vmax.f32 %v1951_v61, 0.0  ;;  %v1941_v3 = vmul.f32 %v3367_v22, %v1929_v21  ;;  %v5745_v61 = vld [vmem:[#allocation65_spill] sm:$0xff] }
 0x8b6   :  { %v3908_v1 = vpop.eup %3907  ;;  %v1954_v56 = vadd.f32 %v3368_v15, %v1942_v16  ;;  %v1932_v53 = vmul.f32 %v3906_v58, %v5034_v34  ;;  %v1964_v10 = vadd.f32 %v1958_v11, %v5726_v36  ;;  %v1970_v54 = vadd.f32 %v1958_v11, %v5728_v50  ;;  %v5746_v16 = vld [vmem:[#allocation64_spill] sm:$0xff]  ;;  %v5752_v50 = vld [vmem:[#allocation73_spill] sm:$0xff] }
 0x8b7   :  { %v1953_v59 = vadd.f32 %v3368_v15, %v1941_v3  ;;  %v1931_v20 = vmul.f32 %v3908_v1, %v5037_v51  ;;  %v1963_v5 = vadd.f32 %v1957_v4, %v5727_v25  ;;  %v1969_v23 = vadd.f32 %v1957_v4, %v5729_v29  ;;  %v5747_v3 = vld [vmem:[#allocation68_spill] sm:$0xff]  ;;  %v5753_v29 = vld [vmem:[#allocation67_spill] sm:$0xff] }
 0x8b8   :  { %v5076_v9 = vmax.f32 %v1954_v56, 0.0  ;;  %v1944_v38 = vmul.f32 %v3367_v22, %v1932_v53  ;;  %v1975_v34 = vadd.f32 %v1957_v4, %v5730_v13  ;;  %v1976_v31 = vadd.f32 %v1958_v11, %v5731_v42  ;;  %v5748_v56 = vld [vmem:[#allocation62_spill] sm:$0xff]  ;;  %v5754_v42 = vld [vmem:[#allocation71_spill] sm:$0xff] }
 0x8b9   :  { %v5079_v28 = vmax.f32 %v1953_v59, 0.0  ;;  %v1943_v47 = vmul.f32 %v3367_v22, %v1931_v20  ;;  %v5089_v33 = vadd.f32 %v1957_v4, %v5733_v52  ;;  %v5092_v57 = vadd.f32 %v1958_v11, %v5734_v6  ;;  %v5749_v59 = vld [vmem:[#allocation55_spill] sm:$0xff]  ;;  %v5756_v6 = vld [vmem:[#allocation49_spill] sm:$0xff] }
 0x8ba   :  { %v1956_v39 = vadd.f32 %v3368_v15, %v1944_v38  ;;  %v1966_v32 = vadd.f32 %v5076_v9, %v5732_v43  ;;  %v1972_v19 = vadd.f32 %v5076_v9, %v5736_v17  ;;  %v1978_v7 = vadd.f32 %v5076_v9, %v5737_v26  ;;  %v5750_v38 = vld [vmem:[#allocation56_spill] sm:$0xff]  ;;  %v5755_v43 = vld [vmem:[#allocation74_spill] sm:$0xff] }
 0x8bb   :  { %v1955_v51 = vadd.f32 %v3368_v15, %v1943_v47  ;;  %v1965_v2 = vadd.f32 %v5079_v28, %v5735_v0  ;;  %v1971_v62 = vadd.f32 %v5079_v28, %v5738_v46  ;;  %v1977_v22 = vadd.f32 %v5079_v28, %v5739_v44  ;;  %v5741_v15 = vld [vmem:[#allocation57_spill] sm:$0xff]  ;;  %v5757_v17 = vld [vmem:[#allocation50_spill] sm:$0xff] }
 0x8bc   :  { %v5094_v12 = vmax.f32 %v1956_v39, 0.0  ;;  %v1983_v30 = vadd.f32 %v5079_v28, %v5740_v49  ;;  %v1984_v40 = vadd.f32 %v5076_v9, %v5741_v15  ;;  %v1987_v55 = vadd.f32 %v1957_v4, %v5742_v48  ;;  %v5751_v47 = vld [vmem:[#allocation61_spill] sm:$0xff]  ;;  %v5758_v46 = vld [vmem:[#allocation58_spill] sm:$0xff]  ;;  %v5760_v48 = vld [vmem:[#allocation72_spill] sm:$0xff] }
 0x8bd   :  { %v5102_v37 = vmax.f32 %v1955_v51, 0.0  ;;  %v1988_v45 = vadd.f32 %v1958_v11, %v5743_v8  ;;  %v5116_v14 = vadd.f32 %v5079_v28, %v5744_v27  ;;  %v5126_v53 = vadd.f32 %v5076_v9, %v5748_v56  ;;  %v5759_v49 = vld [vmem:[#allocation66_spill] sm:$0xff]  ;;  %v5761_v27 = vld [vmem:[#allocation77_spill] sm:$0xff] }
 0x8be   :  { %v1968_v21 = vadd.f32 %v5094_v12, %v5745_v61  ;;  %v1974_v58 = vadd.f32 %v5094_v12, %v5746_v16  ;;  %v1980_v1 = vadd.f32 %v5094_v12, %v5747_v3  ;;  %v1986_v39 = vadd.f32 %v5094_v12, %v5752_v50  ;;  %v5762_v16 = vld [vmem:[#allocation53_spill] sm:$0xff]  ;;  %v5763_v56 = vld [vmem:[#allocation54_spill] sm:$0xff] }
 0x8bf   :  { %v1967_v20 = vadd.f32 %v5102_v37, %v5749_v59  ;;  %v1973_v36 = vadd.f32 %v5102_v37, %v5750_v38  ;;  %v1979_v25 = vadd.f32 %v5102_v37, %v5751_v47  ;;  %v1985_v13 = vadd.f32 %v5102_v37, %v5753_v29  ;;  %v5764_v38 = vld [vmem:[#allocation63_spill] sm:$0xff]  ;;  %v5765_v50 = vld [vmem:[#allocation70_spill] sm:$0xff] }
 0x8c0   :  { %v5140_v51 = vadd.f32 %v5102_v37, %v5754_v42  ;;  %v5144_v52 = vadd.f32 %v5094_v12, %v5755_v43  ;;  %v5147_v0 = vadd.f32 %v1957_v4, %v5756_v6  ;;  %v5150_v26 = vadd.f32 %v1958_v11, %v5757_v17  ;;  %v5766_v42 = vld [vmem:[#allocation76_spill] sm:$0xff]  ;;  %v5767_v6 = vld [vmem:[#allocation79_spill] sm:$0xff] }
 0x8c1   :  { %v5154_v44 = vadd.f32 %v5079_v28, %v5758_v46  ;;  %v5158_v15 = vadd.f32 %v5076_v9, %v5759_v49  ;;  %v5162_v8 = vadd.f32 %v5102_v37, %v5760_v48  ;;  %v5166_v61 = vadd.f32 %v5094_v12, %v5761_v27  ;;  %v5768_v46 = vld [vmem:[#allocation59_spill] sm:$0xff]  ;;  %v5769_v48 = vld [vmem:[#allocation60_spill] sm:$0xff] }
 0x8c2   :  { %v5169_v3 = vadd.f32 %v1957_v4, %v5762_v16  ;;  %v5172_v59 = vadd.f32 %v1958_v11, %v5763_v56  ;;  %v5176_v47 = vadd.f32 %v5079_v28, %v5764_v38  ;;  %v5180_v29 = vadd.f32 %v5076_v9, %v5765_v50 }
 0x8c3   :  { %v5184_v43 = vadd.f32 %v5102_v37, %v5766_v42  ;;  %v5188_v17 = vadd.f32 %v5094_v12, %v5767_v6  ;;  %v5191_v49 = vadd.f32 %v1957_v4, %v5768_v46  ;;  %v5194_v27 = vadd.f32 %v1958_v11, %v5769_v48 }
 0x8c4   :  { %v2011_v16 = vsel %vm1853_vm0, %v1963_v5, -inf  ;;  %v2012_v56 = vsel %vm1853_vm0, %v1964_v10, -inf  ;;  %v2014_v38 = vsel %vm1853_vm0, %v1965_v2, -inf  ;;  %v2016_v42 = vsel %vm1853_vm0, %v1966_v32, -inf }
 0x8c5   :  { %v2013_v50 = vmax.f32 %v2011_v16, %v2012_v56  ;;  %v2018_v18 = vsel %vm1853_vm0, %v1967_v20, -inf  ;;  %v2028_v6 = vsel %vm1853_vm0, %v1969_v23, -inf  ;;  %v2020_v60 = vsel %vm1853_vm0, %v1968_v21, -inf }
 0x8c6   :  { %v2029_v4 = vsel %vm1853_vm0, %v1970_v54, -inf  ;;  %v2031_v11 = vsel %vm1853_vm0, %v1971_v62, -inf  ;;  %v2033_v46 = vsel %vm1853_vm0, %v1972_v19, -inf  ;;  %v2035_v10 = vsel %vm1853_vm0, %v1973_v36, -inf }
 0x8c7   :  { %v2015_v5 = vmax.f32 %v2013_v50, %v2014_v38  ;;  %v2030_v48 = vmax.f32 %v2028_v6, %v2029_v4  ;;  %v2045_v2 = vsel %vm1853_vm0, %v1975_v34, -inf  ;;  %v2037_v32 = vsel %vm1853_vm0, %v1974_v58, -inf }
 0x8c8   :  { %v2046_v20 = vsel %vm1853_vm0, %v1976_v31, -inf  ;;  %v2048_v23 = vsel %vm1853_vm0, %v1977_v22, -inf  ;;  %v2050_v21 = vsel %vm1853_vm0, %v1978_v7, -inf  ;;  %v2052_v62 = vsel %vm1853_vm0, %v1979_v25, -inf }
 0x8c9   :  { %v2017_v16 = vmax.f32 %v2015_v5, %v2016_v42  ;;  %v2032_v54 = vmax.f32 %v2030_v48, %v2031_v11  ;;  %v2047_v56 = vmax.f32 %v2045_v2, %v2046_v20  ;;  %v2054_v19 = vsel %vm1853_vm0, %v1980_v1, -inf }
 0x8ca   :  { %v2062_v36 = vsel %vm1853_vm0, %v5089_v33, -inf  ;;  %v2063_v34 = vsel %vm1853_vm0, %v5092_v57, -inf  ;;  %v2065_v58 = vsel %vm1853_vm0, %v1983_v30, -inf  ;;  %v2067_v7 = vsel %vm1853_vm0, %v1984_v40, -inf }
 0x8cb   :  { %v2019_v31 = vmax.f32 %v2017_v16, %v2018_v18  ;;  %v2034_v38 = vmax.f32 %v2032_v54, %v2033_v46  ;;  %v2049_v22 = vmax.f32 %v2047_v56, %v2048_v23  ;;  %v2064_v50 = vmax.f32 %v2062_v36, %v2063_v34 }
 0x8cc   :  { %v2069_v42 = vsel %vm1853_vm0, %v1985_v13, -inf  ;;  %v2079_v25 = vsel %vm1853_vm0, %v1987_v55, -inf  ;;  %v2080_v1 = vsel %vm1853_vm0, %v1988_v45, -inf  ;;  %v2071_v57 = vsel %vm1853_vm0, %v1986_v39, -inf }
 0x8cd   :  { %v2021_v6 = vmax.f32 %v2019_v31, %v2020_v60  ;;  %v2036_v4 = vmax.f32 %v2034_v38, %v2035_v10  ;;  %v2051_v33 = vmax.f32 %v2049_v22, %v2050_v21  ;;  %v2066_v11 = vmax.f32 %v2064_v50, %v2065_v58 }
 0x8ce   :  { %v2081_v5 = vmax.f32 %v2079_v25, %v2080_v1  ;;  %v2082_v18 = vsel %vm1853_vm0, %v5116_v14, -inf  ;;  %v2084_v30 = vsel %vm1853_vm0, %v5126_v53, -inf  ;;  %v2086_v60 = vsel %vm1853_vm0, %v5140_v51, -inf }
 0x8cf   :  { %v2022_v40 = vrot.slane %v2021_v6, 4  ;;  %v2038_v46 = vmax.f32 %v2036_v4, %v2037_v32  ;;  %v2053_v13 = vmax.f32 %v2051_v33, %v2052_v62  ;;  %v2068_v48 = vmax.f32 %v2066_v11, %v2067_v7 }
 0x8d0   :  { %v2083_v55 = vmax.f32 %v2081_v5, %v2082_v18  ;;  %v2096_v45 = vsel %vm1853_vm0, %v5147_v0, -inf  ;;  %v2097_v39 = vsel %vm1853_vm0, %v5150_v26, -inf  ;;  %v2088_v53 = vsel %vm1853_vm0, %v5144_v52, -inf }
 0x8d1   :  { %v2023_v10 = vmax.f32 %v2021_v6, %v2022_v40  ;;  %v2039_v2 = vrot.slane %v2038_v46, 4  ;;  %v2055_v14 = vmax.f32 %v2053_v13, %v2054_v19  ;;  %v2070_v20 = vmax.f32 %v2068_v48, %v2069_v42 }
 0x8d2   :  { %v2085_v23 = vmax.f32 %v2083_v55, %v2084_v30  ;;  %v2098_v32 = vmax.f32 %v2096_v45, %v2097_v39  ;;  %v2099_v21 = vsel %vm1853_vm0, %v5154_v44, -inf  ;;  %v2101_v26 = vsel %vm1853_vm0, %v5158_v15, -inf }
 0x8d3   :  { %v2024_v16 = vrot.slane %v2023_v10, 2  ;;  %v2040_v51 = vmax.f32 %v2038_v46, %v2039_v2  ;;  %v2056_v54 = vrot.slane %v2055_v14, 4  ;;  %v2072_v56 = vmax.f32 %v2070_v20, %v2071_v57 }
 0x8d4   :  { %v2087_v0 = vmax.f32 %v2085_v23, %v2086_v60  ;;  %v2100_v62 = vmax.f32 %v2098_v32, %v2099_v21  ;;  %v2103_v19 = vsel %vm1853_vm0, %v5162_v8, -inf  ;;  %v2113_v44 = vsel %vm1853_vm0, %v5169_v3, -inf }
 0x8d5   :  { %v2025_v36 = vmax.f32 %v2023_v10, %v2024_v16  ;;  %v2041_v34 = vrot.slane %v2040_v51, 2  ;;  %v2057_v58 = vmax.f32 %v2055_v14, %v2056_v54  ;;  %v2073_v52 = vrot.slane %v2072_v56, 4 }
 0x8d6   :  { %v2089_v31 = vmax.f32 %v2087_v0, %v2088_v53  ;;  %v2102_v38 = vmax.f32 %v2100_v62, %v2101_v26  ;;  %v2114_v22 = vsel %vm1853_vm0, %v5172_v59, -inf  ;;  %v2116_v8 = vsel %vm1853_vm0, %v5176_v47, -inf }
 0x8d7   :  { %v2026_v50 = vrot.slane %v2025_v36, 1  ;;  %v2042_v7 = vmax.f32 %v2040_v51, %v2041_v34  ;;  %v2058_v42 = vrot.slane %v2057_v58, 2  ;;  %v2074_v25 = vmax.f32 %v2072_v56, %v2073_v52 }
 0x8d8   :  { %v2090_v15 = vrot.slane %v2089_v31, 4  ;;  %v2104_v1 = vmax.f32 %v2102_v38, %v2103_v19  ;;  %v2115_v6 = vmax.f32 %v2113_v44, %v2114_v22  ;;  %v2007_v4 = vadd.f32 %v5079_v28, %v5713_v35 }
 0x8d9   :  { %v2043_v33 = vrot.slane %v2042_v7, 1  ;;  %v2059_v11 = vmax.f32 %v2057_v58, %v2058_v42  ;;  %v2105_v3 = vsel %vm1853_vm0, %v5166_v61, -inf  ;;  %v2075_v57 = vrot.slane %v2074_v25, 2 }
 0x8da   :  { %v2091_v59 = vmax.f32 %v2089_v31, %v2090_v15  ;;  %v2106_v5 = vmax.f32 %v2104_v1, %v2105_v3  ;;  %v2117_v18 = vmax.f32 %v2115_v6, %v2116_v8  ;;  %v2008_v30 = vadd.f32 %v5076_v9, %v5714_v41  ;;  %v2407_v8 = vld [vmem:[%s5770_s3] sm:$0xff] }
 0x8db   :  { %v2009_v40 = vadd.f32 %v5102_v37, %v5715_v63  ;;  %v2118_v47 = vsel %vm1853_vm0, %v5180_v29, -inf  ;;  %v2120_v35 = vsel %vm1853_vm0, %v5184_v43, -inf  ;;  %v2027_v28 = vmax.f32 %v2025_v36, %v2026_v50  ;;  %v2332_v3 = vld [vmem:[%s5771_s8] sm:$0x3] }
 0x8dc   :  { %v2044_v46 = vmax.f32 %v2042_v7, %v2043_v33  ;;  %v2107_v13 = vrot.slane %v2106_v5, 4  ;;  %v2119_v61 = vmax.f32 %v2117_v18, %v2118_v47  ;;  %v2060_v48 = vrot.slane %v2059_v11, 1  ;;  %v2410_v18 = vld [vmem:[%s5770_s3 + $0x18] sm:$0xff]  ;;  %v2412_v47 = vld [vmem:[%s5770_s3 + $0x28] sm:$0xff] }
 0x8dd   :  { %v2092_v55 = vrot.slane %v2091_v59, 2  ;;  %v2130_v60 = vsel %vm1853_vm0, %v5191_v49, -inf  ;;  %v2131_v41 = vsel %vm1853_vm0, %v5194_v27, -inf  ;;  %v2076_v9 = vmax.f32 %v2074_v25, %v2075_v57 }
 0x8de   :  { %v2108_v63 = vmax.f32 %v2106_v5, %v2107_v13  ;;  %v2121_v37 = vmax.f32 %v2119_v61, %v2120_v35  ;;  %v2132_v45 = vmax.f32 %v2130_v60, %v2131_v41  ;;  %v2122_v29 = vsel %vm1853_vm0, %v5188_v17, -inf  ;;  %v2409_v5 = vld [vmem:[%s5770_s3 + $0x10] sm:$0xff] }
 0x8df   :  { %v2133_v43 = vsel %vm1853_vm0, %v2007_v4, -inf  ;;  %v2010_v39 = vadd.f32 %v5094_v12, %v5716_v24  ;;  %v2061_v20 = vmax.f32 %v2059_v11, %v2060_v48  ;;  %v2093_v49 = vmax.f32 %v2091_v59, %v2092_v55  ;;  %v2408_v4 = vld [vmem:[%s5770_s3 + $0x8] sm:$0xff] }
 0x8e0   :  { %v2109_v10 = vrot.slane %v2108_v63, 2  ;;  %v2123_v2 = vmax.f32 %v2121_v37, %v2122_v29  ;;  %v2134_v14 = vmax.f32 %v2132_v45, %v2133_v43  ;;  %v2135_v23 = vsel %vm1853_vm0, %v2008_v30, -inf  ;;  %v3371_v37 = vld [vmem:[%s5776_s24] ss:$0 sm:$0xff] }
 0x8e1   :  { %v2137_v27 = vsel %vm1853_vm0, %v2009_v40, -inf  ;;  %v2077_v53 = vrot.slane %v2076_v9, 1  ;;  %v2169_v16 = vsel %vm900_vm6, %v2044_v46, %v2027_v28  ;;  %v2094_v56 = vrot.slane %v2093_v49, 1  ;;  %v2411_v40 = vld [vmem:[%s5770_s3 + $0x20] sm:$0xff]  ;;  %v2413_v28 = vld [vmem:[%s5770_s3 + $0x30] sm:$0xff] }
 0x8e2   :  { %v2124_v32 = vrot.slane %v2123_v2, 4  ;;  %v2136_v21 = vmax.f32 %v2134_v14, %v2135_v23  ;;  %v2110_v17 = vmax.f32 %v2108_v63, %v2109_v10  ;;  %v2139_v24 = vsel %vm1853_vm0, %v2010_v39, -inf  ;;  %v3369_v46 = vld [vmem:[%s5774_s14] ss:$0 sm:$0xff] }
 0x8e3   :  { %v2170_v12 = vsel %vm902_vm7, %v2061_v20, %v2169_v16  ;;  %v2078_v0 = vmax.f32 %v2076_v9, %v2077_v53  ;;  %v2095_v52 = vmax.f32 %v2093_v49, %v2094_v56  ;;  %v5772_v11 = vmov 0.0   ;;  %v3374_v63 = vld [vmem:[%s5775_s19] ss:$0 sm:$0xff]  ;;  %vm3707_vm7 = vmpackc.low %vm157_vm4, %vm157_vm4  ;;  %v5784_v16 = vld [vmem:[#allocation30_spill] sm:$0xff] }
 0x8e4   :  { %v2125_v51 = vmax.f32 %v2123_v2, %v2124_v32  ;;  %v2138_v54 = vmax.f32 %v2136_v21, %v2137_v27  ;;  %v2111_v19 = vrot.slane %v2110_v17, 1  ;;  %v3697_v57 = vpack.c.bf16 %v2408_v4, %v2407_v8  ;;  %v2572_v2 = vld [vmem:[%s5777_s30] sm:$0x3]  ;;  %v5781_v32 = vld [vmem:[#allocation25_spill] sm:$0xff] }
 0x8e5   :  { %v2171_v58 = vsel %vm904_vm8, %v2078_v0, %v2170_v12  ;;  %v5773_v59 = vmov 0.0|0.0   ;;  %v3700_v30 = vpack.c.bf16 %v2410_v18, %v2409_v5  ;;  %v3703_v35 = vpack.c.bf16 %v2412_v47, %v2411_v40  ;;  %v5780_v53 = vld [vmem:[#allocation27_spill] sm:$0xff]  ;;  %v2740_v40 = vld [vmem:[%s5790_s20 + $0x30] sm:$0xff]  ;;  %v2743_v47 = vld [vmem:[%s5790_s20 + $0x48] sm:$0xff] }
 0x8e6   :  { %v2126_v62 = vrot.slane %v2125_v51, 2  ;;  %v2140_v26 = vmax.f32 %v2138_v54, %v2139_v24  ;;  %v2172_v44 = vsel %vm906_vm9, %v2095_v52, %v2171_v58  ;;  %v2112_v22 = vmax.f32 %v2110_v17, %v2111_v19  ;;  %v5785_v17 = vld [vmem:[#allocation28_spill] sm:$0xff]  ;;  %v5788_v56 = vld [vmem:[#allocation31_spill] sm:$0xff]  ;;  %v2756_v27 = vld [vmem:[%s5790_s20 + $0xb0] sm:$0xff] }
 0x8e7   :  { %vm2574_vm6 = vcmask 58368   ;;  %v5782_v21 = vpack.c.bf16 %v5780_v53, %v5781_v32  ;;  %v5787_v54 = vld [vmem:[#allocation32_spill] sm:$0xff]  ;;  %v2659_v12 = vld [vmem:[%s5778_s6] sm:$0x3]  ;;  %vm2660_vm4 = vcmask 392192   ;;  %v2761_v32 = vld [vmem:[%s5790_s20 + $0xd8] sm:$0xff] }
 0x8e8   :  { %v2127_v36 = vmax.f32 %v2125_v51, %v2126_v62  ;;  %v2141_v34 = vrot.slane %v2140_v26, 4  ;;  %v2173_v42 = vsel %vm908_vm10, %v2112_v22, %v2172_v44  ;;  %v5786_v51 = vpack.c.bf16 %v5784_v16, %v5785_v17  ;;  %v2765_v58 = vld [vmem:[%s5783_s12 + $0x18] sm:$0x3f]  ;;  %v2734_v4 = vld [vmem:[%s5790_s20] sm:$0xff]  ;;  %v2759_v53 = vld [vmem:[%s5790_s20 + $0xc8] sm:$0xff] }
 0x8e9   :  { %v5789_v24 = vpack.c.bf16 %v5787_v54, %v5788_v56  ;;  %v3747_v16 = vpack.c.bf16 %v2761_v32, %v2759_v53  ;;  %v2758_v17 = vld [vmem:[%s5790_s20 + $0xc0] sm:$0xff]  ;;  %v3010_v53 = vld [vmem:[%s5794_s7 + $0xb8] sm:$0xff]  ;;  %vm3037_vm9 = vcmask 179200  }
 0x8ea   :  { %v2142_v31 = vmax.f32 %v2140_v26, %v2141_v34  ;;  %v2128_v38 = vrot.slane %v2127_v36, 1  ;;  %v2763_v34 = vld [vmem:[%s5783_s12 + $0x8] sm:$0xff] }
 0x8eb   :  { %v3717_v52 = vpack.c.bf16 %v2765_v58, %v2763_v34 }
 0x8ec   :  { %v2143_v50 = vrot.slane %v2142_v31, 2  ;;  %v2129_v25 = vmax.f32 %v2127_v36, %v2128_v38 }
 0x8ee   :  { %v2144_v7 = vmax.f32 %v2142_v31, %v2143_v50  ;;  %v2174_v1 = vsel %vm910_vm11, %v2129_v25, %v2173_v42  ;;  %v2762_v50 = vld [vmem:[%s5783_s12] sm:$0xff]  ;;  %v2735_v42 = vld [vmem:[%s5790_s20 + $0x8] sm:$0xff]  ;;  %v2737_v25 = vld [vmem:[%s5790_s20 + $0x18] sm:$0xff]  ;;  %vm3270_vm11 = vcmask 9216  }
 0x8ef   :  { %v3723_v8 = vpack.c.bf16 %v2737_v25, %v2735_v42  ;;  %v2990_v42 = vld [vmem:[%s5794_s7 + $0x18] sm:$0xff]  ;;  %v2987_v25 = vld [vmem:[%s5794_s7] sm:$0xff] }
 0x8f0   :  { %v2145_v15 = vrot.slane %v2144_v7, 1 }
 0x8f2   :  { %v2146_v6 = vmax.f32 %v2144_v7, %v2145_v15  ;;  %v2764_v7 = vld [vmem:[%s5783_s12 + $0x10] sm:$0x3f] }
 0x8f4   :  { %v2175_v33 = vsel %vm912_vm12, %v2146_v6, %v2174_v1  ;;  %v3720_v1 = vpack.c.bf16 %v2764_v7, %v2762_v50  ;;  %v2988_v7 = vld [vmem:[%s5794_s7 + $0x8] sm:$0xff] }
 0x8f5   :  { %3579 = vmatmul.mubr.msk.f32.vlgmr.msra.gmra.mrb[14].mxu1 %vm1853_vm0, %v2175_v33  ;;  %3596 = vmatmul.mubr.msk.f32.vlgmr.msra.gmra.mrb[14].mxu0 %vm1853_vm0, %v2175_v33 }
 0x8f6   :  { %3599 = vmatpush3.msra.mxu1 %v2175_v33  ;;  %3600 = vmatprep.mubr.msk.f32.mxu1 %vm3981_vm5, %v5772_v11  ;;  %v2736_v33 = vld [vmem:[%s5790_s20 + $0x10] sm:$0xff] }
 0x8f7   :  { %3696 = vmatprep.subr.bf16.mxu1 %v5773_v59  ;;  %3622 = vmatprep.mubr.msk.f32.mxu0 %vm3981_vm5, %v5772_v11  ;;  %v3725_v5 = vpack.c.bf16 %v2736_v33, %v2734_v4 }
 0x8f9   :  { %3601 = vmatmul.mubr.msk.f32.vlgmr.msra.gmra.mrb[16].mxu1 %vm989_vm13, %v2332_v3  ;;  %v2739_v3 = vld [vmem:[%s5790_s20 + $0x28] sm:$0xff] }
 0x8fa   :  { %3698 = vmatpush3.bf16.msra.mxu1 %v3697_v57  ;;  %3617 = vmatprep.mubr.msk.f32.mxu1 %vm3981_vm5, %v5772_v11  ;;  %v2741_v57 = vld [vmem:[%s5790_s20 + $0x38] sm:$0xff] }
 0x8fb   :  { %3699 = vmatprep.subr.bf16.mxu1 %v5773_v59  ;;  %v3727_v18 = vpack.c.bf16 %v2741_v57, %v2739_v3  ;;  %v2991_v3 = vld [vmem:[%s5794_s7 + $0x20] sm:$0xff]  ;;  %v2993_v57 = vld [vmem:[%s5794_s7 + $0x30] sm:$0xff] }
 0x8fe   :  { %3701 = vmatpush3.bf16.msra.mxu1 %v3700_v30  ;;  %v2738_v30 = vld [vmem:[%s5790_s20 + $0x20] sm:$0xff] }
 0x8ff   :  { %3702 = vmatprep.subr.bf16.mxu1 %v5773_v59 }
 0x902   :  { %3704 = vmatpush3.bf16.msra.mxu1 %v3703_v35  ;;  %v2745_v35 = vld [vmem:[%s5790_s20 + $0x58] sm:$0xff] }
 0x903   :  { %3615 = vmatprep.subr.mxu1 %v5772_v11 }
 0x906   :  { %3616 = vmatpush3.msra.mxu1 %v2413_v28  ;;  %v3729_v28 = vpack.c.bf16 %v2740_v40, %v2738_v30  ;;  %v3757_v30 = vpack.c.bf16 %v2993_v57, %v2991_v3  ;;  %v2935_v3 = vld [vmem:[%s5796_s11] sm:$0x3] }
 0x907   :  { %3705 = vmatprep.subr.bf16.mxu1 %v5773_v59 }
 0x9c8   :  { %v2244_v13 = vpop.f32.mrb[14].mxu1  ;;  %v2328_v61 = vpop.f32.mrb[14].mxu0 }
 0x9c9   :  { %v2245_v48 = vadd.f32 %v3369_v46, %v2244_v13  ;;  %v3580_v55 = vpop.f32.mrb[15].mxu1  ;;  %v3597_v60 = vpop.f32.mrb[15].mxu0  ;;  %v2329_v39 = vadd.f32 %v3371_v37, %v2328_v61  ;;  %v3731_v46 = vpack.c.bf16 %v2745_v35, %v2743_v47  ;;  %v2742_v13 = vld [vmem:[%s5790_s20 + $0x40] sm:$0xff]  ;;  %v2744_v61 = vld [vmem:[%s5790_s20 + $0x50] sm:$0xff]  ;;  %v2751_v37 = vld [vmem:[%s5790_s20 + $0x88] sm:$0xff] }
 0x9ca   :  { %v2749_v55 = vld [vmem:[%s5790_s20 + $0x78] sm:$0xff]  ;;  %v3733_v60 = vpack.c.bf16 %v2744_v61, %v2742_v13  ;;  %v2995_v47 = vld [vmem:[%s5794_s7 + $0x40] sm:$0xff]  ;;  %v2997_v35 = vld [vmem:[%s5794_s7 + $0x50] sm:$0xff] }
 0x9cb   :  { %3621 = vmatpush3.xpose.msk.msra.mxu0 %vm2494_vm1, %v2245_v48  ;;  %v2747_v48 = vld [vmem:[%s5790_s20 + $0x68] sm:$0xff]  ;;  %v3761_v13 = vpack.c.bf16 %v2997_v35, %v2995_v47 }
 0x9cc   :  { %v2403_v41 = vpop.f32.mrb[16].mxu1  ;;  %3625 = vmatprep.subr.mxu0 %v5772_v11 }
 0x9cd   :  { %3618 = vmatmul.mubr.msk.f32.vlgmr.msra.gmra.mrb[18].mxu1 %vm1853_vm0, %v2403_v41  ;;  %v3602_v9 = vpop.f32.mrb[17].mxu1  ;;  %v3735_v41 = vpack.c.bf16 %v2749_v55, %v2747_v48  ;;  %v2999_v48 = vld [vmem:[%s5794_s7 + $0x60] sm:$0xff]  ;;  %v3001_v55 = vld [vmem:[%s5794_s7 + $0x70] sm:$0xff] }
 0x9ce   :  { %3642 = vmatprep.mubr.msk.f32.mxu1 %vm3981_vm5, %v5772_v11  ;;  %3708 = vmatpush3.bf16.msk.msra.mxu1 %vm3707_vm7, %v5782_v21  ;;  %v2746_v9 = vld [vmem:[%s5790_s20 + $0x60] sm:$0xff] }
 0x9cf   :  { %3709 = vmatprep.subr.bf16.mxu1 %v5773_v59 }
 0x9d2   :  { %3712 = vmatpush3.bf16.msk.msra.mxu1 %vm3707_vm7, %v5786_v51  ;;  %v2760_v51 = vld [vmem:[%s5790_s20 + $0xd0] sm:$0xff] }
 0x9d3   :  { %3713 = vmatprep.subr.bf16.mxu1 %v5773_v59  ;;  %v3749_v54 = vpack.c.bf16 %v2760_v51, %v2758_v17  ;;  %v3009_v17 = vld [vmem:[%s5794_s7 + $0xb0] sm:$0xff]  ;;  %v3012_v51 = vld [vmem:[%s5794_s7 + $0xc8] sm:$0xff] }
 0x9d6   :  { %3716 = vmatpush3.bf16.msk.msra.mxu1 %vm3707_vm7, %v5789_v24 }
 0x9d9   :  { %3643 = vmatmul.mubr.msk.f32.vlgmr.msra.gmra.mrb[20].mxu1 %vm2660_vm4, %v2659_v12  ;;  %v5793_v12 = vlaneseq }
 0xaa0   :  { %v2490_v45 = vpop.f32.mrb[18].mxu1 }
 0xaa1   :  { %v2491_v29 = vadd.f32 %v3374_v63, %v2490_v45  ;;  %v3619_v43 = vpop.f32.mrb[19].mxu1  ;;  %v2748_v63 = vld [vmem:[%s5790_s20 + $0x70] sm:$0xff]  ;;  %v2753_v45 = vld [vmem:[%s5790_s20 + $0x98] sm:$0xff] }
 0xaa2   :  { %v3739_v43 = vpack.c.bf16 %v2753_v45, %v2751_v37 }
 0xaa3   :  { %3623 = vmatmul.mubr.msk.f32.vlgmr.msra.gmra.mrb[16].mxu0 %vm2494_vm1, %v2491_v29  ;;  %v3737_v29 = vpack.c.bf16 %v2748_v63, %v2746_v9 }
 0xaa4   :  { %3626 = vmatpush3.msra.mxu0 %v2329_v39  ;;  %3627 = vmatprep.mubr.msk.f32.mxu0 %vm3981_vm5, %v5772_v11  ;;  %v2750_v39 = vld [vmem:[%s5790_s20 + $0x80] sm:$0xff]  ;;  %vm5797_vm5 = vcmask 1045504  }
 0xaa5   :  { %3719 = vmatprep.subr.msk.bf16.mxu0 %vm4186_vm2, %v3717_v52  ;;  %vm5798_vm8 = vmmov %vm5797_vm5 }
 0xaa6   :  { %vm5801_vm10 = vmmov %vm5797_vm5 }
 0xaac   :  { %v2730_v38 = vpop.f32.mrb[20].mxu1 }
 0xaad   :  { %v3644_v44 = vpop.f32.mrb[21].mxu1 }
 0xb76   :  { %v2567_v10 = vpop.f32.mrb[16].mxu0 }
 0xb77   :  { %v2571_v14 = vmul.f32 0.09449112, %v2567_v10  ;;  %v3624_v20 = vpop.f32.mrb[17].mxu0  ;;  %v2752_v10 = vld [vmem:[%s5790_s20 + $0x90] sm:$0xff] }
 0xb78   :  { %v3741_v20 = vpack.c.bf16 %v2752_v10, %v2750_v39 }
 0xb79   :  { %v2573_v49 = vadd.f32 %v2572_v2, %v2571_v14  ;;  %v2755_v2 = vld [vmem:[%s5790_s20 + $0xa8] sm:$0xff]  ;;  %v2757_v14 = vld [vmem:[%s5790_s20 + $0xb8] sm:$0xff] }
 0xb7b   :  { %v2575_v23 = vsel %vm2574_vm6, %v2573_v49, -inf }
 0xb7c   :  { %2576 = vmax.xlane.f32.xlu0 %v2575_v23  ;;  %v2754_v23 = vld [vmem:[%s5790_s20 + $0xa0] sm:$0xff] }
 0xb7d   :  { %v3745_v21 = vpack.c.bf16 %v2756_v27, %v2754_v23  ;;  %v3005_v23 = vld [vmem:[%s5794_s7 + $0x90] sm:$0xff]  ;;  %v3008_v27 = vld [vmem:[%s5794_s7 + $0xa8] sm:$0xff] }
 0xc09   :  { %v2577_v0 = vpop.xlane.xlu0 %2576 }
 0xc0a   :  { %v2578_v62 = vsub.f32 %v2573_v49, %v2577_v0  ;;  %v3743_v49 = vpack.c.bf16 %v2757_v14, %v2755_v2  ;;  %v2923_v0 = vshrl.u32 %v5793_v12, 7  ;;  %v3004_v2 = vld [vmem:[%s5794_s7 + $0x88] sm:$0xff]  ;;  %v3006_v14 = vld [vmem:[%s5794_s7 + $0x98] sm:$0xff]  ;;  %v3011_v12 = vld [vmem:[%s5794_s7 + $0xc0] sm:$0xff] }
 0xc0c   :  { %v2579_v26 = vmul.f32 1.442695, %v2578_v62  ;;  %v5373_v62 = vsub.s32 0, %v2923_v0 }
 0xc0e   :  { %3909 = vpow2.f32 %v2579_v26  ;;  %v5375_v26 = vsub.s32 1, %v2923_v0  ;;  %v3013_v0 = vld [vmem:[%s5794_s7 + $0xd0] sm:$0xff]  ;;  %v2976_v35 = vrot.slane %v2935_v3, %v5373_v62 }
 0xc18   :  { %v3910_v19 = vpop.eup %3909 }
 0xc19   :  { %v2581_v36 = vsel %vm2574_vm6, %v3910_v19, 0.0 }
 0xc1a   :  { %2582 = vadd.xlane.f32.xlu1 %v2581_v36 }
 0xca7   :  { %v2583_v22 = vpop.xlane.xlu1 %2582 }
 0xca8   :  { %3911 = vrcp.f32 %v2583_v22 }
 0xcb2   :  { %v3912_v15 = vpop.eup %3911 }
 0xcb3   :  { %v2585_v6 = vmul.f32 %v3912_v15, %v3910_v19  ;;  %v2920_v19 = vld [vmem:[%s5792_s27] sm:$0x3]  ;;  %v3751_v15 = vpack.c.bf16 %v2990_v42, %v2988_v7  ;;  %v3021_v42 = vld [vmem:[%s5794_s7 + $0x110] sm:$0xff] }
 0xcb4   :  { %v2925_v36 = vrot.slane %v2920_v19, %v5373_v62  ;;  %v2929_v34 = vrot.slane %v2920_v19, %v5375_v26  ;;  %v3016_v19 = vld [vmem:[%s5794_s7 + $0xe8] sm:$0xff]  ;;  %v3019_v7 = vld [vmem:[%s5794_s7 + $0x100] sm:$0xff] }
 0xcb5   :  { %3628 = vmatmul.mubr.msk.f32.vlgmr.msra.gmra.mrb[18].mxu0 %vm989_vm13, %v2585_v6  ;;  %v2992_v6 = vld [vmem:[%s5794_s7 + $0x28] sm:$0xff]  ;;  %3752 = vmatprep.subr.bf16.mxu1 %v3751_v15 }
 0xcb6   :  { %3722 = vmatpush1.bf16.msk.msra.mxu0 %vm4186_vm2, %v3720_v1  ;;  %2839 = vmatprep.mubr.f32.mxu0 %v5772_v11  ;;  %vm2936_vm2 = vcmask 1041408   ;;  %v2989_v1 = vld [vmem:[%s5794_s7 + $0x10] sm:$0xff]  ;;  %v3024_v15 = vld [vmem:[%s5794_s7 + $0x128] sm:$0x3f] }
 0xcb7   :  { %3724 = vmatprep.subr.bf16.mxu0 %v3723_v8  ;;  %v2994_v8 = vld [vmem:[%s5794_s7 + $0x38] sm:$0xff]  ;;  %v3753_v4 = vpack.c.bf16 %v2989_v1, %v2987_v25  ;;  %v3785_v25 = vpack.c.bf16 %v3021_v42, %v3019_v7  ;;  %v3023_v1 = vld [vmem:[%s5794_s7 + $0x120] sm:$0x3f]  ;;  %v3181_v42 = vld [vmem:[%s4167_s17 + $0x68] sm:$0xff] }
 0xcb8   :  { %v3755_v33 = vpack.c.bf16 %v2994_v8, %v2992_v6  ;;  %v3180_v7 = vld [vmem:[%s4167_s17 + $0x60] sm:$0xff] }
 0xcb9   :  { %3388 = vmatmul.mubr.msk.f32.vlgmr.msra.gmra.mrb[20].mxu0 %vm235_vm3, %v2730_v38  ;;  %vm2938_vm3 = vcmask 173056   ;;  %3754 = vmatpush1.bf16.msra.mxu1 %v3753_v4 }
 0xcba   :  { %3726 = vmatpush1.bf16.msra.mxu0 %v3725_v5  ;;  %2913 = vmatprep.mubr.f32.mxu0 %v5772_v11  ;;  %v2996_v5 = vld [vmem:[%s5794_s7 + $0x48] sm:$0xff] }
 0xcbb   :  { %3728 = vmatprep.subr.bf16.mxu0 %v3727_v18  ;;  %v2998_v18 = vld [vmem:[%s5794_s7 + $0x58] sm:$0xff]  ;;  %3756 = vmatprep.subr.bf16.mxu1 %v3755_v33  ;;  %v2934_v33 = vld [vmem:[%s5795_s10] sm:$0x3] }
 0xcbc   :  { %v3759_v40 = vpack.c.bf16 %v2998_v18, %v2996_v5  ;;  %v2967_v57 = vrot.slane %v2934_v33, %v5375_v26  ;;  %v2963_v5 = vrot.slane %v2934_v33, %v5373_v62 }
 0xcbd   :  { %3758 = vmatpush1.bf16.msra.mxu1 %v3757_v30 }
 0xcbe   :  { %3730 = vmatpush1.bf16.msra.mxu0 %v3729_v28  ;;  %v3000_v28 = vld [vmem:[%s5794_s7 + $0x68] sm:$0xff]  ;;  %3760 = vmatprep.subr.bf16.mxu1 %v3759_v40  ;;  %v2980_v40 = vrot.slane %v2935_v3, %v5375_v26  ;;  %v3186_v3 = vld [vmem:[%s4167_s17 + $0x90] sm:$0x3f] }
 0xcbf   :  { %3732 = vmatprep.subr.bf16.mxu0 %v3731_v46  ;;  %v3002_v46 = vld [vmem:[%s5794_s7 + $0x78] sm:$0xff] }
 0xcc0   :  { %v3763_v61 = vpack.c.bf16 %v3002_v46, %v3000_v28 }
 0xcc1   :  { %3762 = vmatpush1.bf16.msra.mxu1 %v3761_v13 }
 0xcc2   :  { %3734 = vmatpush1.bf16.msra.mxu0 %v3733_v60  ;;  %v3765_v60 = vpack.c.bf16 %v3001_v55, %v2999_v48  ;;  %3764 = vmatprep.subr.bf16.mxu1 %v3763_v61 }
 0xcc3   :  { %3736 = vmatprep.subr.bf16.mxu0 %v3735_v41 }
 0xcc5   :  { %3766 = vmatpush1.bf16.msra.mxu1 %v3765_v60  ;;  %v3025_v60 = vld [vmem:[%s5799_s15] sm:$0x3] }
 0xcc6   :  { %3738 = vmatpush1.bf16.msra.mxu0 %v3737_v29 }
 0xcc7   :  { %3740 = vmatprep.subr.bf16.mxu0 %v3739_v43 }
 0xcca   :  { %3742 = vmatpush1.bf16.msra.mxu0 %v3741_v20  ;;  %v3003_v20 = vld [vmem:[%s5794_s7 + $0x80] sm:$0xff] }
 0xccb   :  { %3744 = vmatprep.subr.bf16.mxu0 %v3743_v49  ;;  %v3767_v49 = vpack.c.bf16 %v3006_v14, %v3004_v2  ;;  %v3769_v32 = vpack.c.bf16 %v3005_v23, %v3003_v20  ;;  %v3168_v2 = vld [vmem:[%s4167_s17] sm:$0xff]  ;;  %v3169_v14 = vld [vmem:[%s4167_s17 + $0x8] sm:$0xff]  ;;  %v3170_v20 = vld [vmem:[%s4167_s17 + $0x10] sm:$0xff] }
 0xccc   :  { %v3171_v23 = vld [vmem:[%s4167_s17 + $0x18] sm:$0xff] }
 0xccd   :  { %3768 = vmatprep.subr.bf16.mxu1 %v3767_v49  ;;  %v3788_v49 = vpack.c.bf16 %v3169_v14, %v3168_v2 }
 0xcce   :  { %3746 = vmatpush1.bf16.msra.mxu0 %v3745_v21  ;;  %v3771_v21 = vpack.c.bf16 %v3010_v53, %v3008_v27  ;;  %3770 = vmatpush1.bf16.msra.mxu1 %v3769_v32  ;;  %v3791_v27 = vpack.c.bf16 %v3171_v23, %v3170_v20  ;;  %v3172_v53 = vld [vmem:[%s4167_s17 + $0x20] sm:$0xff]  ;;  %v3173_v32 = vld [vmem:[%s4167_s17 + $0x28] sm:$0xff] }
 0xccf   :  { %3748 = vmatprep.subr.bf16.mxu0 %v3747_v16  ;;  %v3007_v16 = vld [vmem:[%s5794_s7 + $0xa0] sm:$0xff] }
 0xcd0   :  { %3772 = vmatprep.subr.bf16.mxu1 %v3771_v21  ;;  %v3794_v21 = vpack.c.bf16 %v3173_v32, %v3172_v53 }
 0xcd2   :  { %3750 = vmatpush1.bf16.msra.mxu0 %v3749_v54  ;;  %v3014_v54 = vld [vmem:[%s5794_s7 + $0xd8] sm:$0xff] }
 0xcd3   :  { %3787 = vmatprep.subr.bf16.mxu0 %v5773_v59 }
 0xd88   :  { %v2655_v56 = vpop.f32.mrb[18].mxu0 }
 0xd89   :  { %v3629_v24 = vpop.f32.mrb[19].mxu0  ;;  %3389 = vmatmul.mubr.msk.f32.vlgmr.msra.gmra.mrb[20].mxu0 %vm2494_vm1, %v2655_v56  ;;  %v3773_v56 = vpack.c.bf16 %v3009_v17, %v3007_v16  ;;  %v3174_v16 = vld [vmem:[%s4167_s17 + $0x30] sm:$0xff]  ;;  %v3175_v17 = vld [vmem:[%s4167_s17 + $0x38] sm:$0xff] }
 0xd8a   :  { %v3775_v24 = vpack.c.bf16 %v3014_v54, %v3012_v51  ;;  %3789 = vmatpush1.bf16.msra.mxu0 %v3788_v49  ;;  %v3797_v51 = vpack.c.bf16 %v3175_v17, %v3174_v16 }
 0xd8b   :  { %3774 = vmatpush1.bf16.msra.mxu1 %v3773_v56  ;;  %3790 = vmatprep.subr.bf16.mxu0 %v5773_v59 }
 0xd8c   :  { %3776 = vmatprep.subr.bf16.mxu1 %v3775_v24 }
 0xd8e   :  { %3792 = vmatpush1.bf16.msra.mxu0 %v3791_v27 }
 0xd8f   :  { %3793 = vmatprep.subr.bf16.mxu0 %v5773_v59 }
 0xd92   :  { %3795 = vmatpush1.bf16.msra.mxu0 %v3794_v21 }
 0xd93   :  { %3796 = vmatprep.subr.bf16.mxu0 %v5773_v59 }
 0xd96   :  { %3798 = vmatpush1.bf16.msra.mxu0 %v3797_v51 }
 0xd97   :  { %3799 = vmatprep.subr.bf16.mxu0 %v5773_v59 }
 0xe5c   :  { %v2915_v58 = vpop.f32.mrb[20].mxu0 }
 0xe5d   :  { %v2932_v52 = vadd.f32 %v2925_v36, %v2915_v58  ;;  %v2917_v31 = vpop.f32.mrb[21].mxu0  ;;  %v3018_v36 = vld [vmem:[%s5794_s7 + $0xf8] sm:$0xff] }
 0xe5e   :  { %v2933_v38 = vadd.f32 %v2929_v34, %v2917_v31  ;;  %v3777_v34 = vpack.c.bf16 %v3013_v0, %v3011_v12  ;;  %v3779_v58 = vpack.c.bf16 %v3018_v36, %v3016_v19  ;;  %v3017_v31 = vld [vmem:[%s5794_s7 + $0xf0] sm:$0xff] }
 0xe5f   :  { %v2937_v44 = vsel %vm2936_vm2, %v2932_v52, 0.0 }
 0xe60   :  { %v2939_v22 = vsel %vm2938_vm3, %v2933_v38, 0.0  ;;  %3778 = vmatpush1.bf16.msra.mxu1 %v3777_v34 }
 0xe61   :  { %v2940_v50 = vadd.f32 %v2939_v22, %v2937_v44  ;;  %v3022_v44 = vld [vmem:[%s5794_s7 + $0x118] sm:$0xff]  ;;  %3780 = vmatprep.subr.bf16.mxu1 %v3779_v58 }
 0xe63   :  { %2941 = vadd.xlane.f32.xlu0 %v2940_v50 }
 0xef0   :  { %v2942_v41 = vpop.xlane.xlu0 %2941 }
 0xef1   :  { %v2944_v9 = vmul.f32 0.006666667, %v2942_v41  ;;  %v3030_v41 = vrot.slane %v3025_v60, %v5373_v62 }
 0xef3   :  { %v5398_v63 = vsub.f32 %v2932_v52, %v2944_v9  ;;  %v2946_v37 = vsub.f32 %v2933_v38, %v2944_v9  ;;  %v3015_v52 = vld [vmem:[%s5794_s7 + $0xe0] sm:$0xff]  ;;  %v3020_v38 = vld [vmem:[%s5794_s7 + $0x108] sm:$0xff]  ;;  %v3034_v9 = vrot.slane %v3025_v60, %v5375_v26 }
 0xef4   :  { %v3781_v22 = vpack.c.bf16 %v3017_v31, %v3015_v52  ;;  %v3783_v50 = vpack.c.bf16 %v3022_v44, %v3020_v38  ;;  %v3176_v52 = vld [vmem:[%s4167_s17 + $0x40] sm:$0xff]  ;;  %v3177_v31 = vld [vmem:[%s4167_s17 + $0x48] sm:$0xff]  ;;  %v3178_v44 = vld [vmem:[%s4167_s17 + $0x50] sm:$0xff] }
 0xef5   :  { %v2947_v45 = vmul.f32 %v5398_v63, %v5398_v63  ;;  %v2948_v29 = vmul.f32 %v2946_v37, %v2946_v37  ;;  %v3800_v38 = vpack.c.bf16 %v3177_v31, %v3176_v52 }
 0xef6   :  { %3782 = vmatpush1.bf16.msra.mxu1 %v3781_v22  ;;  %v3179_v22 = vld [vmem:[%s4167_s17 + $0x58] sm:$0xff] }
 0xef7   :  { %v2949_v43 = vsel %vm2936_vm2, %v2947_v45, 0.0  ;;  %v2950_v39 = vsel %vm2938_vm3, %v2948_v29, 0.0  ;;  %3784 = vmatprep.subr.bf16.mxu1 %v3783_v50  ;;  %3801 = vmatpush1.bf16.msra.mxu0 %v3800_v38  ;;  %v3803_v50 = vpack.c.bf16 %v3179_v22, %v3178_v44 }
 0xef8   :  { %v2951_v10 = vadd.f32 %v2950_v39, %v2949_v43  ;;  %3802 = vmatprep.subr.bf16.mxu0 %v5773_v59 }
 0xefa   :  { %2952 = vadd.xlane.f32.xlu1 %v2951_v10  ;;  %3786 = vmatpush1.bf16.msra.mxu1 %v3785_v25  ;;  %v3806_v25 = vpack.c.bf16 %v3181_v42, %v3180_v7 }
 0xefb   :  { %3390 = vmatprep.subr.msk.mxu1 %vm5797_vm5, %v3024_v15  ;;  %3804 = vmatpush1.bf16.msra.mxu0 %v3803_v50  ;;  %v3182_v15 = vld [vmem:[%s4167_s17 + $0x70] sm:$0xff] }
 0xefc   :  { %3805 = vmatprep.subr.bf16.mxu0 %v5773_v59 }
 0xefe   :  { %3391 = vmatpush1.msk.msra.mxu1 %vm5798_vm8, %v3023_v1  ;;  %v3183_v1 = vld [vmem:[%s4167_s17 + $0x78] sm:$0xff] }
 0xeff   :  { %3807 = vmatpush1.bf16.msra.mxu0 %v3806_v25 }
 0xf00   :  { %3808 = vmatprep.subr.bf16.mxu0 %v5773_v59 }
 0xf87   :  { %v2953_v6 = vpop.xlane.xlu1 %2952 }
 0xf88   :  { %v2954_v8 = vmul.f32 0.006666667, %v2953_v6  ;;  %v3809_v6 = vpack.c.bf16 %v3183_v1, %v3182_v15 }
 0xf8a   :  { %v2955_v4 = vadd.f32 1e-05, %v2954_v8  ;;  %v3184_v8 = vld [vmem:[%s4167_s17 + $0x80] sm:$0xff]  ;;  %3810 = vmatpush1.bf16.msra.mxu0 %v3809_v6 }
 0xf8b   :  { %3811 = vmatprep.subr.bf16.mxu0 %v5773_v59 }
 0xf8c   :  { %3913 = vrsqrt.f32 %v2955_v4  ;;  %v3185_v4 = vld [vmem:[%s4167_s17 + $0x88] sm:$0xff]  ;;  %s3983_s17 = smov [#allocation2]  }
 0xf8d   :  { %v3812_v33 = vpack.c.bf16 %v3185_v4, %v3184_v8 }
 0xf8f   :  { %3813 = vmatpush1.bf16.msra.mxu0 %v3812_v33 }
 0xf90   :  { %3236 = vmatprep.subr.mxu0 %v5772_v11 }
 0xf93   :  { %3394 = vmatpush1.msk.msra.mxu0 %vm5801_vm10, %v3186_v3 }
 0xf96   :  { %v3914_v18 = vpop.eup %3913 }
 0xf97   :  { %v2958_v30 = vmul.f32 %v3914_v18, %v2946_v37  ;;  %v2957_v47 = vmul.f32 %v3914_v18, %v5398_v63 }
 0xf99   :  { %v2971_v28 = vmul.f32 %v2967_v57, %v2958_v30  ;;  %v2970_v46 = vmul.f32 %v2963_v5, %v2957_v47  ;;  %v3118_v30 = vld [vmem:[%s5800_s16] sm:$0x3] }
 0xf9a   :  { %v3148_v47 = vrot.slane %v3118_v30, %v5375_v26 }
 0xf9b   :  { %v2984_v13 = vadd.f32 %v2980_v40, %v2971_v28  ;;  %v2983_v61 = vadd.f32 %v2976_v35, %v2970_v46  ;;  %v3119_v40 = vld [vmem:[%s4162_s25] sm:$0x3]  ;;  %v3144_v35 = vrot.slane %v3118_v30, %v5373_v62  ;;  %s3278_s25 = sshll.u32 %s3983_s17, 4  ;;  %s3279_s25 = int_to_ptr.vmem [resolvable:$true] %s3278_s25 }
 0xf9c   :  { %v3157_v11 = vrot.slane %v3119_v40, %v5373_v62  ;;  %s3917_s18 = scalar_lea.vmem %s3279_s25, 32  ;;  %p3922_p1 = scmp.lt.s32.totalorder %s3279_s25, %s3279_s25 }
 0xf9d   :  { %v2986_v48 = vmax.f32 %v2984_v13, 0.0  ;;  %v2985_v55 = vmax.f32 %v2983_v61, 0.0  ;;  %v3161_v13 = vrot.slane %v3119_v40, %v5375_v26  ;;  %p3918_p0 = scmp.ne.s32.totalorder %s3279_s25, %s3917_s18  ;;  %p3923_p2 = scmp.lt.s32.totalorder %s3917_s18, %s3917_s18 }
 0xf9f   :  { %3392 = vmatprep.mubr.msk.f32.mxu1 %vm3037_vm9, %v2986_v48  ;;  %p3924_p3 = por %p3923_p2, %p3922_p1 }
 0xfa0   :  { %3112 = vmatmul.mubr.f32.vlgmr.msra.gmra.mrb[22].mxu1 %v2985_v55 }
 0xfa1   :  { %p3925_p4 = pnand %p3924_p3, %p3918_p0 }
0x1073   :  { %v3113_v63 = vpop.f32.mrb[22].mxu1 }
0x1074   :  { %v3114_v37 = vadd.f32 %v3113_v63, %v3030_v41  ;;  %v3115_v45 = vpop.f32.mrb[23].mxu1  ;;  %v3393_v63 = vld [vmem:[%s4172_s21] ss:$0 sm:$0xff] }
0x1075   :  { %v3116_v29 = vadd.f32 %v3115_v45, %v3034_v9 }
0x1076   :  { %v3120_v43 = vsel %vm2936_vm2, %v3114_v37, 0.0 }
0x1077   :  { %v3121_v39 = vsel %vm2938_vm3, %v3116_v29, 0.0 }
0x1078   :  { %v3122_v10 = vadd.f32 %v3121_v39, %v3120_v43 }
0x107a   :  { %3123 = vadd.xlane.f32.xlu0 %v3122_v10 }
0x1107   :  { %v3124_v54 = vpop.xlane.xlu0 %3123 }
0x1108   :  { %v3125_v56 = vmul.f32 0.006666667, %v3124_v54 }
0x110a   :  { %v3126_v24 = vsub.f32 %v3114_v37, %v3125_v56  ;;  %v3127_v12 = vsub.f32 %v3116_v29, %v3125_v56 }
0x110c   :  { %v3128_v0 = vmul.f32 %v3126_v24, %v3126_v24  ;;  %v3129_v19 = vmul.f32 %v3127_v12, %v3127_v12 }
0x110e   :  { %v3130_v36 = vsel %vm2936_vm2, %v3128_v0, 0.0  ;;  %v3131_v34 = vsel %vm2938_vm3, %v3129_v19, 0.0 }
0x110f   :  { %v3132_v58 = vadd.f32 %v3131_v34, %v3130_v36 }
0x1111   :  { %3133 = vadd.xlane.f32.xlu1 %v3132_v58 }
0x119e   :  { %v3134_v57 = vpop.xlane.xlu1 %3133 }
0x119f   :  { %v3135_v5 = vmul.f32 0.006666667, %v3134_v57 }
0x11a1   :  { %v3136_v18 = vadd.f32 1e-05, %v3135_v5 }
0x11a3   :  { %3915 = vrsqrt.f32 %v3136_v18 }
0x11ad   :  { %v3916_v28 = vpop.eup %3915 }
0x11ae   :  { %v3138_v46 = vmul.f32 %v3916_v28, %v3126_v24  ;;  %v3139_v59 = vmul.f32 %v3916_v28, %v3127_v12 }
0x11b0   :  { %v3152_v61 = vmul.f32 %v3148_v47, %v3139_v59  ;;  %v3151_v48 = vmul.f32 %v3144_v35, %v3138_v46 }
0x11b2   :  { %v3165_v55 = vadd.f32 %v3161_v13, %v3152_v61  ;;  %v3164_v60 = vadd.f32 %v3157_v11, %v3151_v48 }
0x11b4   :  { %v3167_v41 = vmax.f32 %v3165_v55, 0.0  ;;  %v3166_v9 = vmax.f32 %v3164_v60, 0.0 }
0x11b6   :  { %3395 = vmatprep.mubr.msk.f32.mxu0 %vm3037_vm9, %v3167_v41 }
0x11b7   :  { %3265 = vmatmul.mubr.f32.vlgmr.msra.gmra.mrb[22].mxu0 %v3166_v9 }
0x128a   :  { %v3266_v37 = vpop.f32.mrb[22].mxu0 }
0x128b   :  { %v3267_v45 = vadd.f32 %v3393_v63, %v3266_v37  ;;  %v3268_v29 = vpop.f32.mrb[23].mxu0 }
0x128d   :  { %3271 = vst.msk [vmem:[#allocation2] sm:$0x3] %vm3270_vm11, %v3267_v45 }
0x128e   :  { %3928 = shalt.err (!%p3925_p4)
}
0x128f   :  { %s3929_s22 = scalar_lea.hbm %s4177_s4, 32 }
0x1290   :  { %p3930_p5 = scmp.ne.s32.totalorder %s4177_s4, %s3929_s22  ;;  %p3933_p6 = scmp.lt.u32.totalorder %s3929_s22, %s4177_s4 }
0x1292   :  { %p3935_p7 = pnand %p3933_p6, %p3930_p5 }
0x1294   :  { %3938 = shalt.err (!%p3935_p7)
}
0x1295   :  { %3281 = dma.vmem_to_hbm [thread:$0]  %s3279_s25, 32, %s4177_s4, [#allocation3]  }
0x1296   :  { %3939 = dma.done.wait [#allocation3], 32  }
0x1297   :  { %3940 = vsyncadd [#allocation3], 4294967264 }
0x1298   :  { %3285 = vsyncpa [#allocation3], 1 }

</bundles_post_ra>
